<compile_context>
chip_gen: v7x
topology: tpu7x:2x2x1
jax: 0.10.0
libtpu: 0.0.40
codegen_flags: <defaults>
</compile_context>

<pallas_src>
import jax
import jax.numpy as jnp
from jax.experimental import pallas as pl
from jax.experimental.pallas import tpu as pltpu


def _cdiv(a: int, b: int) -> int:
    return -(-a // b)


def _round_up(n: int, m: int) -> int:
    return ((n + m - 1) // m) * m


def _pick_tile(n: int, tile_max: int) -> int:
    """Largest tile <= tile_max giving an even number (>=2) of ~equal steps."""
    steps = max(2, _cdiv(n, tile_max))
    if steps % 2:
        steps += 1  # even step count -> balanced split across v7x's 2 TCs
    return max(8, _round_up(_cdiv(n, steps), 8))


def encoder_kernel(x_ref, y_ref, wx_ref, v0_ref, d_ref, o_ref):
    """One batch tile:  out = x @ w_x + v0 + y * (v1 - v0).

    x_ref : (tile, x_dim)  compute dtype (bf16 or f32)
    y_ref : (tile, 1)      f32 (0.0 / 1.0)
    wx_ref: (x_dim, r_dim) compute dtype  (resident)
    v0_ref: (1, r_dim)     f32            (resident)
    d_ref : (1, r_dim)     f32            (resident)
    """
    acc = jnp.dot(x_ref[...], wx_ref[...], preferred_element_type=jnp.float32)
    o_ref[...] = acc + v0_ref[...] + y_ref[...] * d_ref[...]


def encoder_forward(x, y, emb, w, b, *, compute_dtype=jnp.bfloat16,
                    tile_max=8192, small_n_threshold=1024):
    """x:(N,x_dim), y:(N,) int in {0,1}, emb:(2,y_dim),
    w:(x_dim+y_dim, r_dim) pre-transposed so out = inp @ w + b, b:(r_dim,)."""
    n, x_dim = x.shape
    r_dim = w.shape[1]

    if n == 0:
        return jnp.zeros((0, r_dim), jnp.float32)

    # Fold the 2-row embedding through the y-half of the Linear (+ bias),
    # then express the per-row y contribution as a lerp v0 + y * d.
    w32 = w.astype(jnp.float32)
    v01 = emb.astype(jnp.float32) @ w32[x_dim:] + b.astype(jnp.float32)[None, :]
    v0 = v01[0:1, :]                    # (1, r_dim)
    d = v01[1:2, :] - v01[0:1, :]       # (1, r_dim)
    yf = y.astype(jnp.float32).reshape(n, 1)

    if n < small_n_threshold:
        # Tiny batch: pallas_call setup cost dwarfs the work; let XLA fuse it.
        return x.astype(jnp.float32) @ w32[:x_dim] + v0 + yf * d

    x_c = x.astype(compute_dtype)
    wx = w32[:x_dim].astype(compute_dtype)

    tile = _pick_tile(n, tile_max)
    grid = (_cdiv(n, tile),)

    cost = pl.CostEstimate(
        flops=2 * n * x_dim * r_dim,
        transcendentals=0,
        bytes_accessed=int(
            x_c.size * x_c.dtype.itemsize
            + yf.size * 4
            + wx.size * wx.dtype.itemsize
            + (v0.size + d.size) * 4
            + n * r_dim * 4
        ),
    )

    out = pl.pallas_call(
        encoder_kernel,
        out_shape=jax.ShapeDtypeStruct((n, r_dim), jnp.float32),
        grid=grid,
        in_specs=[
            pl.BlockSpec((tile, x_dim), lambda i: (i, 0)),    # x   (streamed)
            pl.BlockSpec((tile, 1), lambda i: (i, 0)),        # y   (streamed)
            pl.BlockSpec((x_dim, r_dim), lambda i: (0, 0)),   # w_x (resident)
            pl.BlockSpec((1, r_dim), lambda i: (0, 0)),       # v0  (resident)
            pl.BlockSpec((1, r_dim), lambda i: (0, 0)),       # d   (resident)
        ],
        out_specs=pl.BlockSpec((tile, r_dim), lambda i: (i, 0)),
        compiler_params=pltpu.CompilerParams(
            dimension_semantics=("parallel",),
            vmem_limit_bytes=32 * 1024 * 1024,
        ),
        cost_estimate=cost,
    )(x_c, yf, wx, v0, d)

    return out


def reference_forward(x, y, emb, w, b):
    y_emb = emb[y]                                   # (N, y_dim)
    inp = jnp.concatenate([x, y_emb], axis=1)
    return inp @ w + b


if __name__ == "__main__":
    # Shapes consistent with Encoder(x_dim, y_dim, h_dim, r_dim).
    x_dim, y_dim, r_dim = 32, 16, 32

    key = jax.random.PRNGKey(0)
    k_x, k_y, k_emb, k_w, k_b, k_xs, k_ys = jax.random.split(key, 7)

    emb = jax.random.normal(k_emb, (2, y_dim), dtype=jnp.float32)              # nn.Embedding(2, y_dim)
    # nn.Linear(x_dim + y_dim, r_dim): weight stored pre-transposed as (in, out).
    w = jax.random.normal(k_w, (x_dim + y_dim, r_dim), dtype=jnp.float32) * 0.1
    b = jax.random.normal(k_b, (r_dim,), dtype=jnp.float32) * 0.1

    # --- Pallas path: ragged N (not a multiple of the tile), >= 2 grid steps.
    N = 4100
    x = jax.random.normal(k_x, (N, x_dim), dtype=jnp.float32)
    y = jax.random.randint(k_y, (N,), 0, 2, dtype=jnp.int32)
    ref = reference_forward(x, y, emb, w, b)

    out_f32 = jax.block_until_ready(
        encoder_forward(x, y, emb, w, b, compute_dtype=jnp.float32))
    assert out_f32.shape == (N, r_dim)
    assert jnp.allclose(out_f32, ref, atol=1e-4, rtol=1e-4), "f32 mismatch"

    out_bf16 = jax.block_until_ready(encoder_forward(x, y, emb, w, b))  # bf16 stream
    assert out_bf16.shape == (N, r_dim)
    assert jnp.allclose(out_bf16, ref, atol=3e-2, rtol=3e-2), "bf16 mismatch"

    # --- Small-N fast path (plain XLA, no pallas_call).
    Ns = 8
    xs = jax.random.normal(k_xs, (Ns, x_dim), dtype=jnp.float32)
    ys = jax.random.randint(k_ys, (Ns,), 0, 2, dtype=jnp.int32)
    out_s = jax.block_until_ready(encoder_forward(xs, ys, emb, w, b))
    ref_s = reference_forward(xs, ys, emb, w, b)
    assert jnp.allclose(out_s, ref_s, atol=1e-5, rtol=1e-5), "small-N mismatch"

    print("KERNEL_OK")
</pallas_src>

<mosaic_0001>
module attributes {stable_mosaic.version = 11 : i64} {
  func.func @encoder_kernel(%arg0: i32, %arg1: memref<2056x32xf32, #tpu.memory_space<vmem>>, %arg2: memref<2056x1xf32, #tpu.memory_space<vmem>>, %arg3: memref<32x32xf32, #tpu.memory_space<vmem>>, %arg4: memref<1x32xf32, #tpu.memory_space<vmem>>, %arg5: memref<1x32xf32, #tpu.memory_space<vmem>>, %arg6: memref<2056x32xf32, #tpu.memory_space<vmem>>) attributes {dimension_semantics = [#tpu.dimension_semantics<parallel>], iteration_bounds = array<i64: 2>, scalar_prefetch = 0 : i64, scratch_operands = 0 : i64, tpu.core_type = #tpu.core_type<tc>, window_params = [{transform_indices = @transform_0, window_bounds = array<i64: 2056, 32>}, {transform_indices = @transform_1, window_bounds = array<i64: 2056, 1>}, {pipeline_mode = #tpu.pipeline_mode<synchronous>, transform_indices = @transform_2, window_bounds = array<i64: 32, 32>}, {pipeline_mode = #tpu.pipeline_mode<synchronous>, transform_indices = @transform_3, window_bounds = array<i64: 1, 32>}, {pipeline_mode = #tpu.pipeline_mode<synchronous>, transform_indices = @transform_4, window_bounds = array<i64: 1, 32>}, {transform_indices = @transform_5, window_bounds = array<i64: 2056, 32>}]} {
    %c0 = arith.constant 0 : index
    %c0_0 = arith.constant 0 : index
    %0 = vector.load %arg1[%c0, %c0_0] : memref<2056x32xf32, #tpu.memory_space<vmem>>, vector<2056x32xf32>
    %c0_1 = arith.constant 0 : index
    %c0_2 = arith.constant 0 : index
    %1 = vector.load %arg3[%c0_1, %c0_2] : memref<32x32xf32, #tpu.memory_space<vmem>>, vector<32x32xf32>
    %cst = arith.constant dense<0.000000e+00> : vector<2056x32xf32>
    %2 = tpu.matmul %0, %1, %cst {dimension_numbers = #tpu.dot_dimension_numbers<[1], [0], [0], [1], [0, 0, 1, 1], [], []>} : vector<2056x32xf32>, vector<32x32xf32>, vector<2056x32xf32> -> vector<2056x32xf32>
    %c0_3 = arith.constant 0 : index
    %c0_4 = arith.constant 0 : index
    %3 = vector.load %arg4[%c0_3, %c0_4] : memref<1x32xf32, #tpu.memory_space<vmem>>, vector<1x32xf32>
    %4 = vector.broadcast %3 : vector<1x32xf32> to vector<2056x32xf32>
    %5 = arith.addf %2, %4 : vector<2056x32xf32>
    %c0_5 = arith.constant 0 : index
    %c0_6 = arith.constant 0 : index
    %6 = vector.load %arg2[%c0_5, %c0_6] : memref<2056x1xf32, #tpu.memory_space<vmem>>, vector<2056x1xf32>
    %c0_7 = arith.constant 0 : index
    %c0_8 = arith.constant 0 : index
    %7 = vector.load %arg5[%c0_7, %c0_8] : memref<1x32xf32, #tpu.memory_space<vmem>>, vector<1x32xf32>
    %8 = vector.broadcast %6 : vector<2056x1xf32> to vector<2056x32xf32>
    %9 = vector.broadcast %7 : vector<1x32xf32> to vector<2056x32xf32>
    %10 = arith.mulf %8, %9 : vector<2056x32xf32>
    %11 = arith.addf %5, %10 : vector<2056x32xf32>
    %c0_9 = arith.constant 0 : index
    %c0_10 = arith.constant 0 : index
    %12 = vector.load %arg6[%c0_9, %c0_10] : memref<2056x32xf32, #tpu.memory_space<vmem>>, vector<2056x32xf32>
    tpu.vector_store %arg6[%c0_9, %c0_10], %11 {strides = array<i32>} : memref<2056x32xf32, #tpu.memory_space<vmem>>, vector<2056x32xf32>,
    return
  }
  func.func @transform_0(%arg0: i32) -> (i32, i32) {
    %c0_i32 = arith.constant 0 : i32
    %c0_i32_0 = arith.constant 0 : i32
    return %arg0, %c0_i32 : i32, i32
  }
  func.func @transform_1(%arg0: i32) -> (i32, i32) {
    %c0_i32 = arith.constant 0 : i32
    %c0_i32_0 = arith.constant 0 : i32
    return %arg0, %c0_i32 : i32, i32
  }
  func.func @transform_2(%arg0: i32) -> (i32, i32) {
    %c0_i32 = arith.constant 0 : i32
    %c0_i32_0 = arith.constant 0 : i32
    %c0_i32_1 = arith.constant 0 : i32
    return %c0_i32, %c0_i32_0 : i32, i32
  }
  func.func @transform_3(%arg0: i32) -> (i32, i32) {
    %c0_i32 = arith.constant 0 : i32
    %c0_i32_0 = arith.constant 0 : i32
    %c0_i32_1 = arith.constant 0 : i32
    return %c0_i32, %c0_i32_0 : i32, i32
  }
  func.func @transform_4(%arg0: i32) -> (i32, i32) {
    %c0_i32 = arith.constant 0 : i32
    %c0_i32_0 = arith.constant 0 : i32
    %c0_i32_1 = arith.constant 0 : i32
    return %c0_i32, %c0_i32_0 : i32, i32
  }
  func.func @transform_5(%arg0: i32) -> (i32, i32) {
    %c0_i32 = arith.constant 0 : i32
    %c0_i32_0 = arith.constant 0 : i32
    return %arg0, %c0_i32 : i32, i32
  }
}

</mosaic_0001>

<bundles_post_ra>
// kernel: tpu_custom_call.1
= control target key start
LH: loop header
LB: loop body
LE: loop exit
PB: predicated region body
PF: predicated region fallthrough
CT: control target
= control target key end

     0   :  { %s7035_s18 = smov 0   ;;  %s7037_s19 = smov 0   ;;  %s10293_s0 = inlined_call_operand.vmem [shape: f32[4100,32], index: 0, kind: input, shape index: {}]   ;;  %s10294_s1 = inlined_call_operand.vmem [shape: f32[4100,1], index: 1, kind: input, shape index: {}]   ;;  %s10295_s2 = inlined_call_operand.vmem [shape: f32[32,32], index: 2, kind: input, shape index: {}]   ;;  %s10296_s3 = inlined_call_operand.vmem [shape: f32[1,32], index: 3, kind: input, shape index: {}]   ;;  %s10297_s4 = inlined_call_operand.vmem [shape: f32[1,32], index: 4, kind: input, shape index: {}]   ;;  %s10298_s5 = inlined_call_operand.vmem [shape: f32[4100,32], index: 5, kind: output, shape index: {}]  }
   0x1   :  { %s7039_s20 = smov 0  }
   0x2 LB: > { %s7048_s21 = sadd.s32 4294967295, %s6967_s20   ;;  %s7050_s22 = sadd.s32 1, %s6967_s20   ;;  %s6967_s20 = sphi %s7039_s20, %s10474_s20   ;;  %s6963_s19 = sphi %s7037_s19, %s10473_s19   ;;  %s6959_s18 = sphi %s7035_s18, %s10472_s18  }
   0x3   : > { %s134_s23 = ssub.s32 %s6967_s20, %s7050_s22  ;;  %s137_s24 = sadd.s32 1, %s6963_s19 }
   0x4   : > { %p135_p0 = scmp.eq.s32.totalorder %s134_s23, 0  ;;  %p147_p1 = scmp.ne.s32.totalorder %s6963_s19, %s6959_s18 }
   0x5   : > { %p148_p2 = scmp.eq.s32.totalorder %s7048_s21, 1  ;;  %p5480_p3 = scmp.ge.s32.totalorder %s6967_s20, 1 }
   0x6   : > { %s7058_s25 = scalar_select %p135_p0, %s6963_s19, %s137_s24  }
   0x7   : > { %p7060_p4 = por %p148_p2, %p147_p1  ;;  %p215_p5 = scmp.lt.s32.totalorder %s6967_s20, 3 }
   0x9   : > { %p216_p6 = pnand %p5480_p3, %p215_p5 }
   0xb   : > { %219 = sbr.rel (%p216_p6) target bundleno = 829 (0x33d), region = 40 }
  0x12   : > { %v545_v0 = vld [vmem:[%s10295_s2] sm:$0xff]  ;;  %v546_v1 = vld [vmem:[%s10295_s2 + $0x8] sm:$0xff]  ;;  %v547_v2 = vld [vmem:[%s10295_s2 + $0x10] sm:$0xff]  ;;  %v7001_v3 = vmov 0.0|0.0   ;;  %s7077_s10 = smul.u32 257, %s7048_s21  ;;  %v7002_v6 = vmov 0  }
  0x13   : > { %6800 = vmatprep.subr.bf16.mxu0 %v7001_v3  ;;  %6806 = vmatprep.subr.bf16.mxu1 %v7001_v3  ;;  %v6801_v4 = vpack.c.bf16 %v546_v1, %v545_v0  ;;  %v548_v5 = vld [vmem:[%s10295_s2 + $0x18] sm:$0xff]  ;;  %vm7003_vm0 = vmmov 0   ;;  %v10299_v8 = vmov 0.0   ;;  %vm556_vm1 = vcmask 261120   ;;  %s252_s23 = sand.u32 1, %s6959_s18   ;;  %s5757_s30 = smul.u32 (%p7060_p4), 2056, %s7048_s21 }
  0x14   : > { %6904 = vset.pattern.permute.xlu1 %v7002_v6  ;;  %6903 = vset.pattern.permute.xlu0 %v7002_v6  ;;  %v6804_v7 = vpack.c.bf16 %v548_v5, %v547_v2  ;;  %p260_p7 = scmp.lt.s32.totalorder %s7077_s10, 512  ;;  %s7713_s28 = smul.u32 2056, %s252_s23 }
  0x15   : > { %6802 = vmatpush3.bf16.msra.mxu0 %v6801_v4  ;;  %6808 = vmatpush3.bf16.msra.mxu1 %v6801_v4  ;;  %s5006_s29 = ssub.s32 (%p7060_p4), 513, %s7077_s10  ;;  %s10094_s8 = scalar_lea.vmem (%p7060_p4), %s10298_s5, %s5757_s30  }
  0x16   : > { %6803 = vmatprep.subr.bf16.mxu0 %v7001_v3  ;;  %6807 = vmatprep.subr.bf16.mxu1 %v7001_v3  ;;  %s261_s11 = scalar_select %p260_p7, %s7077_s10, 512 }
  0x17   : > { %6029 = vmatprep.mubr.msk.f32.mxu0 %vm7003_vm0, %v10299_v8  ;;  %6416 = vmatprep.mubr.msk.f32.mxu1 %vm7003_vm0, %v10299_v8  ;;  %s7754_s18 = scalar_lea.vmem [#allocation2], %s7713_s28   ;;  %p5007_p8 = scmp.lt.s32.totalorder (%p7060_p4), %s5006_s29, 257 }
  0x18   : > { %s5481_s12 = sshll.u32 %s261_s11, 3 }
  0x19   : > { %6805 = vmatpush3.bf16.msra.mxu0 %v6804_v7  ;;  %6809 = vmatpush3.bf16.msra.mxu1 %v6804_v7  ;;  %s7088_s15 = scalar_lea.vmem %s10294_s1, %s5481_s12  ;;  %s7093_s20 = scalar_lea.vmem %s10293_s0, %s5481_s12 }
  0x1a   : > { %v2680_v9 = vld [vmem:[%s7088_s15 + $0x10] sm:$0xff]  ;;  %v2678_v10 = vld [vmem:[%s7088_s15] sm:$0xff]  ;;  %v417_v12 = vld [vmem:[%s7093_s20 + $0x408] sm:$0xff] }
  0x1b   : > { %v288_v11 = vld [vmem:[%s7093_s20] sm:$0xff]  ;;  %2948 = vperm.xlu1 %6904, %v2680_v9   ;;  %2938 = vperm.xlu0 %6903, %v2678_v10   ;;  %v2681_v13 = vld [vmem:[%s7088_s15 + $0x18] sm:$0xff]  ;;  %v2679_v14 = vld [vmem:[%s7088_s15 + $0x8] sm:$0xff] }
  0x1c   : > { %6030 = vmatmul.mubr.msk.f32.vlgmr.msra.gmra.mrb[0].mxu0 %vm556_vm1, %v288_v11  ;;  %6417 = vmatmul.mubr.msk.f32.vlgmr.msra.gmra.mrb[0].mxu1 %vm556_vm1, %v417_v12  ;;  %v289_v15 = vld [vmem:[%s7093_s20 + $0x8] sm:$0xff]  ;;  %v418_v16 = vld [vmem:[%s7093_s20 + $0x410] sm:$0xff]  ;;  %v2682_v18 = vld [vmem:[%s7088_s15 + $0x20] sm:$0xff] }
  0x1d   : > { %6032 = vmatprep.mubr.msk.f32.mxu0 %vm7003_vm0, %v10299_v8  ;;  %6419 = vmatprep.mubr.msk.f32.mxu1 %vm7003_vm0, %v10299_v8  ;;  %v2683_v17 = vld [vmem:[%s7088_s15 + $0x28] sm:$0xff]  ;;  %v290_v19 = vld [vmem:[%s7093_s20 + $0x10] sm:$0xff]  ;;  %v419_v20 = vld [vmem:[%s7093_s20 + $0x418] sm:$0xff] }
  0x1e   : > { %v2685_v21 = vld [vmem:[%s7088_s15 + $0x38] sm:$0xff]  ;;  %v2684_v22 = vld [vmem:[%s7088_s15 + $0x30] sm:$0xff]  ;;  %v420_v24 = vld [vmem:[%s7093_s20 + $0x420] sm:$0xff] }
  0x1f   : > { %2953 = vperm.xlu1 %6904, %v2681_v13   ;;  %2943 = vperm.xlu0 %6903, %v2679_v14   ;;  %v291_v23 = vld [vmem:[%s7093_s20 + $0x18] sm:$0xff]  ;;  %v2687_v25 = vld [vmem:[%s7088_s15 + $0x48] sm:$0xff]  ;;  %v2686_v26 = vld [vmem:[%s7088_s15 + $0x40] sm:$0xff] }
  0x20   : > { %6033 = vmatmul.mubr.msk.f32.gmra.mrb[2].mxu0 %vm556_vm1, %v289_v15  ;;  %6420 = vmatmul.mubr.msk.f32.gmra.mrb[2].mxu1 %vm556_vm1, %v418_v16  ;;  %v292_v27 = vld [vmem:[%s7093_s20 + $0x20] sm:$0xff]  ;;  %v421_v28 = vld [vmem:[%s7093_s20 + $0x428] sm:$0xff]  ;;  %v2689_v29 = vld [vmem:[%s7088_s15 + $0x58] sm:$0xff] }
  0x21   : > { %6035 = vmatprep.mubr.msk.f32.mxu0 %vm7003_vm0, %v10299_v8  ;;  %6422 = vmatprep.mubr.msk.f32.mxu1 %vm7003_vm0, %v10299_v8  ;;  %v2688_v30 = vld [vmem:[%s7088_s15 + $0x50] sm:$0xff]  ;;  %v293_v31 = vld [vmem:[%s7093_s20 + $0x28] sm:$0xff]  ;;  %v2690_v34 = vld [vmem:[%s7088_s15 + $0x60] sm:$0xff] }
  0x22   : > { %v422_v32 = vld [vmem:[%s7093_s20 + $0x430] sm:$0xff]  ;;  %v2691_v33 = vld [vmem:[%s7088_s15 + $0x68] sm:$0xff]  ;;  %v423_v36 = vld [vmem:[%s7093_s20 + $0x438] sm:$0xff] }
  0x23   : > { %2963 = vperm.xlu1 %6904, %v2683_v17   ;;  %2958 = vperm.xlu0 %6903, %v2682_v18   ;;  %v294_v35 = vld [vmem:[%s7093_s20 + $0x30] sm:$0xff]  ;;  %v2693_v37 = vld [vmem:[%s7088_s15 + $0x78] sm:$0xff]  ;;  %v424_v40 = vld [vmem:[%s7093_s20 + $0x440] sm:$0xff] }
  0x24   : > { %6036 = vmatmul.mubr.msk.f32.gmra.mrb[4].mxu0 %vm556_vm1, %v290_v19  ;;  %6423 = vmatmul.mubr.msk.f32.gmra.mrb[4].mxu1 %vm556_vm1, %v419_v20  ;;  %v2692_v38 = vld [vmem:[%s7088_s15 + $0x70] sm:$0xff]  ;;  %v295_v39 = vld [vmem:[%s7093_s20 + $0x38] sm:$0xff]  ;;  %v2695_v41 = vld [vmem:[%s7088_s15 + $0x88] sm:$0xff] }
  0x25   : > { %6038 = vmatprep.mubr.msk.f32.mxu0 %vm7003_vm0, %v10299_v8  ;;  %6425 = vmatprep.mubr.msk.f32.mxu1 %vm7003_vm0, %v10299_v8  ;;  %v2694_v42 = vld [vmem:[%s7088_s15 + $0x80] sm:$0xff]  ;;  %v425_v44 = vld [vmem:[%s7093_s20 + $0x448] sm:$0xff]  ;;  %v2697_v45 = vld [vmem:[%s7088_s15 + $0x98] sm:$0xff] }
  0x26   : > { %v296_v43 = vld [vmem:[%s7093_s20 + $0x40] sm:$0xff]  ;;  %v2696_v46 = vld [vmem:[%s7088_s15 + $0x90] sm:$0xff]  ;;  %v297_v47 = vld [vmem:[%s7093_s20 + $0x48] sm:$0xff] }
  0x27   : > { %2973 = vperm.xlu1 %6904, %v2685_v21   ;;  %2968 = vperm.xlu0 %6903, %v2684_v22   ;;  %v426_v48 = vld [vmem:[%s7093_s20 + $0x450] sm:$0xff]  ;;  %v2699_v49 = vld [vmem:[%s7088_s15 + $0xa8] sm:$0xff]  ;;  %v2698_v50 = vld [vmem:[%s7088_s15 + $0xa0] sm:$0xff] }
  0x28   : > { %6039 = vmatmul.mubr.msk.f32.gmra.mrb[6].mxu0 %vm556_vm1, %v291_v23  ;;  %6426 = vmatmul.mubr.msk.f32.gmra.mrb[6].mxu1 %vm556_vm1, %v420_v24  ;;  %v298_v51 = vld [vmem:[%s7093_s20 + $0x50] sm:$0xff]  ;;  %v427_v52 = vld [vmem:[%s7093_s20 + $0x458] sm:$0xff]  ;;  %v428_v56 = vld [vmem:[%s7093_s20 + $0x460] sm:$0xff] }
  0x29   : > { %6041 = vmatprep.mubr.msk.f32.mxu0 %vm7003_vm0, %v10299_v8  ;;  %6428 = vmatprep.mubr.msk.f32.mxu1 %vm7003_vm0, %v10299_v8  ;;  %v2701_v53 = vld [vmem:[%s7088_s15 + $0xb8] sm:$0xff]  ;;  %v2700_v54 = vld [vmem:[%s7088_s15 + $0xb0] sm:$0xff]  ;;  %v2703_v57 = vld [vmem:[%s7088_s15 + $0xc8] sm:$0xff] }
  0x2a   : > { %v299_v55 = vld [vmem:[%s7093_s20 + $0x58] sm:$0xff]  ;;  %v2702_v58 = vld [vmem:[%s7088_s15 + $0xc0] sm:$0xff]  ;;  %v429_v60 = vld [vmem:[%s7093_s20 + $0x468] sm:$0xff] }
  0x2b   : > { %2983 = vperm.xlu1 %6904, %v2687_v25   ;;  %2978 = vperm.xlu0 %6903, %v2686_v26   ;;  %v300_v59 = vld [vmem:[%s7093_s20 + $0x60] sm:$0xff]  ;;  %v2705_v61 = vld [vmem:[%s7088_s15 + $0xd8] sm:$0xff]  ;;  %v2704_v62 = vld [vmem:[%s7088_s15 + $0xd0] sm:$0xff] }
  0x2c   : > { %6042 = vmatmul.mubr.msk.f32.gmra.mrb[8].mxu0 %vm556_vm1, %v292_v27  ;;  %6429 = vmatmul.mubr.msk.f32.gmra.mrb[8].mxu1 %vm556_vm1, %v421_v28  ;;  %v301_v63 = vld [vmem:[%s7093_s20 + $0x68] sm:$0xff]  ;;  %v430_v0 = vld [vmem:[%s7093_s20 + $0x470] sm:$0xff]  ;;  %v2706_v2 = vld [vmem:[%s7088_s15 + $0xe0] sm:$0xff] }
  0x2d   : > { %6044 = vmatprep.mubr.msk.f32.mxu0 %vm7003_vm0, %v10299_v8  ;;  %6431 = vmatprep.mubr.msk.f32.mxu1 %vm7003_vm0, %v10299_v8  ;;  %v2707_v1 = vld [vmem:[%s7088_s15 + $0xe8] sm:$0xff]  ;;  %v302_v3 = vld [vmem:[%s7093_s20 + $0x70] sm:$0xff]  ;;  %v431_v4 = vld [vmem:[%s7093_s20 + $0x478] sm:$0xff] }
  0x2e   : > { %v2709_v5 = vld [vmem:[%s7088_s15 + $0xf8] sm:$0xff]  ;;  %v2708_v6 = vld [vmem:[%s7088_s15 + $0xf0] sm:$0xff]  ;;  %v432_v9 = vld [vmem:[%s7093_s20 + $0x480] sm:$0xff] }
  0x2f   : > { %2993 = vperm.xlu1 %6904, %v2689_v29   ;;  %2988 = vperm.xlu0 %6903, %v2688_v30   ;;  %v303_v7 = vld [vmem:[%s7093_s20 + $0x78] sm:$0xff]  ;;  %v2711_v10 = vld [vmem:[%s7088_s15 + $0x108] sm:$0xff]  ;;  %v2710_v11 = vld [vmem:[%s7088_s15 + $0x100] sm:$0xff] }
  0x30   : > { %6045 = vmatmul.mubr.msk.f32.gmra.mrb[10].mxu0 %vm556_vm1, %v293_v31  ;;  %6432 = vmatmul.mubr.msk.f32.gmra.mrb[10].mxu1 %vm556_vm1, %v422_v32  ;;  %v304_v12 = vld [vmem:[%s7093_s20 + $0x80] sm:$0xff]  ;;  %v433_v13 = vld [vmem:[%s7093_s20 + $0x488] sm:$0xff]  ;;  %v2713_v14 = vld [vmem:[%s7088_s15 + $0x118] sm:$0xff] }
  0x31   : > { %6047 = vmatprep.mubr.msk.f32.mxu0 %vm7003_vm0, %v10299_v8  ;;  %6434 = vmatprep.mubr.msk.f32.mxu1 %vm7003_vm0, %v10299_v8  ;;  %v2712_v15 = vld [vmem:[%s7088_s15 + $0x110] sm:$0xff]  ;;  %v305_v16 = vld [vmem:[%s7093_s20 + $0x88] sm:$0xff]  ;;  %v2714_v19 = vld [vmem:[%s7088_s15 + $0x120] sm:$0xff] }
  0x32   : > { %v434_v17 = vld [vmem:[%s7093_s20 + $0x490] sm:$0xff]  ;;  %v2715_v18 = vld [vmem:[%s7088_s15 + $0x128] sm:$0xff]  ;;  %v435_v21 = vld [vmem:[%s7093_s20 + $0x498] sm:$0xff] }
  0x33   : > { %3003 = vperm.xlu1 %6904, %v2691_v33   ;;  %2998 = vperm.xlu0 %6903, %v2690_v34   ;;  %v306_v20 = vld [vmem:[%s7093_s20 + $0x90] sm:$0xff]  ;;  %v2717_v22 = vld [vmem:[%s7088_s15 + $0x138] sm:$0xff]  ;;  %v436_v25 = vld [vmem:[%s7093_s20 + $0x4a0] sm:$0xff] }
  0x34   : > { %6048 = vmatmul.mubr.msk.f32.gmra.mrb[12].mxu0 %vm556_vm1, %v294_v35  ;;  %6435 = vmatmul.mubr.msk.f32.gmra.mrb[12].mxu1 %vm556_vm1, %v423_v36  ;;  %v2716_v23 = vld [vmem:[%s7088_s15 + $0x130] sm:$0xff]  ;;  %v307_v24 = vld [vmem:[%s7093_s20 + $0x98] sm:$0xff]  ;;  %v2719_v26 = vld [vmem:[%s7088_s15 + $0x148] sm:$0xff] }
  0x35   : > { %6050 = vmatprep.mubr.msk.f32.mxu0 %vm7003_vm0, %v10299_v8  ;;  %6437 = vmatprep.mubr.msk.f32.mxu1 %vm7003_vm0, %v10299_v8  ;;  %v2718_v27 = vld [vmem:[%s7088_s15 + $0x140] sm:$0xff]  ;;  %v437_v29 = vld [vmem:[%s7093_s20 + $0x4a8] sm:$0xff]  ;;  %v2721_v30 = vld [vmem:[%s7088_s15 + $0x158] sm:$0xff] }
  0x36   : > { %v308_v28 = vld [vmem:[%s7093_s20 + $0xa0] sm:$0xff]  ;;  %v2720_v31 = vld [vmem:[%s7088_s15 + $0x150] sm:$0xff]  ;;  %v309_v32 = vld [vmem:[%s7093_s20 + $0xa8] sm:$0xff] }
  0x37   : > { %3013 = vperm.xlu1 %6904, %v2693_v37   ;;  %3008 = vperm.xlu0 %6903, %v2692_v38   ;;  %v438_v33 = vld [vmem:[%s7093_s20 + $0x4b0] sm:$0xff]  ;;  %v2723_v34 = vld [vmem:[%s7088_s15 + $0x168] sm:$0xff]  ;;  %v2722_v35 = vld [vmem:[%s7088_s15 + $0x160] sm:$0xff] }
  0x38   : > { %6051 = vmatmul.mubr.msk.f32.gmra.mrb[14].mxu0 %vm556_vm1, %v295_v39  ;;  %6438 = vmatmul.mubr.msk.f32.gmra.mrb[14].mxu1 %vm556_vm1, %v424_v40  ;;  %v310_v36 = vld [vmem:[%s7093_s20 + $0xb0] sm:$0xff]  ;;  %v439_v37 = vld [vmem:[%s7093_s20 + $0x4b8] sm:$0xff] }
  0x39   : > { %6053 = vmatprep.mubr.msk.f32.mxu0 %vm7003_vm0, %v10299_v8  ;;  %6440 = vmatprep.mubr.msk.f32.mxu1 %vm7003_vm0, %v10299_v8  ;;  %v2725_v38 = vld [vmem:[%s7088_s15 + $0x178] sm:$0xff]  ;;  %v2724_v39 = vld [vmem:[%s7088_s15 + $0x170] sm:$0xff] }
  0x3a   : > { %v311_v40 = vld [vmem:[%s7093_s20 + $0xb8] sm:$0xff] }
  0x3b   : > { %3023 = vperm.xlu1 %6904, %v2695_v41   ;;  %3018 = vperm.xlu0 %6903, %v2694_v42   ;;  %v440_v41 = vld [vmem:[%s7093_s20 + $0x4c0] sm:$0xff]  ;;  %v2727_v42 = vld [vmem:[%s7088_s15 + $0x188] sm:$0xff] }
  0x3c   : > { %6054 = vmatmul.mubr.msk.f32.gmra.mrb[16].mxu0 %vm556_vm1, %v296_v43  ;;  %6441 = vmatmul.mubr.msk.f32.gmra.mrb[16].mxu1 %vm556_vm1, %v425_v44  ;;  %v2726_v43 = vld [vmem:[%s7088_s15 + $0x180] sm:$0xff] }
  0x3d   : > { %6056 = vmatprep.mubr.msk.f32.mxu0 %vm7003_vm0, %v10299_v8  ;;  %6443 = vmatprep.mubr.msk.f32.mxu1 %vm7003_vm0, %v10299_v8  ;;  %v312_v44 = vld [vmem:[%s7093_s20 + $0xc0] sm:$0xff] }
  0x3f   : > { %3033 = vperm.xlu1 %6904, %v2697_v45   ;;  %3028 = vperm.xlu0 %6903, %v2696_v46   ;;  %v441_v45 = vld [vmem:[%s7093_s20 + $0x4c8] sm:$0xff]  ;;  %v2729_v46 = vld [vmem:[%s7088_s15 + $0x198] sm:$0xff] }
  0x40   : > { %6057 = vmatmul.mubr.msk.f32.gmra.mrb[18].mxu0 %vm556_vm1, %v297_v47  ;;  %6444 = vmatmul.mubr.msk.f32.gmra.mrb[18].mxu1 %vm556_vm1, %v426_v48  ;;  %v2728_v47 = vld [vmem:[%s7088_s15 + $0x190] sm:$0xff]  ;;  %v313_v48 = vld [vmem:[%s7093_s20 + $0xc8] sm:$0xff] }
  0x41   : > { %6059 = vmatprep.mubr.msk.f32.mxu0 %vm7003_vm0, %v10299_v8  ;;  %6446 = vmatprep.mubr.msk.f32.mxu1 %vm7003_vm0, %v10299_v8 }
  0x43   : > { %3043 = vperm.xlu1 %6904, %v2699_v49   ;;  %3038 = vperm.xlu0 %6903, %v2698_v50   ;;  %v442_v49 = vld [vmem:[%s7093_s20 + $0x4d0] sm:$0xff]  ;;  %v2731_v50 = vld [vmem:[%s7088_s15 + $0x1a8] sm:$0xff] }
  0x44   : > { %6060 = vmatmul.mubr.msk.f32.gmra.mrb[20].mxu0 %vm556_vm1, %v298_v51  ;;  %6447 = vmatmul.mubr.msk.f32.gmra.mrb[20].mxu1 %vm556_vm1, %v427_v52  ;;  %v2730_v51 = vld [vmem:[%s7088_s15 + $0x1a0] sm:$0xff]  ;;  %v314_v52 = vld [vmem:[%s7093_s20 + $0xd0] sm:$0xff] }
  0x45   : > { %6062 = vmatprep.mubr.msk.f32.mxu0 %vm7003_vm0, %v10299_v8  ;;  %6449 = vmatprep.mubr.msk.f32.mxu1 %vm7003_vm0, %v10299_v8 }
  0x47   : > { %3053 = vperm.xlu1 %6904, %v2701_v53   ;;  %3048 = vperm.xlu0 %6903, %v2700_v54   ;;  %v443_v53 = vld [vmem:[%s7093_s20 + $0x4d8] sm:$0xff] }
  0x48   : > { %6063 = vmatmul.mubr.msk.f32.gmra.mrb[22].mxu0 %vm556_vm1, %v299_v55  ;;  %6450 = vmatmul.mubr.msk.f32.gmra.mrb[22].mxu1 %vm556_vm1, %v428_v56  ;;  %v2733_v54 = vld [vmem:[%s7088_s15 + $0x1b8] sm:$0xff]  ;;  %v2732_v55 = vld [vmem:[%s7088_s15 + $0x1b0] sm:$0xff] }
  0x49   : > { %6065 = vmatprep.mubr.msk.f32.mxu0 %vm7003_vm0, %v10299_v8  ;;  %6452 = vmatprep.mubr.msk.f32.mxu1 %vm7003_vm0, %v10299_v8  ;;  %v315_v56 = vld [vmem:[%s7093_s20 + $0xd8] sm:$0xff] }
  0x4b   : > { %3063 = vperm.xlu1 %6904, %v2703_v57   ;;  %3058 = vperm.xlu0 %6903, %v2702_v58   ;;  %v444_v57 = vld [vmem:[%s7093_s20 + $0x4e0] sm:$0xff]  ;;  %v2735_v58 = vld [vmem:[%s7088_s15 + $0x1c8] sm:$0xff] }
  0x4c   : > { %6066 = vmatmul.mubr.msk.f32.gmra.mrb[24].mxu0 %vm556_vm1, %v300_v59  ;;  %6453 = vmatmul.mubr.msk.f32.gmra.mrb[24].mxu1 %vm556_vm1, %v429_v60  ;;  %v2734_v59 = vld [vmem:[%s7088_s15 + $0x1c0] sm:$0xff] }
  0x4d   : > { %6068 = vmatprep.mubr.msk.f32.mxu0 %vm7003_vm0, %v10299_v8  ;;  %6455 = vmatprep.mubr.msk.f32.mxu1 %vm7003_vm0, %v10299_v8  ;;  %v316_v60 = vld [vmem:[%s7093_s20 + $0xe0] sm:$0xff] }
  0x4f   : > { %3073 = vperm.xlu1 %6904, %v2705_v61   ;;  %3068 = vperm.xlu0 %6903, %v2704_v62   ;;  %v445_v61 = vld [vmem:[%s7093_s20 + $0x4e8] sm:$0xff]  ;;  %v2737_v62 = vld [vmem:[%s7088_s15 + $0x1d8] sm:$0xff] }
  0x50   : > { %6069 = vmatmul.mubr.msk.f32.gmra.mrb[26].mxu0 %vm556_vm1, %v301_v63  ;;  %6456 = vmatmul.mubr.msk.f32.gmra.mrb[26].mxu1 %vm556_vm1, %v430_v0  ;;  %v2736_v63 = vld [vmem:[%s7088_s15 + $0x1d0] sm:$0xff]  ;;  %v317_v0 = vld [vmem:[%s7093_s20 + $0xe8] sm:$0xff] }
  0x51   : > { %6071 = vmatprep.mubr.msk.f32.mxu0 %vm7003_vm0, %v10299_v8  ;;  %6458 = vmatprep.mubr.msk.f32.mxu1 %vm7003_vm0, %v10299_v8 }
  0x53   : > { %3083 = vperm.xlu1 %6904, %v2707_v1   ;;  %3078 = vperm.xlu0 %6903, %v2706_v2   ;;  %v446_v1 = vld [vmem:[%s7093_s20 + $0x4f0] sm:$0xff]  ;;  %v2739_v2 = vld [vmem:[%s7088_s15 + $0x1e8] sm:$0xff] }
  0x54   : > { %6072 = vmatmul.mubr.msk.f32.gmra.mrb[28].mxu0 %vm556_vm1, %v302_v3  ;;  %6459 = vmatmul.mubr.msk.f32.gmra.mrb[28].mxu1 %vm556_vm1, %v431_v4  ;;  %v2738_v3 = vld [vmem:[%s7088_s15 + $0x1e0] sm:$0xff]  ;;  %v318_v4 = vld [vmem:[%s7093_s20 + $0xf0] sm:$0xff] }
  0x55   : > { %6074 = vmatprep.mubr.msk.f32.mxu0 %vm7003_vm0, %v10299_v8  ;;  %6461 = vmatprep.mubr.msk.f32.mxu1 %vm7003_vm0, %v10299_v8 }
  0x57   : > { %3093 = vperm.xlu1 %6904, %v2709_v5   ;;  %3088 = vperm.xlu0 %6903, %v2708_v6   ;;  %v447_v5 = vld [vmem:[%s7093_s20 + $0x4f8] sm:$0xff] }
  0x58   : > { %6075 = vmatmul.mubr.msk.f32.gmra.mrb[30].mxu0 %vm556_vm1, %v303_v7  ;;  %6462 = vmatmul.mubr.msk.f32.gmra.mrb[30].mxu1 %vm556_vm1, %v432_v9  ;;  %v2741_v6 = vld [vmem:[%s7088_s15 + $0x1f8] sm:$0xff]  ;;  %v2740_v7 = vld [vmem:[%s7088_s15 + $0x1f0] sm:$0xff] }
  0x59   : > { %6077 = vmatprep.mubr.msk.f32.mxu0 %vm7003_vm0, %v10299_v8  ;;  %6464 = vmatprep.mubr.msk.f32.mxu1 %vm7003_vm0, %v10299_v8  ;;  %v319_v9 = vld [vmem:[%s7093_s20 + $0xf8] sm:$0xff] }
  0x5b   : > { %3103 = vperm.xlu1 %6904, %v2711_v10   ;;  %3098 = vperm.xlu0 %6903, %v2710_v11   ;;  %v448_v10 = vld [vmem:[%s7093_s20 + $0x500] sm:$0xff]  ;;  %v2743_v11 = vld [vmem:[%s7088_s15 + $0x208] sm:$0xff] }
  0x5c   : > { %6078 = vmatmul.mubr.msk.f32.gmra.mrb[32].mxu0 %vm556_vm1, %v304_v12  ;;  %6465 = vmatmul.mubr.msk.f32.gmra.mrb[32].mxu1 %vm556_vm1, %v433_v13  ;;  %v2742_v12 = vld [vmem:[%s7088_s15 + $0x200] sm:$0xff] }
  0x5d   : > { %6080 = vmatprep.mubr.msk.f32.mxu0 %vm7003_vm0, %v10299_v8  ;;  %6467 = vmatprep.mubr.msk.f32.mxu1 %vm7003_vm0, %v10299_v8  ;;  %v320_v13 = vld [vmem:[%s7093_s20 + $0x100] sm:$0xff] }
  0x5f   : > { %3113 = vperm.xlu1 %6904, %v2713_v14   ;;  %3108 = vperm.xlu0 %6903, %v2712_v15   ;;  %v449_v14 = vld [vmem:[%s7093_s20 + $0x508] sm:$0xff] }
  0x60   : > { %6081 = vmatmul.mubr.msk.f32.gmra.mrb[34].mxu0 %vm556_vm1, %v305_v16  ;;  %6468 = vmatmul.mubr.msk.f32.gmra.mrb[34].mxu1 %vm556_vm1, %v434_v17  ;;  %v2745_v17 = vld [vmem:[%s7088_s15 + $0x218] sm:$0xff] }
  0x61   : > { %6083 = vmatprep.mubr.msk.f32.mxu0 %vm7003_vm0, %v10299_v8  ;;  %6470 = vmatprep.mubr.msk.f32.mxu1 %vm7003_vm0, %v10299_v8 }
  0x63   : > { %3123 = vperm.xlu1 %6904, %v2715_v18   ;;  %3118 = vperm.xlu0 %6903, %v2714_v19   ;;  %v2744_v18 = vld [vmem:[%s7088_s15 + $0x210] sm:$0xff]  ;;  %v321_v19 = vld [vmem:[%s7093_s20 + $0x108] sm:$0xff] }
  0x64   : > { %6084 = vmatmul.mubr.msk.f32.gmra.mrb[36].mxu0 %vm556_vm1, %v306_v20  ;;  %6471 = vmatmul.mubr.msk.f32.gmra.mrb[36].mxu1 %vm556_vm1, %v435_v21  ;;  %v450_v20 = vld [vmem:[%s7093_s20 + $0x510] sm:$0xff] }
  0x65   : > { %6086 = vmatprep.mubr.msk.f32.mxu0 %vm7003_vm0, %v10299_v8  ;;  %6473 = vmatprep.mubr.msk.f32.mxu1 %vm7003_vm0, %v10299_v8 }
  0x67   : > { %3133 = vperm.xlu1 %6904, %v2717_v22   ;;  %3128 = vperm.xlu0 %6903, %v2716_v23   ;;  %v2747_v23 = vld [vmem:[%s7088_s15 + $0x228] sm:$0xff] }
  0x68   : > { %6087 = vmatmul.mubr.msk.f32.gmra.mrb[38].mxu0 %vm556_vm1, %v307_v24  ;;  %6474 = vmatmul.mubr.msk.f32.gmra.mrb[38].mxu1 %vm556_vm1, %v436_v25  ;;  %v2746_v24 = vld [vmem:[%s7088_s15 + $0x220] sm:$0xff]  ;;  %v322_v25 = vld [vmem:[%s7093_s20 + $0x110] sm:$0xff] }
  0x69   : > { %6089 = vmatprep.mubr.msk.f32.mxu0 %vm7003_vm0, %v10299_v8  ;;  %6476 = vmatprep.mubr.msk.f32.mxu1 %vm7003_vm0, %v10299_v8 }
  0x6b   : > { %3143 = vperm.xlu1 %6904, %v2719_v26   ;;  %3138 = vperm.xlu0 %6903, %v2718_v27   ;;  %v451_v26 = vld [vmem:[%s7093_s20 + $0x518] sm:$0xff] }
  0x6c   : > { %6090 = vmatmul.mubr.msk.f32.gmra.mrb[40].mxu0 %vm556_vm1, %v308_v28  ;;  %6477 = vmatmul.mubr.msk.f32.gmra.mrb[40].mxu1 %vm556_vm1, %v437_v29  ;;  %v2749_v29 = vld [vmem:[%s7088_s15 + $0x238] sm:$0xff] }
  0x6d   : > { %6092 = vmatprep.mubr.msk.f32.mxu0 %vm7003_vm0, %v10299_v8  ;;  %6479 = vmatprep.mubr.msk.f32.mxu1 %vm7003_vm0, %v10299_v8 }
  0x6f   : > { %3153 = vperm.xlu1 %6904, %v2721_v30   ;;  %3148 = vperm.xlu0 %6903, %v2720_v31   ;;  %v2748_v30 = vld [vmem:[%s7088_s15 + $0x230] sm:$0xff]  ;;  %v323_v31 = vld [vmem:[%s7093_s20 + $0x118] sm:$0xff] }
  0x70   : > { %6093 = vmatmul.mubr.msk.f32.gmra.mrb[42].mxu0 %vm556_vm1, %v309_v32  ;;  %6480 = vmatmul.mubr.msk.f32.gmra.mrb[42].mxu1 %vm556_vm1, %v438_v33  ;;  %v452_v32 = vld [vmem:[%s7093_s20 + $0x520] sm:$0xff] }
  0x71   : > { %6095 = vmatprep.mubr.msk.f32.mxu0 %vm7003_vm0, %v10299_v8  ;;  %6482 = vmatprep.mubr.msk.f32.mxu1 %vm7003_vm0, %v10299_v8 }
  0x73   : > { %3163 = vperm.xlu1 %6904, %v2723_v34   ;;  %3158 = vperm.xlu0 %6903, %v2722_v35   ;;  %v2751_v35 = vld [vmem:[%s7088_s15 + $0x248] sm:$0xff] }
  0x74   : > { %6096 = vmatmul.mubr.msk.f32.gmra.mrb[44].mxu0 %vm556_vm1, %v310_v36  ;;  %6483 = vmatmul.mubr.msk.f32.gmra.mrb[44].mxu1 %vm556_vm1, %v439_v37  ;;  %v2750_v36 = vld [vmem:[%s7088_s15 + $0x240] sm:$0xff] }
  0x75   : > { %6098 = vmatprep.mubr.msk.f32.mxu0 %vm7003_vm0, %v10299_v8  ;;  %6485 = vmatprep.mubr.msk.f32.mxu1 %vm7003_vm0, %v10299_v8  ;;  %v324_v37 = vld [vmem:[%s7093_s20 + $0x120] sm:$0xff] }
  0x77   : > { %3173 = vperm.xlu1 %6904, %v2725_v38   ;;  %3168 = vperm.xlu0 %6903, %v2724_v39   ;;  %v453_v38 = vld [vmem:[%s7093_s20 + $0x528] sm:$0xff] }
  0x78   : > { %6099 = vmatmul.mubr.msk.f32.gmra.mrb[46].mxu0 %vm556_vm1, %v311_v40  ;;  %6486 = vmatmul.mubr.msk.f32.gmra.mrb[46].mxu1 %vm556_vm1, %v440_v41  ;;  %v2753_v41 = vld [vmem:[%s7088_s15 + $0x258] sm:$0xff] }
  0x79   : > { %6101 = vmatprep.mubr.msk.f32.mxu0 %vm7003_vm0, %v10299_v8  ;;  %6488 = vmatprep.mubr.msk.f32.mxu1 %vm7003_vm0, %v10299_v8 }
  0x7b   : > { %3183 = vperm.xlu1 %6904, %v2727_v42   ;;  %3178 = vperm.xlu0 %6903, %v2726_v43   ;;  %v2752_v42 = vld [vmem:[%s7088_s15 + $0x250] sm:$0xff]  ;;  %v325_v43 = vld [vmem:[%s7093_s20 + $0x128] sm:$0xff] }
  0x7c   : > { %6102 = vmatmul.mubr.msk.f32.gmra.mrb[48].mxu0 %vm556_vm1, %v312_v44  ;;  %6489 = vmatmul.mubr.msk.f32.gmra.mrb[48].mxu1 %vm556_vm1, %v441_v45  ;;  %v454_v44 = vld [vmem:[%s7093_s20 + $0x530] sm:$0xff] }
  0x7d   : > { %6104 = vmatprep.mubr.msk.f32.mxu0 %vm7003_vm0, %v10299_v8  ;;  %6491 = vmatprep.mubr.msk.f32.mxu1 %vm7003_vm0, %v10299_v8 }
  0x7f   : > { %3193 = vperm.xlu1 %6904, %v2729_v46   ;;  %3188 = vperm.xlu0 %6903, %v2728_v47   ;;  %v2755_v47 = vld [vmem:[%s7088_s15 + $0x268] sm:$0xff] }
  0x80   : > { %6105 = vmatmul.mubr.msk.f32.gmra.mrb[50].mxu0 %vm556_vm1, %v313_v48  ;;  %6492 = vmatmul.mubr.msk.f32.gmra.mrb[50].mxu1 %vm556_vm1, %v442_v49  ;;  %v2754_v48 = vld [vmem:[%s7088_s15 + $0x260] sm:$0xff]  ;;  %v326_v49 = vld [vmem:[%s7093_s20 + $0x130] sm:$0xff] }
  0x81   : > { %6107 = vmatprep.mubr.msk.f32.mxu0 %vm7003_vm0, %v10299_v8  ;;  %6494 = vmatprep.mubr.msk.f32.mxu1 %vm7003_vm0, %v10299_v8 }
  0x83   : > { %3203 = vperm.xlu1 %6904, %v2731_v50   ;;  %3198 = vperm.xlu0 %6903, %v2730_v51   ;;  %v455_v50 = vld [vmem:[%s7093_s20 + $0x538] sm:$0xff] }
  0x84   : > { %6108 = vmatmul.mubr.msk.f32.gmra.mrb[52].mxu0 %vm556_vm1, %v314_v52  ;;  %6495 = vmatmul.mubr.msk.f32.gmra.mrb[52].mxu1 %vm556_vm1, %v443_v53  ;;  %v2757_v53 = vld [vmem:[%s7088_s15 + $0x278] sm:$0xff] }
  0x85   : > { %6110 = vmatprep.mubr.msk.f32.mxu0 %vm7003_vm0, %v10299_v8  ;;  %6497 = vmatprep.mubr.msk.f32.mxu1 %vm7003_vm0, %v10299_v8 }
  0x87   : > { %3213 = vperm.xlu1 %6904, %v2733_v54   ;;  %3208 = vperm.xlu0 %6903, %v2732_v55   ;;  %v2756_v54 = vld [vmem:[%s7088_s15 + $0x270] sm:$0xff]  ;;  %v327_v55 = vld [vmem:[%s7093_s20 + $0x138] sm:$0xff] }
  0x88   : > { %6111 = vmatmul.mubr.msk.f32.gmra.mrb[54].mxu0 %vm556_vm1, %v315_v56  ;;  %6498 = vmatmul.mubr.msk.f32.gmra.mrb[54].mxu1 %vm556_vm1, %v444_v57  ;;  %v456_v56 = vld [vmem:[%s7093_s20 + $0x540] sm:$0xff] }
  0x89   : > { %6113 = vmatprep.mubr.msk.f32.mxu0 %vm7003_vm0, %v10299_v8  ;;  %6500 = vmatprep.mubr.msk.f32.mxu1 %vm7003_vm0, %v10299_v8 }
  0x8b   : > { %3223 = vperm.xlu1 %6904, %v2735_v58   ;;  %3218 = vperm.xlu0 %6903, %v2734_v59   ;;  %v2759_v59 = vld [vmem:[%s7088_s15 + $0x288] sm:$0xff] }
  0x8c   : > { %6114 = vmatmul.mubr.msk.f32.gmra.mrb[56].mxu0 %vm556_vm1, %v316_v60  ;;  %6501 = vmatmul.mubr.msk.f32.gmra.mrb[56].mxu1 %vm556_vm1, %v445_v61  ;;  %v2758_v60 = vld [vmem:[%s7088_s15 + $0x280] sm:$0xff] }
  0x8d   : > { %6116 = vmatprep.mubr.msk.f32.mxu0 %vm7003_vm0, %v10299_v8  ;;  %6503 = vmatprep.mubr.msk.f32.mxu1 %vm7003_vm0, %v10299_v8  ;;  %v328_v61 = vld [vmem:[%s7093_s20 + $0x140] sm:$0xff] }
  0x8f   : > { %3233 = vperm.xlu1 %6904, %v2737_v62   ;;  %3228 = vperm.xlu0 %6903, %v2736_v63   ;;  %v457_v62 = vld [vmem:[%s7093_s20 + $0x548] sm:$0xff] }
  0x90   : > { %6117 = vmatmul.mubr.msk.f32.gmra.mrb[58].mxu0 %vm556_vm1, %v317_v0  ;;  %6504 = vmatmul.mubr.msk.f32.gmra.mrb[58].mxu1 %vm556_vm1, %v446_v1  ;;  %v2761_v1 = vld [vmem:[%s7088_s15 + $0x298] sm:$0xff] }
  0x91   : > { %6119 = vmatprep.mubr.msk.f32.mxu0 %vm7003_vm0, %v10299_v8  ;;  %6506 = vmatprep.mubr.msk.f32.mxu1 %vm7003_vm0, %v10299_v8 }
  0x93   : > { %3243 = vperm.xlu1 %6904, %v2739_v2   ;;  %3238 = vperm.xlu0 %6903, %v2738_v3   ;;  %v2760_v2 = vld [vmem:[%s7088_s15 + $0x290] sm:$0xff]  ;;  %v329_v3 = vld [vmem:[%s7093_s20 + $0x148] sm:$0xff] }
  0x94   : > { %6120 = vmatmul.mubr.msk.f32.gmra.mrb[60].mxu0 %vm556_vm1, %v318_v4  ;;  %6507 = vmatmul.mubr.msk.f32.gmra.mrb[60].mxu1 %vm556_vm1, %v447_v5  ;;  %v458_v4 = vld [vmem:[%s7093_s20 + $0x550] sm:$0xff] }
  0x95   : > { %6122 = vmatprep.mubr.msk.f32.mxu0 %vm7003_vm0, %v10299_v8  ;;  %6509 = vmatprep.mubr.msk.f32.mxu1 %vm7003_vm0, %v10299_v8 }
  0x97   : > { %3253 = vperm.xlu1 %6904, %v2741_v6   ;;  %3248 = vperm.xlu0 %6903, %v2740_v7   ;;  %v2763_v7 = vld [vmem:[%s7088_s15 + $0x2a8] sm:$0xff] }
  0x98   : > { %6123 = vmatmul.mubr.msk.f32.gmra.mrb[62].mxu0 %vm556_vm1, %v319_v9  ;;  %6510 = vmatmul.mubr.msk.f32.gmra.mrb[62].mxu1 %vm556_vm1, %v448_v10  ;;  %v2762_v9 = vld [vmem:[%s7088_s15 + $0x2a0] sm:$0xff]  ;;  %v330_v10 = vld [vmem:[%s7093_s20 + $0x150] sm:$0xff] }
  0x99   : > { %6125 = vmatprep.mubr.msk.f32.mxu0 %vm7003_vm0, %v10299_v8  ;;  %6512 = vmatprep.mubr.msk.f32.mxu1 %vm7003_vm0, %v10299_v8 }
  0x9a   : > { %v7419_v15 = vpop.permute.xlu1 %2948  ;;  %v7421_v16 = vpop.permute.xlu0 %2938 }
  0x9b   : > { %3263 = vperm.xlu1 %6904, %v2743_v11   ;;  %3258 = vperm.xlu0 %6903, %v2742_v12   ;;  %v459_v11 = vld [vmem:[%s7093_s20 + $0x558] sm:$0xff] }
  0x9c   : > { %6126 = vmatmul.mubr.msk.f32.gmra.mrb[64].mxu0 %vm556_vm1, %v320_v13  ;;  %6513 = vmatmul.mubr.msk.f32.gmra.mrb[64].mxu1 %vm556_vm1, %v449_v14  ;;  %v2765_v14 = vld [vmem:[%s7088_s15 + $0x2b8] sm:$0xff] }
  0x9d   : > { %6128 = vmatprep.mubr.msk.f32.mxu0 %vm7003_vm0, %v10299_v8  ;;  %6515 = vmatprep.mubr.msk.f32.mxu1 %vm7003_vm0, %v10299_v8 }
  0x9e   : > { %v7433_v21 = vpop.permute.xlu1 %2953  ;;  %v7435_v22 = vpop.permute.xlu0 %2943 }
  0x9f   : > { %3273 = vperm.xlu1 %6904, %v2745_v17   ;;  %3268 = vperm.xlu0 %6903, %v2744_v18   ;;  %v2764_v17 = vld [vmem:[%s7088_s15 + $0x2b0] sm:$0xff]  ;;  %v331_v18 = vld [vmem:[%s7093_s20 + $0x158] sm:$0xff] }
  0xa0   : > { %6129 = vmatmul.mubr.msk.f32.gmra.mrb[66].mxu0 %vm556_vm1, %v321_v19  ;;  %6516 = vmatmul.mubr.msk.f32.gmra.mrb[66].mxu1 %vm556_vm1, %v450_v20  ;;  %v460_v19 = vld [vmem:[%s7093_s20 + $0x560] sm:$0xff] }
  0xa1   : > { %6131 = vmatprep.mubr.msk.f32.mxu0 %vm7003_vm0, %v10299_v8  ;;  %6518 = vmatprep.mubr.msk.f32.mxu1 %vm7003_vm0, %v10299_v8 }
  0xa2   : > { %v7447_v27 = vpop.permute.xlu1 %2963  ;;  %v7449_v28 = vpop.permute.xlu0 %2958 }
  0xa3   : > { %3283 = vperm.xlu1 %6904, %v2747_v23   ;;  %3278 = vperm.xlu0 %6903, %v2746_v24   ;;  %v2767_v24 = vld [vmem:[%s7088_s15 + $0x2c8] sm:$0xff] }
  0xa4   : > { %6132 = vmatmul.mubr.msk.f32.gmra.mrb[68].mxu0 %vm556_vm1, %v322_v25  ;;  %6519 = vmatmul.mubr.msk.f32.gmra.mrb[68].mxu1 %vm556_vm1, %v451_v26  ;;  %v2766_v25 = vld [vmem:[%s7088_s15 + $0x2c0] sm:$0xff] }
  0xa5   : > { %6134 = vmatprep.mubr.msk.f32.mxu0 %vm7003_vm0, %v10299_v8  ;;  %6521 = vmatprep.mubr.msk.f32.mxu1 %vm7003_vm0, %v10299_v8  ;;  %v332_v26 = vld [vmem:[%s7093_s20 + $0x160] sm:$0xff] }
  0xa6   : > { %v7461_v33 = vpop.permute.xlu1 %2973  ;;  %v7463_v34 = vpop.permute.xlu0 %2968 }
  0xa7   : > { %3293 = vperm.xlu1 %6904, %v2749_v29   ;;  %3288 = vperm.xlu0 %6903, %v2748_v30   ;;  %v461_v29 = vld [vmem:[%s7093_s20 + $0x568] sm:$0xff] }
  0xa8   : > { %6135 = vmatmul.mubr.msk.f32.gmra.mrb[70].mxu0 %vm556_vm1, %v323_v31  ;;  %6522 = vmatmul.mubr.msk.f32.gmra.mrb[70].mxu1 %vm556_vm1, %v452_v32  ;;  %v2769_v32 = vld [vmem:[%s7088_s15 + $0x2d8] sm:$0xff] }
  0xa9   : > { %6137 = vmatprep.mubr.msk.f32.mxu0 %vm7003_vm0, %v10299_v8  ;;  %6524 = vmatprep.mubr.msk.f32.mxu1 %vm7003_vm0, %v10299_v8 }
  0xaa   : > { %v7475_v39 = vpop.permute.xlu1 %2983  ;;  %v7477_v40 = vpop.permute.xlu0 %2978 }
  0xab   : > { %3303 = vperm.xlu1 %6904, %v2751_v35   ;;  %3298 = vperm.xlu0 %6903, %v2750_v36   ;;  %v2768_v35 = vld [vmem:[%s7088_s15 + $0x2d0] sm:$0xff]  ;;  %v333_v36 = vld [vmem:[%s7093_s20 + $0x168] sm:$0xff] }
  0xac   : > { %6138 = vmatmul.mubr.msk.f32.gmra.mrb[72].mxu0 %vm556_vm1, %v324_v37  ;;  %6525 = vmatmul.mubr.msk.f32.gmra.mrb[72].mxu1 %vm556_vm1, %v453_v38  ;;  %v462_v37 = vld [vmem:[%s7093_s20 + $0x570] sm:$0xff] }
  0xad   : > { %6140 = vmatprep.mubr.msk.f32.mxu0 %vm7003_vm0, %v10299_v8  ;;  %6527 = vmatprep.mubr.msk.f32.mxu1 %vm7003_vm0, %v10299_v8 }
  0xae   : > { %v7489_v45 = vpop.permute.xlu1 %2993  ;;  %v7491_v46 = vpop.permute.xlu0 %2988 }
  0xaf   : > { %3313 = vperm.xlu1 %6904, %v2753_v41   ;;  %3308 = vperm.xlu0 %6903, %v2752_v42   ;;  %v2771_v42 = vld [vmem:[%s7088_s15 + $0x2e8] sm:$0xff] }
  0xb0   : > { %6141 = vmatmul.mubr.msk.f32.gmra.mrb[74].mxu0 %vm556_vm1, %v325_v43  ;;  %6528 = vmatmul.mubr.msk.f32.gmra.mrb[74].mxu1 %vm556_vm1, %v454_v44  ;;  %v2770_v43 = vld [vmem:[%s7088_s15 + $0x2e0] sm:$0xff]  ;;  %v334_v44 = vld [vmem:[%s7093_s20 + $0x170] sm:$0xff] }
  0xb1   : > { %6143 = vmatprep.mubr.msk.f32.mxu0 %vm7003_vm0, %v10299_v8  ;;  %6530 = vmatprep.mubr.msk.f32.mxu1 %vm7003_vm0, %v10299_v8 }
  0xb2   : > { %v7503_v51 = vpop.permute.xlu1 %3003  ;;  %v7505_v52 = vpop.permute.xlu0 %2998 }
  0xb3   : > { %3323 = vperm.xlu1 %6904, %v2755_v47   ;;  %3318 = vperm.xlu0 %6903, %v2754_v48   ;;  %v463_v47 = vld [vmem:[%s7093_s20 + $0x578] sm:$0xff] }
  0xb4   : > { %6144 = vmatmul.mubr.msk.f32.gmra.mrb[76].mxu0 %vm556_vm1, %v326_v49  ;;  %6531 = vmatmul.mubr.msk.f32.gmra.mrb[76].mxu1 %vm556_vm1, %v455_v50  ;;  %v2773_v50 = vld [vmem:[%s7088_s15 + $0x2f8] sm:$0xff] }
  0xb5   : > { %6146 = vmatprep.mubr.msk.f32.mxu0 %vm7003_vm0, %v10299_v8  ;;  %6533 = vmatprep.mubr.msk.f32.mxu1 %vm7003_vm0, %v10299_v8 }
  0xb6   : > { %v7517_v57 = vpop.permute.xlu1 %3013  ;;  %v7519_v58 = vpop.permute.xlu0 %3008 }
  0xb7   : > { %3333 = vperm.xlu1 %6904, %v2757_v53   ;;  %3328 = vperm.xlu0 %6903, %v2756_v54   ;;  %v2772_v53 = vld [vmem:[%s7088_s15 + $0x2f0] sm:$0xff]  ;;  %v335_v54 = vld [vmem:[%s7093_s20 + $0x178] sm:$0xff] }
  0xb8   : > { %6147 = vmatmul.mubr.msk.f32.gmra.mrb[78].mxu0 %vm556_vm1, %v327_v55  ;;  %6534 = vmatmul.mubr.msk.f32.gmra.mrb[78].mxu1 %vm556_vm1, %v456_v56  ;;  %v464_v55 = vld [vmem:[%s7093_s20 + $0x580] sm:$0xff] }
  0xb9   : > { %6149 = vmatprep.mubr.msk.f32.mxu0 %vm7003_vm0, %v10299_v8  ;;  %6536 = vmatprep.mubr.msk.f32.mxu1 %vm7003_vm0, %v10299_v8 }
  0xba   : > { %v7531_v63 = vpop.permute.xlu1 %3023  ;;  %v7533_v0 = vpop.permute.xlu0 %3018 }
  0xbb   : > { %3343 = vperm.xlu1 %6904, %v2759_v59   ;;  %3338 = vperm.xlu0 %6903, %v2758_v60   ;;  %v2775_v60 = vld [vmem:[%s7088_s15 + $0x308] sm:$0xff] }
  0xbc   : > { %6150 = vmatmul.mubr.msk.f32.gmra.mrb[80].mxu0 %vm556_vm1, %v328_v61  ;;  %6537 = vmatmul.mubr.msk.f32.gmra.mrb[80].mxu1 %vm556_vm1, %v457_v62  ;;  %v2774_v61 = vld [vmem:[%s7088_s15 + $0x300] sm:$0xff] }
  0xbd   : > { %6152 = vmatprep.mubr.msk.f32.mxu0 %vm7003_vm0, %v10299_v8  ;;  %6539 = vmatprep.mubr.msk.f32.mxu1 %vm7003_vm0, %v10299_v8  ;;  %v336_v62 = vld [vmem:[%s7093_s20 + $0x180] sm:$0xff] }
  0xbe   : > { %v7545_v5 = vpop.permute.xlu1 %3033  ;;  %v7547_v6 = vpop.permute.xlu0 %3028 }
  0xbf   : > { %3353 = vperm.xlu1 %6904, %v2761_v1   ;;  %3348 = vperm.xlu0 %6903, %v2760_v2   ;;  %v465_v1 = vld [vmem:[%s7093_s20 + $0x588] sm:$0xff] }
  0xc0   : > { %6153 = vmatmul.mubr.msk.f32.gmra.mrb[82].mxu0 %vm556_vm1, %v329_v3  ;;  %6540 = vmatmul.mubr.msk.f32.gmra.mrb[82].mxu1 %vm556_vm1, %v458_v4  ;;  %v2777_v4 = vld [vmem:[%s7088_s15 + $0x318] sm:$0xff] }
  0xc1   : > { %6155 = vmatprep.mubr.msk.f32.mxu0 %vm7003_vm0, %v10299_v8  ;;  %6542 = vmatprep.mubr.msk.f32.mxu1 %vm7003_vm0, %v10299_v8 }
  0xc2   : > { %v7559_v12 = vpop.permute.xlu1 %3043  ;;  %v7561_v13 = vpop.permute.xlu0 %3038 }
  0xc3   : > { %3363 = vperm.xlu1 %6904, %v2763_v7   ;;  %3358 = vperm.xlu0 %6903, %v2762_v9   ;;  %v2776_v7 = vld [vmem:[%s7088_s15 + $0x310] sm:$0xff]  ;;  %v337_v9 = vld [vmem:[%s7093_s20 + $0x188] sm:$0xff] }
  0xc4   : > { %6156 = vmatmul.mubr.msk.f32.gmra.mrb[84].mxu0 %vm556_vm1, %v330_v10  ;;  %6543 = vmatmul.mubr.msk.f32.gmra.mrb[84].mxu1 %vm556_vm1, %v459_v11  ;;  %v466_v10 = vld [vmem:[%s7093_s20 + $0x590] sm:$0xff] }
  0xc5   : > { %6158 = vmatprep.mubr.msk.f32.mxu0 %vm7003_vm0, %v10299_v8  ;;  %6545 = vmatprep.mubr.msk.f32.mxu1 %vm7003_vm0, %v10299_v8 }
  0xc6   : > { %v7573_v20 = vpop.permute.xlu1 %3053  ;;  %v7575_v23 = vpop.permute.xlu0 %3048 }
  0xc7   : > { %3373 = vperm.xlu1 %6904, %v2765_v14   ;;  %3368 = vperm.xlu0 %6903, %v2764_v17   ;;  %v2779_v17 = vld [vmem:[%s7088_s15 + $0x328] sm:$0xff] }
  0xc8   : > { %6159 = vmatmul.mubr.msk.f32.gmra.mrb[86].mxu0 %vm556_vm1, %v331_v18  ;;  %6546 = vmatmul.mubr.msk.f32.gmra.mrb[86].mxu1 %vm556_vm1, %v460_v19  ;;  %v2778_v18 = vld [vmem:[%s7088_s15 + $0x320] sm:$0xff]  ;;  %v338_v19 = vld [vmem:[%s7093_s20 + $0x190] sm:$0xff] }
  0xc9   : > { %6161 = vmatprep.mubr.msk.f32.mxu0 %vm7003_vm0, %v10299_v8  ;;  %6548 = vmatprep.mubr.msk.f32.mxu1 %vm7003_vm0, %v10299_v8 }
  0xca   : > { %v7587_v30 = vpop.permute.xlu1 %3063  ;;  %v7589_v31 = vpop.permute.xlu0 %3058 }
  0xcb   : > { %3383 = vperm.xlu1 %6904, %v2767_v24   ;;  %3378 = vperm.xlu0 %6903, %v2766_v25   ;;  %v467_v24 = vld [vmem:[%s7093_s20 + $0x598] sm:$0xff] }
  0xcc   : > { %6162 = vmatmul.mubr.msk.f32.gmra.mrb[88].mxu0 %vm556_vm1, %v332_v26  ;;  %6549 = vmatmul.mubr.msk.f32.gmra.mrb[88].mxu1 %vm556_vm1, %v461_v29  ;;  %v2781_v29 = vld [vmem:[%s7088_s15 + $0x338] sm:$0xff] }
  0xcd   : > { %6164 = vmatprep.mubr.msk.f32.mxu0 %vm7003_vm0, %v10299_v8  ;;  %6551 = vmatprep.mubr.msk.f32.mxu1 %vm7003_vm0, %v10299_v8 }
  0xce   : > { %v7601_v38 = vpop.permute.xlu1 %3073  ;;  %v7603_v41 = vpop.permute.xlu0 %3068 }
  0xcf   : > { %3393 = vperm.xlu1 %6904, %v2769_v32   ;;  %3388 = vperm.xlu0 %6903, %v2768_v35   ;;  %v2780_v32 = vld [vmem:[%s7088_s15 + $0x330] sm:$0xff]  ;;  %v339_v35 = vld [vmem:[%s7093_s20 + $0x198] sm:$0xff] }
  0xd0   : > { %6165 = vmatmul.mubr.msk.f32.gmra.mrb[90].mxu0 %vm556_vm1, %v333_v36  ;;  %6552 = vmatmul.mubr.msk.f32.gmra.mrb[90].mxu1 %vm556_vm1, %v462_v37  ;;  %v468_v36 = vld [vmem:[%s7093_s20 + $0x5a0] sm:$0xff] }
  0xd1   : > { %6167 = vmatprep.mubr.msk.f32.mxu0 %vm7003_vm0, %v10299_v8  ;;  %6554 = vmatprep.mubr.msk.f32.mxu1 %vm7003_vm0, %v10299_v8 }
  0xd2   : > { %v7615_v48 = vpop.permute.xlu1 %3083  ;;  %v7617_v49 = vpop.permute.xlu0 %3078 }
  0xd3   : > { %3403 = vperm.xlu1 %6904, %v2771_v42   ;;  %3398 = vperm.xlu0 %6903, %v2770_v43   ;;  %v2783_v43 = vld [vmem:[%s7088_s15 + $0x348] sm:$0xff] }
  0xd4   : > { %6168 = vmatmul.mubr.msk.f32.gmra.mrb[92].mxu0 %vm556_vm1, %v334_v44  ;;  %6555 = vmatmul.mubr.msk.f32.gmra.mrb[92].mxu1 %vm556_vm1, %v463_v47  ;;  %v2782_v44 = vld [vmem:[%s7088_s15 + $0x340] sm:$0xff] }
  0xd5   : > { %6170 = vmatprep.mubr.msk.f32.mxu0 %vm7003_vm0, %v10299_v8  ;;  %6557 = vmatprep.mubr.msk.f32.mxu1 %vm7003_vm0, %v10299_v8  ;;  %v340_v47 = vld [vmem:[%s7093_s20 + $0x1a0] sm:$0xff] }
  0xd6   : > { %v7629_v56 = vpop.permute.xlu1 %3093  ;;  %v7631_v59 = vpop.permute.xlu0 %3088 }
  0xd7   : > { %3413 = vperm.xlu1 %6904, %v2773_v50   ;;  %3408 = vperm.xlu0 %6903, %v2772_v53   ;;  %v469_v50 = vld [vmem:[%s7093_s20 + $0x5a8] sm:$0xff] }
  0xd8   : > { %6171 = vmatmul.mubr.msk.f32.gmra.mrb[94].mxu0 %vm556_vm1, %v335_v54  ;;  %6558 = vmatmul.mubr.msk.f32.gmra.mrb[94].mxu1 %vm556_vm1, %v464_v55  ;;  %v7707_v55 = vld [vmem:[%s10297_s4] ss:$0 sm:$0xff] }
  0xd9   : > { %6173 = vmatprep.mubr.msk.f32.mxu0 %vm7003_vm0, %v10299_v8  ;;  %6560 = vmatprep.mubr.msk.f32.mxu1 %vm7003_vm0, %v10299_v8 }
  0xda   : > { %v7643_v2 = vpop.permute.xlu1 %3103  ;;  %v7645_v3 = vpop.permute.xlu0 %3098 }
  0xdb   : > { %3423 = vperm.xlu1 %6904, %v2775_v60   ;;  %3418 = vperm.xlu0 %6903, %v2774_v61   ;;  %v2785_v60 = vld [vmem:[%s7088_s15 + $0x358] sm:$0xff]  ;;  %v2784_v61 = vld [vmem:[%s7088_s15 + $0x350] sm:$0xff] }
  0xdc   : > { %6174 = vmatmul.mubr.msk.f32.gmra.mrb[96].mxu0 %vm556_vm1, %v336_v62  ;;  %6561 = vmatmul.mubr.msk.f32.gmra.mrb[96].mxu1 %vm556_vm1, %v465_v1  ;;  %v7718_v62 = vld [vmem:[%s10296_s3] ss:$0 sm:$0xff]  ;;  %v341_v1 = vld [vmem:[%s7093_s20 + $0x1a8] sm:$0xff] }
  0xdd   : > { %6176 = vmatprep.mubr.msk.f32.mxu0 %vm7003_vm0, %v10299_v8  ;;  %6563 = vmatprep.mubr.msk.f32.mxu1 %vm7003_vm0, %v10299_v8 }
  0xde   : > { %v7657_v11 = vpop.permute.xlu1 %3113  ;;  %v7659_v14 = vpop.permute.xlu0 %3108 }
  0xdf   : > { %3433 = vperm.xlu1 %6904, %v2777_v4   ;;  %3428 = vperm.xlu0 %6903, %v2776_v7   ;;  %v470_v4 = vld [vmem:[%s7093_s20 + $0x5b0] sm:$0xff]  ;;  %v4227_v7 = vmul.f32 %v7707_v55, %v7421_v16  ;;  %v2787_v16 = vld [vmem:[%s7088_s15 + $0x368] sm:$0xff] }
  0xe0   : > { %6177 = vmatmul.mubr.msk.f32.gmra.mrb[98].mxu0 %vm556_vm1, %v337_v9  ;;  %6564 = vmatmul.mubr.msk.f32.gmra.mrb[98].mxu1 %vm556_vm1, %v466_v10 }
  0xe1   : > { %6179 = vmatprep.mubr.msk.f32.mxu0 %vm7003_vm0, %v10299_v8  ;;  %6566 = vmatprep.mubr.msk.f32.mxu1 %vm7003_vm0, %v10299_v8 }
  0xe2   : > { %v7671_v25 = vpop.permute.xlu1 %3123  ;;  %v7673_v26 = vpop.permute.xlu0 %3118 }
  0xe3   : > { %3443 = vperm.xlu1 %6904, %v2779_v17   ;;  %3438 = vperm.xlu0 %6903, %v2778_v18  }
  0xe4   : > { %6180 = vmatmul.mubr.msk.f32.gmra.mrb[100].mxu0 %vm556_vm1, %v338_v19  ;;  %6567 = vmatmul.mubr.msk.f32.gmra.mrb[100].mxu1 %vm556_vm1, %v467_v24 }
  0xe5   : > { %6182 = vmatprep.mubr.msk.f32.mxu0 %vm7003_vm0, %v10299_v8  ;;  %6569 = vmatprep.mubr.msk.f32.mxu1 %vm7003_vm0, %v10299_v8 }
  0xe6   : > { %v7685_v37 = vpop.permute.xlu1 %3133  ;;  %v7687_v42 = vpop.permute.xlu0 %3128 }
  0xe7   : > { %3453 = vperm.xlu1 %6904, %v2781_v29   ;;  %3448 = vperm.xlu0 %6903, %v2780_v32   ;;  %v2786_v29 = vld [vmem:[%s7088_s15 + $0x360] sm:$0xff] }
  0xe8   : > { %6183 = vmatmul.mubr.msk.f32.gmra.mrb[102].mxu0 %vm556_vm1, %v339_v35  ;;  %6570 = vmatmul.mubr.msk.f32.gmra.mrb[102].mxu1 %vm556_vm1, %v468_v36  ;;  %v342_v35 = vld [vmem:[%s7093_s20 + $0x1b0] sm:$0xff]  ;;  %v471_v36 = vld [vmem:[%s7093_s20 + $0x5b8] sm:$0xff] }
  0xe9   : > { %6185 = vmatprep.mubr.msk.f32.mxu0 %vm7003_vm0, %v10299_v8  ;;  %6572 = vmatprep.mubr.msk.f32.mxu1 %vm7003_vm0, %v10299_v8 }
  0xea   : > { %v7699_v53 = vpop.permute.xlu1 %3143  ;;  %v7701_v54 = vpop.permute.xlu0 %3138 }
  0xeb   : > { %3463 = vperm.xlu1 %6904, %v2783_v43   ;;  %3458 = vperm.xlu0 %6903, %v2782_v44  }
  0xec   : > { %6186 = vmatmul.mubr.msk.f32.gmra.mrb[104].mxu0 %vm556_vm1, %v340_v47  ;;  %6573 = vmatmul.mubr.msk.f32.gmra.mrb[104].mxu1 %vm556_vm1, %v469_v50 }
  0xed   : > { %6188 = vmatprep.mubr.msk.f32.mxu0 %vm7003_vm0, %v10299_v8  ;;  %6575 = vmatprep.mubr.msk.f32.mxu1 %vm7003_vm0, %v10299_v8 }
  0xee   : > { %v7728_v9 = vpop.permute.xlu1 %3153  ;;  %v7730_v10 = vpop.permute.xlu0 %3148 }
  0xef   : > { %3473 = vperm.xlu1 %6904, %v2785_v60   ;;  %3468 = vperm.xlu0 %6903, %v2784_v61   ;;  %v1394_v17 = vpop.f32.mrb[0].mxu0  ;;  %v7732_v18 = vpop.f32.mrb[0].mxu1  ;;  %v4228_v61 = vmul.f32 %v7707_v55, %v7435_v22  ;;  %v343_v22 = vld [vmem:[%s7093_s20 + $0x1b8] sm:$0xff] }
  0xf0   : > { %v1395_v19 = vadd.f32 %v7718_v62, %v1394_v17  ;;  %v6031_v24 = vpop.f32.mrb[1].mxu0  ;;  %6189 = vmatmul.mubr.msk.f32.gmra.mrb[106].mxu0 %vm556_vm1, %v341_v1  ;;  %6576 = vmatmul.mubr.msk.f32.gmra.mrb[106].mxu1 %vm556_vm1, %v470_v4  ;;  %v6418_v32 = vpop.f32.mrb[1].mxu1  ;;  %v2788_v17 = vld [vmem:[%s7088_s15 + $0x370] sm:$0xff] }
  0xf1   : > { %6191 = vmatprep.mubr.msk.f32.mxu0 %vm7003_vm0, %v10299_v8  ;;  %6578 = vmatprep.mubr.msk.f32.mxu1 %vm7003_vm0, %v10299_v8  ;;  %v472_v24 = vld [vmem:[%s7093_s20 + $0x5c0] sm:$0xff] }
  0xf2   : > { %v4484_v43 = vadd.f32 %v4227_v7, %v1395_v19  ;;  %v7745_v44 = vpop.permute.xlu1 %3163  ;;  %v7747_v47 = vpop.permute.xlu0 %3158  ;;  %v2789_v7 = vld [vmem:[%s7088_s15 + $0x378] sm:$0xff] }
  0xf3   : > { %3483 = vperm.xlu1 %6904, %v2787_v16   ;;  %3478 = vperm.xlu0 %6903, %v2786_v29   ;;  %v1399_v50 = vpop.f32.mrb[2].mxu0  ;;  %v7749_v60 = vpop.f32.mrb[2].mxu1 }
  0xf4   : > { %4741 = vst.msk [vmem:[%s7754_s18] sm:$0xff] %vm556_vm1, %v4484_v43  ;;  %v1400_v1 = vadd.f32 %v7718_v62, %v1399_v50  ;;  %v6034_v4 = vpop.f32.mrb[3].mxu0  ;;  %6192 = vmatmul.mubr.msk.f32.gmra.mrb[108].mxu0 %vm556_vm1, %v342_v35  ;;  %6579 = vmatmul.mubr.msk.f32.gmra.mrb[108].mxu1 %vm556_vm1, %v471_v36  ;;  %v6421_v19 = vpop.f32.mrb[3].mxu1  ;;  %v4229_v43 = vmul.f32 %v7707_v55, %v7419_v15  ;;  %v344_v15 = vld [vmem:[%s7093_s20 + $0x1c0] sm:$0xff] }
  0xf5   : > { %6194 = vmatprep.mubr.msk.f32.mxu0 %vm7003_vm0, %v10299_v8  ;;  %6581 = vmatprep.mubr.msk.f32.mxu1 %vm7003_vm0, %v10299_v8 }
  0xf6   : > { %v4485_v16 = vadd.f32 %v4228_v61, %v1400_v1  ;;  %v7769_v29 = vpop.permute.xlu1 %3173  ;;  %v7771_v32 = vpop.permute.xlu0 %3168  ;;  %v2791_v61 = vld [vmem:[%s7088_s15 + $0x388] sm:$0xff]  ;;  %v2790_v1 = vld [vmem:[%s7088_s15 + $0x380] sm:$0xff] }
  0xf7   : > { %10302 = vst [vmem:[#allocation3_spill] sm:$0xff] %v7769_v29  ;;  %3493 = vperm.xlu1 %6904, %v2789_v7   ;;  %3488 = vperm.xlu0 %6903, %v2788_v17   ;;  %v1404_v35 = vpop.f32.mrb[4].mxu0  ;;  %v7773_v36 = vpop.f32.mrb[4].mxu1  ;;  %v473_v17 = vld [vmem:[%s7093_s20 + $0x5c8] sm:$0xff] }
  0xf8   : > { %4742 = vst.msk [vmem:[%s7754_s18 + $0x8] sm:$0xff] %vm556_vm1, %v4485_v16  ;;  %v1405_v50 = vadd.f32 %v7718_v62, %v1404_v35  ;;  %v6037_v4 = vpop.f32.mrb[5].mxu0  ;;  %6195 = vmatmul.mubr.msk.f32.gmra.mrb[110].mxu0 %vm556_vm1, %v343_v22  ;;  %6582 = vmatmul.mubr.msk.f32.gmra.mrb[110].mxu1 %vm556_vm1, %v472_v24  ;;  %v6424_v7 = vpop.f32.mrb[5].mxu1 }
  0xf9   : > { %6197 = vmatprep.mubr.msk.f32.mxu0 %vm7003_vm0, %v10299_v8  ;;  %6584 = vmatprep.mubr.msk.f32.mxu1 %vm7003_vm0, %v10299_v8  ;;  %v4230_v4 = vmul.f32 %v7707_v55, %v7433_v21  ;;  %v345_v21 = vld [vmem:[%s7093_s20 + $0x1c8] sm:$0xff] }
  0xfa   : > { %v4486_v19 = vadd.f32 %v4229_v43, %v1405_v50  ;;  %v7790_v16 = vpop.permute.xlu1 %3183  ;;  %v7792_v22 = vpop.permute.xlu0 %3178  ;;  %v2793_v43 = vld [vmem:[%s7088_s15 + $0x398] sm:$0xff]  ;;  %v2792_v50 = vld [vmem:[%s7088_s15 + $0x390] sm:$0xff] }
  0xfb   : > { %10303 = vst [vmem:[#allocation4_spill] sm:$0xff] %v7790_v16  ;;  %10304 = vst [vmem:[#allocation5_spill] sm:$0xff] %v7792_v22  ;;  %3503 = vperm.xlu1 %6904, %v2791_v61   ;;  %3498 = vperm.xlu0 %6903, %v2790_v1   ;;  %v1409_v24 = vpop.f32.mrb[6].mxu0  ;;  %v7794_v35 = vpop.f32.mrb[6].mxu1  ;;  %v10305_v1 = vmov 0.0   ;;  %v4231_v16 = vmul.f32 %v7707_v55, %v7449_v28  ;;  %v346_v28 = vld [vmem:[%s7093_s20 + $0x1d0] sm:$0xff] }
  0xfc   : > { %4743 = vst.msk [vmem:[%s7754_s18 + $0x10] sm:$0xff] %vm556_vm1, %v4486_v19  ;;  %v1410_v7 = vadd.f32 %v7718_v62, %v1409_v24  ;;  %v6040_v8 = vpop.f32.mrb[7].mxu0  ;;  %6198 = vmatmul.mubr.msk.f32.gmra.mrb[112].mxu0 %vm556_vm1, %v344_v15  ;;  %6585 = vmatmul.mubr.msk.f32.gmra.mrb[112].mxu1 %vm556_vm1, %v473_v17  ;;  %v6427_v61 = vpop.f32.mrb[7].mxu1  ;;  %v474_v19 = vld [vmem:[%s7093_s20 + $0x5d0] sm:$0xff] }
  0xfd   : > { %6200 = vmatprep.mubr.msk.f32.mxu0 %vm7003_vm0, %v10305_v1  ;;  %6587 = vmatprep.mubr.msk.f32.mxu1 %vm7003_vm0, %v10305_v1 }
  0xfe   : > { %v4487_v24 = vadd.f32 %v4230_v4, %v1410_v7  ;;  %v7811_v8 = vpop.permute.xlu1 %3193  ;;  %v7813_v15 = vpop.permute.xlu0 %3188  ;;  %v2795_v4 = vld [vmem:[%s7088_s15 + $0x3a8] sm:$0xff]  ;;  %v2794_v7 = vld [vmem:[%s7088_s15 + $0x3a0] sm:$0xff] }
  0xff   : > { %10306 = vst [vmem:[#allocation6_spill] sm:$0xff] %v7811_v8  ;;  %10307 = vst [vmem:[#allocation7_spill] sm:$0xff] %v7813_v15  ;;  %3513 = vperm.xlu1 %6904, %v2793_v43   ;;  %3508 = vperm.xlu0 %6903, %v2792_v50   ;;  %v1414_v17 = vpop.f32.mrb[8].mxu0  ;;  %v7815_v61 = vpop.f32.mrb[8].mxu1  ;;  %v475_v50 = vld [vmem:[%s7093_s20 + $0x5d8] sm:$0xff] }
 0x100   : > { %4744 = vst.msk [vmem:[%s7754_s18 + $0x18] sm:$0xff] %vm556_vm1, %v4487_v24  ;;  %v1415_v22 = vadd.f32 %v7718_v62, %v1414_v17  ;;  %v6043_v29 = vpop.f32.mrb[9].mxu0  ;;  %6201 = vmatmul.mubr.msk.f32.gmra.mrb[114].mxu0 %vm556_vm1, %v345_v21  ;;  %6588 = vmatmul.mubr.msk.f32.gmra.mrb[114].mxu1 %vm556_vm1, %v474_v19  ;;  %v6430_v43 = vpop.f32.mrb[9].mxu1 }
 0x101   : > { %6203 = vmatprep.mubr.msk.f32.mxu0 %vm7003_vm0, %v10305_v1  ;;  %6590 = vmatprep.mubr.msk.f32.mxu1 %vm7003_vm0, %v10305_v1  ;;  %v4232_v43 = vmul.f32 %v7707_v55, %v7447_v27  ;;  %v347_v27 = vld [vmem:[%s7093_s20 + $0x1d8] sm:$0xff] }
 0x102   : > { %v4488_v24 = vadd.f32 %v4231_v16, %v1415_v22  ;;  %v7832_v29 = vpop.permute.xlu1 %3203  ;;  %v7834_v21 = vpop.permute.xlu0 %3198  ;;  %v2797_v16 = vld [vmem:[%s7088_s15 + $0x3b8] sm:$0xff]  ;;  %v2796_v22 = vld [vmem:[%s7088_s15 + $0x3b0] sm:$0xff] }
 0x103   : > { %10308 = vst [vmem:[#allocation8_spill] sm:$0xff] %v7832_v29  ;;  %10309 = vst [vmem:[#allocation9_spill] sm:$0xff] %v7834_v21  ;;  %3523 = vperm.xlu1 %6904, %v2795_v4   ;;  %3518 = vperm.xlu0 %6903, %v2794_v7   ;;  %v1419_v19 = vpop.f32.mrb[10].mxu0  ;;  %v7836_v17 = vpop.f32.mrb[10].mxu1  ;;  %v476_v7 = vld [vmem:[%s7093_s20 + $0x5e0] sm:$0xff] }
 0x104   : > { %4745 = vst.msk [vmem:[%s7754_s18 + $0x20] sm:$0xff] %vm556_vm1, %v4488_v24  ;;  %v1420_v8 = vadd.f32 %v7718_v62, %v1419_v19  ;;  %v6046_v15 = vpop.f32.mrb[11].mxu0  ;;  %6204 = vmatmul.mubr.msk.f32.gmra.mrb[116].mxu0 %vm556_vm1, %v346_v28  ;;  %6591 = vmatmul.mubr.msk.f32.gmra.mrb[116].mxu1 %vm556_vm1, %v475_v50  ;;  %v6433_v4 = vpop.f32.mrb[11].mxu1 }
 0x105   : > { %6206 = vmatprep.mubr.msk.f32.mxu0 %vm7003_vm0, %v10305_v1  ;;  %6593 = vmatprep.mubr.msk.f32.mxu1 %vm7003_vm0, %v10305_v1  ;;  %v4233_v4 = vmul.f32 %v7707_v55, %v7463_v34  ;;  %v348_v34 = vld [vmem:[%s7093_s20 + $0x1e0] sm:$0xff] }
 0x106   : > { %v4489_v24 = vadd.f32 %v4232_v43, %v1420_v8  ;;  %v7853_v15 = vpop.permute.xlu1 %3213  ;;  %v7855_v28 = vpop.permute.xlu0 %3208  ;;  %v2799_v8 = vld [vmem:[%s7088_s15 + $0x3c8] sm:$0xff]  ;;  %v2798_v43 = vld [vmem:[%s7088_s15 + $0x3c0] sm:$0xff] }
 0x107   : > { %10310 = vst [vmem:[#allocation10_spill] sm:$0xff] %v7853_v15  ;;  %10311 = vst [vmem:[#allocation11_spill] sm:$0xff] %v7855_v28  ;;  %3533 = vperm.xlu1 %6904, %v2797_v16   ;;  %3528 = vperm.xlu0 %6903, %v2796_v22   ;;  %v1424_v50 = vpop.f32.mrb[12].mxu0  ;;  %v7857_v19 = vpop.f32.mrb[12].mxu1  ;;  %v477_v22 = vld [vmem:[%s7093_s20 + $0x5e8] sm:$0xff] }
 0x108   : > { %4746 = vst.msk [vmem:[%s7754_s18 + $0x28] sm:$0xff] %vm556_vm1, %v4489_v24  ;;  %v1425_v29 = vadd.f32 %v7718_v62, %v1424_v50  ;;  %v6049_v21 = vpop.f32.mrb[13].mxu0  ;;  %6207 = vmatmul.mubr.msk.f32.gmra.mrb[118].mxu0 %vm556_vm1, %v347_v27  ;;  %6594 = vmatmul.mubr.msk.f32.gmra.mrb[118].mxu1 %vm556_vm1, %v476_v7  ;;  %v6436_v16 = vpop.f32.mrb[13].mxu1 }
 0x109   : > { %6209 = vmatprep.mubr.msk.f32.mxu0 %vm7003_vm0, %v10305_v1  ;;  %6596 = vmatprep.mubr.msk.f32.mxu1 %vm7003_vm0, %v10305_v1  ;;  %v4234_v16 = vmul.f32 %v7707_v55, %v7461_v33  ;;  %v349_v33 = vld [vmem:[%s7093_s20 + $0x1e8] sm:$0xff] }
 0x10a   : > { %v4490_v24 = vadd.f32 %v4233_v4, %v1425_v29  ;;  %v7874_v21 = vpop.permute.xlu1 %3223  ;;  %v7876_v27 = vpop.permute.xlu0 %3218  ;;  %v2801_v29 = vld [vmem:[%s7088_s15 + $0x3d8] sm:$0xff]  ;;  %v2800_v4 = vld [vmem:[%s7088_s15 + $0x3d0] sm:$0xff] }
 0x10b   : > { %10312 = vst [vmem:[#allocation12_spill] sm:$0xff] %v7874_v21  ;;  %10313 = vst [vmem:[#allocation13_spill] sm:$0xff] %v7876_v27  ;;  %3543 = vperm.xlu1 %6904, %v2799_v8   ;;  %3538 = vperm.xlu0 %6903, %v2798_v43   ;;  %v1429_v7 = vpop.f32.mrb[14].mxu0  ;;  %v7878_v50 = vpop.f32.mrb[14].mxu1  ;;  %v478_v43 = vld [vmem:[%s7093_s20 + $0x5f0] sm:$0xff] }
 0x10c   : > { %4747 = vst.msk [vmem:[%s7754_s18 + $0x30] sm:$0xff] %vm556_vm1, %v4490_v24  ;;  %v1430_v15 = vadd.f32 %v7718_v62, %v1429_v7  ;;  %v6052_v28 = vpop.f32.mrb[15].mxu0  ;;  %6210 = vmatmul.mubr.msk.f32.gmra.mrb[120].mxu0 %vm556_vm1, %v348_v34  ;;  %6597 = vmatmul.mubr.msk.f32.gmra.mrb[120].mxu1 %vm556_vm1, %v477_v22  ;;  %v6439_v8 = vpop.f32.mrb[15].mxu1 }
 0x10d   : > { %6212 = vmatprep.mubr.msk.f32.mxu0 %vm7003_vm0, %v10305_v1  ;;  %6599 = vmatprep.mubr.msk.f32.mxu1 %vm7003_vm0, %v10305_v1  ;;  %v4235_v8 = vmul.f32 %v7707_v55, %v7477_v40  ;;  %v350_v40 = vld [vmem:[%s7093_s20 + $0x1f0] sm:$0xff] }
 0x10e   : > { %v4491_v24 = vadd.f32 %v4234_v16, %v1430_v15  ;;  %v7895_v28 = vpop.permute.xlu1 %3233  ;;  %v7897_v34 = vpop.permute.xlu0 %3228  ;;  %v2803_v15 = vld [vmem:[%s7088_s15 + $0x3e8] sm:$0xff]  ;;  %v2802_v16 = vld [vmem:[%s7088_s15 + $0x3e0] sm:$0xff] }
 0x10f   : > { %10314 = vst [vmem:[#allocation14_spill] sm:$0xff] %v7895_v28  ;;  %10315 = vst [vmem:[#allocation15_spill] sm:$0xff] %v7897_v34  ;;  %3553 = vperm.xlu1 %6904, %v2801_v29   ;;  %3548 = vperm.xlu0 %6903, %v2800_v4   ;;  %v1434_v22 = vpop.f32.mrb[16].mxu0  ;;  %v7899_v7 = vpop.f32.mrb[16].mxu1  ;;  %v479_v4 = vld [vmem:[%s7093_s20 + $0x5f8] sm:$0xff] }
 0x110   : > { %4748 = vst.msk [vmem:[%s7754_s18 + $0x38] sm:$0xff] %vm556_vm1, %v4491_v24  ;;  %v1435_v21 = vadd.f32 %v7718_v62, %v1434_v22  ;;  %v6055_v27 = vpop.f32.mrb[17].mxu0  ;;  %6213 = vmatmul.mubr.msk.f32.gmra.mrb[122].mxu0 %vm556_vm1, %v349_v33  ;;  %6600 = vmatmul.mubr.msk.f32.gmra.mrb[122].mxu1 %vm556_vm1, %v478_v43  ;;  %v6442_v29 = vpop.f32.mrb[17].mxu1 }
 0x111   : > { %6215 = vmatprep.mubr.msk.f32.mxu0 %vm7003_vm0, %v10305_v1  ;;  %6602 = vmatprep.mubr.msk.f32.mxu1 %vm7003_vm0, %v10305_v1  ;;  %v4236_v29 = vmul.f32 %v7707_v55, %v7475_v39  ;;  %v351_v39 = vld [vmem:[%s7093_s20 + $0x1f8] sm:$0xff] }
 0x112   : > { %v4492_v24 = vadd.f32 %v4235_v8, %v1435_v21  ;;  %v7916_v27 = vpop.permute.xlu1 %3243  ;;  %v7918_v33 = vpop.permute.xlu0 %3238  ;;  %v2805_v21 = vld [vmem:[%s7088_s15 + $0x3f8] sm:$0xff]  ;;  %v2804_v8 = vld [vmem:[%s7088_s15 + $0x3f0] sm:$0xff] }
 0x113   : > { %10316 = vst [vmem:[#allocation16_spill] sm:$0xff] %v7916_v27  ;;  %10317 = vst [vmem:[#allocation17_spill] sm:$0xff] %v7918_v33  ;;  %3563 = vperm.xlu1 %6904, %v2803_v15   ;;  %3558 = vperm.xlu0 %6903, %v2802_v16   ;;  %v1439_v43 = vpop.f32.mrb[18].mxu0  ;;  %v7920_v22 = vpop.f32.mrb[18].mxu1  ;;  %v480_v16 = vld [vmem:[%s7093_s20 + $0x600] sm:$0xff] }
 0x114   : > { %4749 = vst.msk [vmem:[%s7754_s18 + $0x40] sm:$0xff] %vm556_vm1, %v4492_v24  ;;  %v1440_v28 = vadd.f32 %v7718_v62, %v1439_v43  ;;  %v6058_v34 = vpop.f32.mrb[19].mxu0  ;;  %6216 = vmatmul.mubr.msk.f32.gmra.mrb[124].mxu0 %vm556_vm1, %v350_v40  ;;  %6603 = vmatmul.mubr.msk.f32.gmra.mrb[124].mxu1 %vm556_vm1, %v479_v4  ;;  %v6445_v15 = vpop.f32.mrb[19].mxu1 }
 0x115   : > { %6218 = vmatprep.mubr.msk.f32.mxu0 %vm7003_vm0, %v10305_v1  ;;  %6605 = vmatprep.mubr.msk.f32.mxu1 %vm7003_vm0, %v10305_v1  ;;  %v4237_v15 = vmul.f32 %v7707_v55, %v7491_v46  ;;  %v352_v46 = vld [vmem:[%s7093_s20 + $0x200] sm:$0xff] }
 0x116   : > { %v4493_v24 = vadd.f32 %v4236_v29, %v1440_v28  ;;  %v7937_v34 = vpop.permute.xlu1 %3253  ;;  %v7939_v40 = vpop.permute.xlu0 %3248  ;;  %v2807_v28 = vld [vmem:[%s7088_s15 + $0x408] sm:$0xff]  ;;  %v2806_v29 = vld [vmem:[%s7088_s15 + $0x400] sm:$0xff] }
 0x117   : > { %10318 = vst [vmem:[#allocation18_spill] sm:$0xff] %v7937_v34  ;;  %10319 = vst [vmem:[#allocation19_spill] sm:$0xff] %v7939_v40  ;;  %3573 = vperm.xlu1 %6904, %v2805_v21   ;;  %3568 = vperm.xlu0 %6903, %v2804_v8   ;;  %v1444_v4 = vpop.f32.mrb[20].mxu0  ;;  %v7941_v43 = vpop.f32.mrb[20].mxu1  ;;  %v481_v8 = vld [vmem:[%s7093_s20 + $0x608] sm:$0xff] }
 0x118   : > { %4750 = vst.msk [vmem:[%s7754_s18 + $0x48] sm:$0xff] %vm556_vm1, %v4493_v24  ;;  %v1445_v27 = vadd.f32 %v7718_v62, %v1444_v4  ;;  %v6061_v33 = vpop.f32.mrb[21].mxu0  ;;  %6219 = vmatmul.mubr.msk.f32.gmra.mrb[126].mxu0 %vm556_vm1, %v351_v39  ;;  %6606 = vmatmul.mubr.msk.f32.gmra.mrb[126].mxu1 %vm556_vm1, %v480_v16  ;;  %v6448_v21 = vpop.f32.mrb[21].mxu1 }
 0x119   : > { %6221 = vmatprep.mubr.msk.f32.mxu0 %vm7003_vm0, %v10305_v1  ;;  %6608 = vmatprep.mubr.msk.f32.mxu1 %vm7003_vm0, %v10305_v1  ;;  %v4238_v21 = vmul.f32 %v7707_v55, %v7489_v45  ;;  %v353_v45 = vld [vmem:[%s7093_s20 + $0x208] sm:$0xff] }
 0x11a   : > { %v4494_v24 = vadd.f32 %v4237_v15, %v1445_v27  ;;  %v7958_v33 = vpop.permute.xlu1 %3263  ;;  %v7960_v39 = vpop.permute.xlu0 %3258  ;;  %v2809_v27 = vld [vmem:[%s7088_s15 + $0x418] sm:$0xff]  ;;  %v2808_v15 = vld [vmem:[%s7088_s15 + $0x410] sm:$0xff] }
 0x11b   : > { %10320 = vst [vmem:[#allocation20_spill] sm:$0xff] %v7958_v33  ;;  %10321 = vst [vmem:[#allocation21_spill] sm:$0xff] %v7960_v39  ;;  %3583 = vperm.xlu1 %6904, %v2807_v28   ;;  %3578 = vperm.xlu0 %6903, %v2806_v29   ;;  %v1449_v16 = vpop.f32.mrb[22].mxu0  ;;  %v7962_v4 = vpop.f32.mrb[22].mxu1  ;;  %v482_v29 = vld [vmem:[%s7093_s20 + $0x610] sm:$0xff] }
 0x11c   : > { %4751 = vst.msk [vmem:[%s7754_s18 + $0x50] sm:$0xff] %vm556_vm1, %v4494_v24  ;;  %v1450_v34 = vadd.f32 %v7718_v62, %v1449_v16  ;;  %v6064_v40 = vpop.f32.mrb[23].mxu0  ;;  %6222 = vmatmul.mubr.msk.f32.gmra.mrb[128].mxu0 %vm556_vm1, %v352_v46  ;;  %6609 = vmatmul.mubr.msk.f32.gmra.mrb[128].mxu1 %vm556_vm1, %v481_v8  ;;  %v6451_v28 = vpop.f32.mrb[23].mxu1 }
 0x11d   : > { %6224 = vmatprep.mubr.msk.f32.mxu0 %vm7003_vm0, %v10305_v1  ;;  %6611 = vmatprep.mubr.msk.f32.mxu1 %vm7003_vm0, %v10305_v1  ;;  %v4239_v28 = vmul.f32 %v7707_v55, %v7505_v52  ;;  %v354_v52 = vld [vmem:[%s7093_s20 + $0x210] sm:$0xff] }
 0x11e   : > { %v4495_v24 = vadd.f32 %v4238_v21, %v1450_v34  ;;  %v7979_v40 = vpop.permute.xlu1 %3273  ;;  %v7981_v46 = vpop.permute.xlu0 %3268  ;;  %v2811_v34 = vld [vmem:[%s7088_s15 + $0x428] sm:$0xff]  ;;  %v2810_v21 = vld [vmem:[%s7088_s15 + $0x420] sm:$0xff] }
 0x11f   : > { %10322 = vst [vmem:[#allocation22_spill] sm:$0xff] %v7979_v40  ;;  %10323 = vst [vmem:[#allocation23_spill] sm:$0xff] %v7981_v46  ;;  %3593 = vperm.xlu1 %6904, %v2809_v27   ;;  %3588 = vperm.xlu0 %6903, %v2808_v15   ;;  %v1454_v8 = vpop.f32.mrb[24].mxu0  ;;  %v7983_v16 = vpop.f32.mrb[24].mxu1  ;;  %v483_v15 = vld [vmem:[%s7093_s20 + $0x618] sm:$0xff] }
 0x120   : > { %4752 = vst.msk [vmem:[%s7754_s18 + $0x58] sm:$0xff] %vm556_vm1, %v4495_v24  ;;  %v1455_v33 = vadd.f32 %v7718_v62, %v1454_v8  ;;  %v6067_v39 = vpop.f32.mrb[25].mxu0  ;;  %6225 = vmatmul.mubr.msk.f32.gmra.mrb[130].mxu0 %vm556_vm1, %v353_v45  ;;  %6612 = vmatmul.mubr.msk.f32.gmra.mrb[130].mxu1 %vm556_vm1, %v482_v29  ;;  %v6454_v27 = vpop.f32.mrb[25].mxu1 }
 0x121   : > { %6227 = vmatprep.mubr.msk.f32.mxu0 %vm7003_vm0, %v10305_v1  ;;  %6614 = vmatprep.mubr.msk.f32.mxu1 %vm7003_vm0, %v10305_v1  ;;  %v4240_v27 = vmul.f32 %v7707_v55, %v7503_v51  ;;  %v355_v51 = vld [vmem:[%s7093_s20 + $0x218] sm:$0xff] }
 0x122   : > { %v4496_v24 = vadd.f32 %v4239_v28, %v1455_v33  ;;  %v8000_v39 = vpop.permute.xlu1 %3283  ;;  %v8002_v45 = vpop.permute.xlu0 %3278  ;;  %v2813_v33 = vld [vmem:[%s7088_s15 + $0x438] sm:$0xff]  ;;  %v2812_v28 = vld [vmem:[%s7088_s15 + $0x430] sm:$0xff] }
 0x123   : > { %10324 = vst [vmem:[#allocation24_spill] sm:$0xff] %v8000_v39  ;;  %10325 = vst [vmem:[#allocation25_spill] sm:$0xff] %v8002_v45  ;;  %3603 = vperm.xlu1 %6904, %v2811_v34   ;;  %3598 = vperm.xlu0 %6903, %v2810_v21   ;;  %v1459_v29 = vpop.f32.mrb[26].mxu0  ;;  %v8004_v8 = vpop.f32.mrb[26].mxu1  ;;  %v484_v21 = vld [vmem:[%s7093_s20 + $0x620] sm:$0xff] }
 0x124   : > { %4753 = vst.msk [vmem:[%s7754_s18 + $0x60] sm:$0xff] %vm556_vm1, %v4496_v24  ;;  %v1460_v40 = vadd.f32 %v7718_v62, %v1459_v29  ;;  %v6070_v46 = vpop.f32.mrb[27].mxu0  ;;  %6228 = vmatmul.mubr.msk.f32.gmra.mrb[132].mxu0 %vm556_vm1, %v354_v52  ;;  %6615 = vmatmul.mubr.msk.f32.gmra.mrb[132].mxu1 %vm556_vm1, %v483_v15  ;;  %v6457_v34 = vpop.f32.mrb[27].mxu1 }
 0x125   : > { %6230 = vmatprep.mubr.msk.f32.mxu0 %vm7003_vm0, %v10305_v1  ;;  %6617 = vmatprep.mubr.msk.f32.mxu1 %vm7003_vm0, %v10305_v1  ;;  %v4241_v34 = vmul.f32 %v7707_v55, %v7519_v58  ;;  %v356_v58 = vld [vmem:[%s7093_s20 + $0x220] sm:$0xff] }
 0x126   : > { %v4497_v24 = vadd.f32 %v4240_v27, %v1460_v40  ;;  %v8021_v46 = vpop.permute.xlu1 %3293  ;;  %v8023_v52 = vpop.permute.xlu0 %3288  ;;  %v2815_v40 = vld [vmem:[%s7088_s15 + $0x448] sm:$0xff]  ;;  %v2814_v27 = vld [vmem:[%s7088_s15 + $0x440] sm:$0xff] }
 0x127   : > { %10326 = vst [vmem:[#allocation26_spill] sm:$0xff] %v8021_v46  ;;  %10327 = vst [vmem:[#allocation27_spill] sm:$0xff] %v8023_v52  ;;  %3613 = vperm.xlu1 %6904, %v2813_v33   ;;  %3608 = vperm.xlu0 %6903, %v2812_v28   ;;  %v1464_v15 = vpop.f32.mrb[28].mxu0  ;;  %v8025_v29 = vpop.f32.mrb[28].mxu1  ;;  %v485_v28 = vld [vmem:[%s7093_s20 + $0x628] sm:$0xff] }
 0x128   : > { %4754 = vst.msk [vmem:[%s7754_s18 + $0x68] sm:$0xff] %vm556_vm1, %v4497_v24  ;;  %v1465_v39 = vadd.f32 %v7718_v62, %v1464_v15  ;;  %v6073_v45 = vpop.f32.mrb[29].mxu0  ;;  %6231 = vmatmul.mubr.msk.f32.gmra.mrb[134].mxu0 %vm556_vm1, %v355_v51  ;;  %6618 = vmatmul.mubr.msk.f32.gmra.mrb[134].mxu1 %vm556_vm1, %v484_v21  ;;  %v6460_v33 = vpop.f32.mrb[29].mxu1 }
 0x129   : > { %6233 = vmatprep.mubr.msk.f32.mxu0 %vm7003_vm0, %v10305_v1  ;;  %6620 = vmatprep.mubr.msk.f32.mxu1 %vm7003_vm0, %v10305_v1  ;;  %v4242_v33 = vmul.f32 %v7707_v55, %v7517_v57  ;;  %v357_v57 = vld [vmem:[%s7093_s20 + $0x228] sm:$0xff] }
 0x12a   : > { %v4498_v24 = vadd.f32 %v4241_v34, %v1465_v39  ;;  %v8042_v45 = vpop.permute.xlu1 %3303  ;;  %v8044_v51 = vpop.permute.xlu0 %3298  ;;  %v2817_v39 = vld [vmem:[%s7088_s15 + $0x458] sm:$0xff]  ;;  %v2816_v34 = vld [vmem:[%s7088_s15 + $0x450] sm:$0xff] }
 0x12b   : > { %10328 = vst [vmem:[#allocation28_spill] sm:$0xff] %v8042_v45  ;;  %10329 = vst [vmem:[#allocation29_spill] sm:$0xff] %v8044_v51  ;;  %3623 = vperm.xlu1 %6904, %v2815_v40   ;;  %3618 = vperm.xlu0 %6903, %v2814_v27   ;;  %v1469_v21 = vpop.f32.mrb[30].mxu0  ;;  %v8046_v15 = vpop.f32.mrb[30].mxu1  ;;  %v486_v27 = vld [vmem:[%s7093_s20 + $0x630] sm:$0xff] }
 0x12c   : > { %4755 = vst.msk [vmem:[%s7754_s18 + $0x70] sm:$0xff] %vm556_vm1, %v4498_v24  ;;  %v1470_v46 = vadd.f32 %v7718_v62, %v1469_v21  ;;  %v6076_v52 = vpop.f32.mrb[31].mxu0  ;;  %6234 = vmatmul.mubr.msk.f32.gmra.mrb[136].mxu0 %vm556_vm1, %v356_v58  ;;  %6621 = vmatmul.mubr.msk.f32.gmra.mrb[136].mxu1 %vm556_vm1, %v485_v28  ;;  %v6463_v40 = vpop.f32.mrb[31].mxu1 }
 0x12d   : > { %6236 = vmatprep.mubr.msk.f32.mxu0 %vm7003_vm0, %v10305_v1  ;;  %6623 = vmatprep.mubr.msk.f32.mxu1 %vm7003_vm0, %v10305_v1  ;;  %v4243_v40 = vmul.f32 %v7707_v55, %v7533_v0  ;;  %v358_v0 = vld [vmem:[%s7093_s20 + $0x230] sm:$0xff] }
 0x12e   : > { %v4499_v24 = vadd.f32 %v4242_v33, %v1470_v46  ;;  %v8063_v52 = vpop.permute.xlu1 %3313  ;;  %v8065_v58 = vpop.permute.xlu0 %3308  ;;  %v2819_v46 = vld [vmem:[%s7088_s15 + $0x468] sm:$0xff]  ;;  %v2818_v33 = vld [vmem:[%s7088_s15 + $0x460] sm:$0xff] }
 0x12f   : > { %10330 = vst [vmem:[#allocation30_spill] sm:$0xff] %v8063_v52  ;;  %10331 = vst [vmem:[#allocation31_spill] sm:$0xff] %v8065_v58  ;;  %3633 = vperm.xlu1 %6904, %v2817_v39   ;;  %3628 = vperm.xlu0 %6903, %v2816_v34   ;;  %v1474_v28 = vpop.f32.mrb[32].mxu0  ;;  %v8067_v21 = vpop.f32.mrb[32].mxu1  ;;  %v487_v34 = vld [vmem:[%s7093_s20 + $0x638] sm:$0xff] }
 0x130   : > { %4756 = vst.msk [vmem:[%s7754_s18 + $0x78] sm:$0xff] %vm556_vm1, %v4499_v24  ;;  %v1475_v45 = vadd.f32 %v7718_v62, %v1474_v28  ;;  %v6079_v51 = vpop.f32.mrb[33].mxu0  ;;  %6237 = vmatmul.mubr.msk.f32.gmra.mrb[138].mxu0 %vm556_vm1, %v357_v57  ;;  %6624 = vmatmul.mubr.msk.f32.gmra.mrb[138].mxu1 %vm556_vm1, %v486_v27  ;;  %v6466_v39 = vpop.f32.mrb[33].mxu1 }
 0x131   : > { %6239 = vmatprep.mubr.msk.f32.mxu0 %vm7003_vm0, %v10305_v1  ;;  %6626 = vmatprep.mubr.msk.f32.mxu1 %vm7003_vm0, %v10305_v1  ;;  %v4244_v39 = vmul.f32 %v7707_v55, %v7531_v63  ;;  %v359_v63 = vld [vmem:[%s7093_s20 + $0x238] sm:$0xff] }
 0x132   : > { %v4500_v24 = vadd.f32 %v4243_v40, %v1475_v45  ;;  %v8084_v51 = vpop.permute.xlu1 %3323  ;;  %v8086_v57 = vpop.permute.xlu0 %3318  ;;  %v2821_v45 = vld [vmem:[%s7088_s15 + $0x478] sm:$0xff]  ;;  %v2820_v40 = vld [vmem:[%s7088_s15 + $0x470] sm:$0xff] }
 0x133   : > { %10332 = vst [vmem:[#allocation32_spill] sm:$0xff] %v8084_v51  ;;  %10333 = vst [vmem:[#allocation33_spill] sm:$0xff] %v8086_v57  ;;  %3643 = vperm.xlu1 %6904, %v2819_v46   ;;  %3638 = vperm.xlu0 %6903, %v2818_v33   ;;  %v1479_v27 = vpop.f32.mrb[34].mxu0  ;;  %v8088_v28 = vpop.f32.mrb[34].mxu1  ;;  %v488_v33 = vld [vmem:[%s7093_s20 + $0x640] sm:$0xff] }
 0x134   : > { %4757 = vst.msk [vmem:[%s7754_s18 + $0x80] sm:$0xff] %vm556_vm1, %v4500_v24  ;;  %v1480_v52 = vadd.f32 %v7718_v62, %v1479_v27  ;;  %v6082_v58 = vpop.f32.mrb[35].mxu0  ;;  %6240 = vmatmul.mubr.msk.f32.gmra.mrb[140].mxu0 %vm556_vm1, %v358_v0  ;;  %6627 = vmatmul.mubr.msk.f32.gmra.mrb[140].mxu1 %vm556_vm1, %v487_v34  ;;  %v6469_v46 = vpop.f32.mrb[35].mxu1 }
 0x135   : > { %6242 = vmatprep.mubr.msk.f32.mxu0 %vm7003_vm0, %v10305_v1  ;;  %6629 = vmatprep.mubr.msk.f32.mxu1 %vm7003_vm0, %v10305_v1  ;;  %v4245_v46 = vmul.f32 %v7707_v55, %v7547_v6  ;;  %v360_v6 = vld [vmem:[%s7093_s20 + $0x240] sm:$0xff] }
 0x136   : > { %v4501_v24 = vadd.f32 %v4244_v39, %v1480_v52  ;;  %v8105_v58 = vpop.permute.xlu1 %3333  ;;  %v8107_v0 = vpop.permute.xlu0 %3328  ;;  %v2823_v52 = vld [vmem:[%s7088_s15 + $0x488] sm:$0xff]  ;;  %v2822_v39 = vld [vmem:[%s7088_s15 + $0x480] sm:$0xff] }
 0x137   : > { %10334 = vst [vmem:[#allocation34_spill] sm:$0xff] %v8105_v58  ;;  %10335 = vst [vmem:[#allocation35_spill] sm:$0xff] %v8107_v0  ;;  %3653 = vperm.xlu1 %6904, %v2821_v45   ;;  %3648 = vperm.xlu0 %6903, %v2820_v40   ;;  %v1484_v34 = vpop.f32.mrb[36].mxu0  ;;  %v8109_v27 = vpop.f32.mrb[36].mxu1  ;;  %v489_v40 = vld [vmem:[%s7093_s20 + $0x648] sm:$0xff] }
 0x138   : > { %4758 = vst.msk [vmem:[%s7754_s18 + $0x88] sm:$0xff] %vm556_vm1, %v4501_v24  ;;  %v1485_v51 = vadd.f32 %v7718_v62, %v1484_v34  ;;  %v6085_v57 = vpop.f32.mrb[37].mxu0  ;;  %6243 = vmatmul.mubr.msk.f32.gmra.mrb[142].mxu0 %vm556_vm1, %v359_v63  ;;  %6630 = vmatmul.mubr.msk.f32.gmra.mrb[142].mxu1 %vm556_vm1, %v488_v33  ;;  %v6472_v45 = vpop.f32.mrb[37].mxu1 }
 0x139   : > { %6245 = vmatprep.mubr.msk.f32.mxu0 %vm7003_vm0, %v10305_v1  ;;  %6632 = vmatprep.mubr.msk.f32.mxu1 %vm7003_vm0, %v10305_v1  ;;  %v4246_v45 = vmul.f32 %v7707_v55, %v7545_v5  ;;  %v361_v5 = vld [vmem:[%s7093_s20 + $0x248] sm:$0xff] }
 0x13a   : > { %v4502_v24 = vadd.f32 %v4245_v46, %v1485_v51  ;;  %v8126_v57 = vpop.permute.xlu1 %3343  ;;  %v8128_v63 = vpop.permute.xlu0 %3338  ;;  %v2825_v51 = vld [vmem:[%s7088_s15 + $0x498] sm:$0xff]  ;;  %v2824_v46 = vld [vmem:[%s7088_s15 + $0x490] sm:$0xff] }
 0x13b   : > { %10336 = vst [vmem:[#allocation36_spill] sm:$0xff] %v8126_v57  ;;  %10337 = vst [vmem:[#allocation37_spill] sm:$0xff] %v8128_v63  ;;  %3663 = vperm.xlu1 %6904, %v2823_v52   ;;  %3658 = vperm.xlu0 %6903, %v2822_v39   ;;  %v1489_v33 = vpop.f32.mrb[38].mxu0  ;;  %v8130_v34 = vpop.f32.mrb[38].mxu1  ;;  %v490_v39 = vld [vmem:[%s7093_s20 + $0x650] sm:$0xff] }
 0x13c   : > { %4759 = vst.msk [vmem:[%s7754_s18 + $0x90] sm:$0xff] %vm556_vm1, %v4502_v24  ;;  %v1490_v58 = vadd.f32 %v7718_v62, %v1489_v33  ;;  %v6088_v0 = vpop.f32.mrb[39].mxu0  ;;  %6246 = vmatmul.mubr.msk.f32.gmra.mrb[144].mxu0 %vm556_vm1, %v360_v6  ;;  %6633 = vmatmul.mubr.msk.f32.gmra.mrb[144].mxu1 %vm556_vm1, %v489_v40  ;;  %v6475_v52 = vpop.f32.mrb[39].mxu1 }
 0x13d   : > { %6248 = vmatprep.mubr.msk.f32.mxu0 %vm7003_vm0, %v10305_v1  ;;  %6635 = vmatprep.mubr.msk.f32.mxu1 %vm7003_vm0, %v10305_v1  ;;  %v4247_v52 = vmul.f32 %v7707_v55, %v7561_v13  ;;  %v362_v13 = vld [vmem:[%s7093_s20 + $0x250] sm:$0xff] }
 0x13e   : > { %v4503_v24 = vadd.f32 %v4246_v45, %v1490_v58  ;;  %v8147_v0 = vpop.permute.xlu1 %3353  ;;  %v8149_v6 = vpop.permute.xlu0 %3348  ;;  %v2827_v58 = vld [vmem:[%s7088_s15 + $0x4a8] sm:$0xff]  ;;  %v2826_v45 = vld [vmem:[%s7088_s15 + $0x4a0] sm:$0xff] }
 0x13f   : > { %10338 = vst [vmem:[#allocation38_spill] sm:$0xff] %v8147_v0  ;;  %10339 = vst [vmem:[#allocation39_spill] sm:$0xff] %v8149_v6  ;;  %3673 = vperm.xlu1 %6904, %v2825_v51   ;;  %3668 = vperm.xlu0 %6903, %v2824_v46   ;;  %v1494_v40 = vpop.f32.mrb[40].mxu0  ;;  %v8151_v33 = vpop.f32.mrb[40].mxu1  ;;  %v491_v46 = vld [vmem:[%s7093_s20 + $0x658] sm:$0xff] }
 0x140   : > { %4760 = vst.msk [vmem:[%s7754_s18 + $0x98] sm:$0xff] %vm556_vm1, %v4503_v24  ;;  %v1495_v57 = vadd.f32 %v7718_v62, %v1494_v40  ;;  %v6091_v63 = vpop.f32.mrb[41].mxu0  ;;  %6249 = vmatmul.mubr.msk.f32.gmra.mrb[146].mxu0 %vm556_vm1, %v361_v5  ;;  %6636 = vmatmul.mubr.msk.f32.gmra.mrb[146].mxu1 %vm556_vm1, %v490_v39  ;;  %v6478_v51 = vpop.f32.mrb[41].mxu1 }
 0x141   : > { %6251 = vmatprep.mubr.msk.f32.mxu0 %vm7003_vm0, %v10305_v1  ;;  %6638 = vmatprep.mubr.msk.f32.mxu1 %vm7003_vm0, %v10305_v1  ;;  %v4248_v51 = vmul.f32 %v7707_v55, %v7559_v12  ;;  %v363_v12 = vld [vmem:[%s7093_s20 + $0x258] sm:$0xff] }
 0x142   : > { %v4504_v24 = vadd.f32 %v4247_v52, %v1495_v57  ;;  %v8168_v63 = vpop.permute.xlu1 %3363  ;;  %v8170_v5 = vpop.permute.xlu0 %3358  ;;  %v2829_v57 = vld [vmem:[%s7088_s15 + $0x4b8] sm:$0xff]  ;;  %v2828_v52 = vld [vmem:[%s7088_s15 + $0x4b0] sm:$0xff] }
 0x143   : > { %10340 = vst [vmem:[#allocation40_spill] sm:$0xff] %v8168_v63  ;;  %10341 = vst [vmem:[#allocation41_spill] sm:$0xff] %v8170_v5  ;;  %3683 = vperm.xlu1 %6904, %v2827_v58   ;;  %3678 = vperm.xlu0 %6903, %v2826_v45   ;;  %v1499_v39 = vpop.f32.mrb[42].mxu0  ;;  %v8172_v40 = vpop.f32.mrb[42].mxu1  ;;  %v492_v45 = vld [vmem:[%s7093_s20 + $0x660] sm:$0xff] }
 0x144   : > { %4761 = vst.msk [vmem:[%s7754_s18 + $0xa0] sm:$0xff] %vm556_vm1, %v4504_v24  ;;  %v1500_v0 = vadd.f32 %v7718_v62, %v1499_v39  ;;  %v6094_v6 = vpop.f32.mrb[43].mxu0  ;;  %6252 = vmatmul.mubr.msk.f32.gmra.mrb[148].mxu0 %vm556_vm1, %v362_v13  ;;  %6639 = vmatmul.mubr.msk.f32.gmra.mrb[148].mxu1 %vm556_vm1, %v491_v46  ;;  %v6481_v58 = vpop.f32.mrb[43].mxu1 }
 0x145   : > { %6254 = vmatprep.mubr.msk.f32.mxu0 %vm7003_vm0, %v10305_v1  ;;  %6641 = vmatprep.mubr.msk.f32.mxu1 %vm7003_vm0, %v10305_v1  ;;  %v4249_v58 = vmul.f32 %v7707_v55, %v7575_v23  ;;  %v364_v23 = vld [vmem:[%s7093_s20 + $0x260] sm:$0xff] }
 0x146   : > { %v4505_v24 = vadd.f32 %v4248_v51, %v1500_v0  ;;  %v8189_v6 = vpop.permute.xlu1 %3373  ;;  %v8191_v13 = vpop.permute.xlu0 %3368  ;;  %v2831_v0 = vld [vmem:[%s7088_s15 + $0x4c8] sm:$0xff]  ;;  %v2830_v51 = vld [vmem:[%s7088_s15 + $0x4c0] sm:$0xff] }
 0x147   : > { %10342 = vst [vmem:[#allocation42_spill] sm:$0xff] %v8189_v6  ;;  %10343 = vst [vmem:[#allocation43_spill] sm:$0xff] %v8191_v13  ;;  %3693 = vperm.xlu1 %6904, %v2829_v57   ;;  %3688 = vperm.xlu0 %6903, %v2828_v52   ;;  %v1504_v46 = vpop.f32.mrb[44].mxu0  ;;  %v8193_v39 = vpop.f32.mrb[44].mxu1  ;;  %v493_v52 = vld [vmem:[%s7093_s20 + $0x668] sm:$0xff] }
 0x148   : > { %4762 = vst.msk [vmem:[%s7754_s18 + $0xa8] sm:$0xff] %vm556_vm1, %v4505_v24  ;;  %v1505_v63 = vadd.f32 %v7718_v62, %v1504_v46  ;;  %v6097_v5 = vpop.f32.mrb[45].mxu0  ;;  %6255 = vmatmul.mubr.msk.f32.gmra.mrb[150].mxu0 %vm556_vm1, %v363_v12  ;;  %6642 = vmatmul.mubr.msk.f32.gmra.mrb[150].mxu1 %vm556_vm1, %v492_v45  ;;  %v6484_v57 = vpop.f32.mrb[45].mxu1 }
 0x149   : > { %6257 = vmatprep.mubr.msk.f32.mxu0 %vm7003_vm0, %v10305_v1  ;;  %6644 = vmatprep.mubr.msk.f32.mxu1 %vm7003_vm0, %v10305_v1  ;;  %v4250_v57 = vmul.f32 %v7707_v55, %v7573_v20  ;;  %v365_v20 = vld [vmem:[%s7093_s20 + $0x268] sm:$0xff] }
 0x14a   : > { %v4506_v24 = vadd.f32 %v4249_v58, %v1505_v63  ;;  %v8210_v5 = vpop.permute.xlu1 %3383  ;;  %v8212_v12 = vpop.permute.xlu0 %3378  ;;  %v2833_v63 = vld [vmem:[%s7088_s15 + $0x4d8] sm:$0xff]  ;;  %v2832_v58 = vld [vmem:[%s7088_s15 + $0x4d0] sm:$0xff] }
 0x14b   : > { %10344 = vst [vmem:[#allocation44_spill] sm:$0xff] %v8210_v5  ;;  %10345 = vst [vmem:[#allocation45_spill] sm:$0xff] %v8212_v12  ;;  %3703 = vperm.xlu1 %6904, %v2831_v0   ;;  %3698 = vperm.xlu0 %6903, %v2830_v51   ;;  %v1509_v45 = vpop.f32.mrb[46].mxu0  ;;  %v8214_v46 = vpop.f32.mrb[46].mxu1  ;;  %v494_v51 = vld [vmem:[%s7093_s20 + $0x670] sm:$0xff] }
 0x14c   : > { %4763 = vst.msk [vmem:[%s7754_s18 + $0xb0] sm:$0xff] %vm556_vm1, %v4506_v24  ;;  %v1510_v6 = vadd.f32 %v7718_v62, %v1509_v45  ;;  %v6100_v13 = vpop.f32.mrb[47].mxu0  ;;  %6258 = vmatmul.mubr.msk.f32.gmra.mrb[152].mxu0 %vm556_vm1, %v364_v23  ;;  %6645 = vmatmul.mubr.msk.f32.gmra.mrb[152].mxu1 %vm556_vm1, %v493_v52  ;;  %v6487_v0 = vpop.f32.mrb[47].mxu1 }
 0x14d   : > { %6260 = vmatprep.mubr.msk.f32.mxu0 %vm7003_vm0, %v10305_v1  ;;  %6647 = vmatprep.mubr.msk.f32.mxu1 %vm7003_vm0, %v10305_v1  ;;  %v4251_v0 = vmul.f32 %v7707_v55, %v7589_v31  ;;  %v366_v31 = vld [vmem:[%s7093_s20 + $0x270] sm:$0xff]  ;;  %v495_v55 = vld [vmem:[%s7093_s20 + $0x678] sm:$0xff] }
 0x14e   : > { %v4507_v24 = vadd.f32 %v4250_v57, %v1510_v6  ;;  %v8231_v13 = vpop.permute.xlu1 %3393  ;;  %v8233_v23 = vpop.permute.xlu0 %3388  ;;  %v2835_v6 = vld [vmem:[%s7088_s15 + $0x4e8] sm:$0xff]  ;;  %v2834_v57 = vld [vmem:[%s7088_s15 + $0x4e0] sm:$0xff] }
 0x14f   : > { %10346 = vst [vmem:[#allocation46_spill] sm:$0xff] %v8231_v13  ;;  %10347 = vst [vmem:[#allocation47_spill] sm:$0xff] %v8233_v23  ;;  %3713 = vperm.xlu1 %6904, %v2833_v63   ;;  %3708 = vperm.xlu0 %6903, %v2832_v58   ;;  %v1514_v52 = vpop.f32.mrb[48].mxu0  ;;  %v8235_v45 = vpop.f32.mrb[48].mxu1 }
 0x150   : > { %4764 = vst.msk [vmem:[%s7754_s18 + $0xb8] sm:$0xff] %vm556_vm1, %v4507_v24  ;;  %v1515_v5 = vadd.f32 %v7718_v62, %v1514_v52  ;;  %v6103_v12 = vpop.f32.mrb[49].mxu0  ;;  %6261 = vmatmul.mubr.msk.f32.gmra.mrb[154].mxu0 %vm556_vm1, %v365_v20  ;;  %6648 = vmatmul.mubr.msk.f32.gmra.mrb[154].mxu1 %vm556_vm1, %v494_v51  ;;  %v6490_v63 = vpop.f32.mrb[49].mxu1  ;;  %v8261_v24 = vld [vmem:[%s10297_s4] ss:$0 sm:$0xff] }
 0x151   : > { %6263 = vmatprep.mubr.msk.f32.mxu0 %vm7003_vm0, %v10305_v1  ;;  %6650 = vmatprep.mubr.msk.f32.mxu1 %vm7003_vm0, %v10305_v1  ;;  %v8270_v52 = vld [vmem:[%s10296_s3] ss:$0 sm:$0xff]  ;;  %v2836_v63 = vld [vmem:[%s7088_s15 + $0x4f0] sm:$0xff] }
 0x152   : > { %v4508_v58 = vadd.f32 %v4251_v0, %v1515_v5  ;;  %v8252_v62 = vpop.permute.xlu1 %3403  ;;  %v8254_v12 = vpop.permute.xlu0 %3398  ;;  %v4252_v5 = vmul.f32 %v8261_v24, %v7587_v30  ;;  %v367_v30 = vld [vmem:[%s7093_s20 + $0x278] sm:$0xff] }
 0x153   : > { %10348 = vst [vmem:[#allocation48_spill] sm:$0xff] %v8252_v62  ;;  %10349 = vst [vmem:[#allocation49_spill] sm:$0xff] %v8254_v12  ;;  %3723 = vperm.xlu1 %6904, %v2835_v6   ;;  %3718 = vperm.xlu0 %6903, %v2834_v57   ;;  %v1519_v20 = vpop.f32.mrb[50].mxu0  ;;  %v8256_v51 = vpop.f32.mrb[50].mxu1  ;;  %v2837_v57 = vld [vmem:[%s7088_s15 + $0x4f8] sm:$0xff]  ;;  %v4253_v12 = vmul.f32 %v8261_v24, %v7603_v41  ;;  %v368_v41 = vld [vmem:[%s7093_s20 + $0x280] sm:$0xff] }
 0x154   : > { %4765 = vst.msk [vmem:[%s7754_s18 + $0xc0] sm:$0xff] %vm556_vm1, %v4508_v58  ;;  %v1520_v0 = vadd.f32 %v8270_v52, %v1519_v20  ;;  %v6106_v6 = vpop.f32.mrb[51].mxu0  ;;  %6264 = vmatmul.mubr.msk.f32.gmra.mrb[156].mxu0 %vm556_vm1, %v366_v31  ;;  %6651 = vmatmul.mubr.msk.f32.gmra.mrb[156].mxu1 %vm556_vm1, %v495_v55  ;;  %v6493_v62 = vpop.f32.mrb[51].mxu1  ;;  %v496_v58 = vld [vmem:[%s7093_s20 + $0x680] sm:$0xff] }
 0x155   : > { %6266 = vmatprep.mubr.msk.f32.mxu0 %vm7003_vm0, %v10305_v1  ;;  %6653 = vmatprep.mubr.msk.f32.mxu1 %vm7003_vm0, %v10305_v1 }
 0x156   : > { %v4509_v20 = vadd.f32 %v4252_v5, %v1520_v0  ;;  %v8283_v6 = vpop.permute.xlu1 %3413  ;;  %v8285_v31 = vpop.permute.xlu0 %3408  ;;  %v2839_v5 = vld [vmem:[%s7088_s15 + $0x508] sm:$0xff]  ;;  %v2838_v0 = vld [vmem:[%s7088_s15 + $0x500] sm:$0xff] }
 0x157   : > { %10350 = vst [vmem:[#allocation50_spill] sm:$0xff] %v8283_v6  ;;  %10351 = vst [vmem:[#allocation51_spill] sm:$0xff] %v8285_v31  ;;  %3733 = vperm.xlu1 %6904, %v2837_v57   ;;  %3728 = vperm.xlu0 %6903, %v2836_v63   ;;  %v1524_v55 = vpop.f32.mrb[52].mxu0  ;;  %v8287_v62 = vpop.f32.mrb[52].mxu1  ;;  %v497_v63 = vld [vmem:[%s7093_s20 + $0x688] sm:$0xff] }
 0x158   : > { %4766 = vst.msk [vmem:[%s7754_s18 + $0xc8] sm:$0xff] %vm556_vm1, %v4509_v20  ;;  %v1525_v13 = vadd.f32 %v8270_v52, %v1524_v55  ;;  %v6109_v23 = vpop.f32.mrb[53].mxu0  ;;  %6267 = vmatmul.mubr.msk.f32.gmra.mrb[158].mxu0 %vm556_vm1, %v367_v30  ;;  %6654 = vmatmul.mubr.msk.f32.gmra.mrb[158].mxu1 %vm556_vm1, %v496_v58  ;;  %v6496_v57 = vpop.f32.mrb[53].mxu1 }
 0x159   : > { %6269 = vmatprep.mubr.msk.f32.mxu0 %vm7003_vm0, %v10305_v1  ;;  %6656 = vmatprep.mubr.msk.f32.mxu1 %vm7003_vm0, %v10305_v1  ;;  %v4254_v57 = vmul.f32 %v8261_v24, %v7601_v38  ;;  %v369_v38 = vld [vmem:[%s7093_s20 + $0x288] sm:$0xff] }
 0x15a   : > { %v4510_v20 = vadd.f32 %v4253_v12, %v1525_v13  ;;  %v8304_v23 = vpop.permute.xlu1 %3423  ;;  %v8306_v30 = vpop.permute.xlu0 %3418  ;;  %v2841_v13 = vld [vmem:[%s7088_s15 + $0x518] sm:$0xff]  ;;  %v2840_v12 = vld [vmem:[%s7088_s15 + $0x510] sm:$0xff] }
 0x15b   : > { %10352 = vst [vmem:[#allocation52_spill] sm:$0xff] %v8304_v23  ;;  %10353 = vst [vmem:[#allocation53_spill] sm:$0xff] %v8306_v30  ;;  %3743 = vperm.xlu1 %6904, %v2839_v5   ;;  %3738 = vperm.xlu0 %6903, %v2838_v0   ;;  %v1529_v58 = vpop.f32.mrb[54].mxu0  ;;  %v8308_v55 = vpop.f32.mrb[54].mxu1  ;;  %v498_v0 = vld [vmem:[%s7093_s20 + $0x690] sm:$0xff] }
 0x15c   : > { %4767 = vst.msk [vmem:[%s7754_s18 + $0xd0] sm:$0xff] %vm556_vm1, %v4510_v20  ;;  %v1530_v6 = vadd.f32 %v8270_v52, %v1529_v58  ;;  %v6112_v31 = vpop.f32.mrb[55].mxu0  ;;  %6270 = vmatmul.mubr.msk.f32.gmra.mrb[160].mxu0 %vm556_vm1, %v368_v41  ;;  %6657 = vmatmul.mubr.msk.f32.gmra.mrb[160].mxu1 %vm556_vm1, %v497_v63  ;;  %v6499_v5 = vpop.f32.mrb[55].mxu1 }
 0x15d   : > { %6272 = vmatprep.mubr.msk.f32.mxu0 %vm7003_vm0, %v10305_v1  ;;  %6659 = vmatprep.mubr.msk.f32.mxu1 %vm7003_vm0, %v10305_v1  ;;  %v4255_v5 = vmul.f32 %v8261_v24, %v7617_v49  ;;  %v370_v49 = vld [vmem:[%s7093_s20 + $0x290] sm:$0xff] }
 0x15e   : > { %v4511_v20 = vadd.f32 %v4254_v57, %v1530_v6  ;;  %v8325_v31 = vpop.permute.xlu1 %3433  ;;  %v8327_v41 = vpop.permute.xlu0 %3428  ;;  %v2843_v6 = vld [vmem:[%s7088_s15 + $0x528] sm:$0xff]  ;;  %v2842_v57 = vld [vmem:[%s7088_s15 + $0x520] sm:$0xff] }
 0x15f   : > { %10354 = vst [vmem:[#allocation54_spill] sm:$0xff] %v8325_v31  ;;  %10355 = vst [vmem:[#allocation55_spill] sm:$0xff] %v8327_v41  ;;  %3753 = vperm.xlu1 %6904, %v2841_v13   ;;  %3748 = vperm.xlu0 %6903, %v2840_v12   ;;  %v1534_v63 = vpop.f32.mrb[56].mxu0  ;;  %v8329_v58 = vpop.f32.mrb[56].mxu1  ;;  %v499_v12 = vld [vmem:[%s7093_s20 + $0x698] sm:$0xff] }
 0x160   : > { %4768 = vst.msk [vmem:[%s7754_s18 + $0xd8] sm:$0xff] %vm556_vm1, %v4511_v20  ;;  %v1535_v23 = vadd.f32 %v8270_v52, %v1534_v63  ;;  %v6115_v30 = vpop.f32.mrb[57].mxu0  ;;  %6273 = vmatmul.mubr.msk.f32.gmra.mrb[162].mxu0 %vm556_vm1, %v369_v38  ;;  %6660 = vmatmul.mubr.msk.f32.gmra.mrb[162].mxu1 %vm556_vm1, %v498_v0  ;;  %v6502_v13 = vpop.f32.mrb[57].mxu1 }
 0x161   : > { %6275 = vmatprep.mubr.msk.f32.mxu0 %vm7003_vm0, %v10305_v1  ;;  %6662 = vmatprep.mubr.msk.f32.mxu1 %vm7003_vm0, %v10305_v1  ;;  %v4256_v13 = vmul.f32 %v8261_v24, %v7615_v48  ;;  %v371_v48 = vld [vmem:[%s7093_s20 + $0x298] sm:$0xff] }
 0x162   : > { %v4512_v20 = vadd.f32 %v4255_v5, %v1535_v23  ;;  %v8346_v30 = vpop.permute.xlu1 %3443  ;;  %v8348_v38 = vpop.permute.xlu0 %3438  ;;  %v2845_v23 = vld [vmem:[%s7088_s15 + $0x538] sm:$0xff]  ;;  %v2844_v5 = vld [vmem:[%s7088_s15 + $0x530] sm:$0xff] }
 0x163   : > { %10356 = vst [vmem:[#allocation56_spill] sm:$0xff] %v8346_v30  ;;  %10357 = vst [vmem:[#allocation57_spill] sm:$0xff] %v8348_v38  ;;  %3763 = vperm.xlu1 %6904, %v2843_v6   ;;  %3758 = vperm.xlu0 %6903, %v2842_v57   ;;  %v1539_v0 = vpop.f32.mrb[58].mxu0  ;;  %v8350_v63 = vpop.f32.mrb[58].mxu1  ;;  %v500_v57 = vld [vmem:[%s7093_s20 + $0x6a0] sm:$0xff] }
 0x164   : > { %4769 = vst.msk [vmem:[%s7754_s18 + $0xe0] sm:$0xff] %vm556_vm1, %v4512_v20  ;;  %v1540_v31 = vadd.f32 %v8270_v52, %v1539_v0  ;;  %v6118_v41 = vpop.f32.mrb[59].mxu0  ;;  %6276 = vmatmul.mubr.msk.f32.gmra.mrb[164].mxu0 %vm556_vm1, %v370_v49  ;;  %6663 = vmatmul.mubr.msk.f32.gmra.mrb[164].mxu1 %vm556_vm1, %v499_v12  ;;  %v6505_v6 = vpop.f32.mrb[59].mxu1 }
 0x165   : > { %6278 = vmatprep.mubr.msk.f32.mxu0 %vm7003_vm0, %v10305_v1  ;;  %6665 = vmatprep.mubr.msk.f32.mxu1 %vm7003_vm0, %v10305_v1  ;;  %v4257_v6 = vmul.f32 %v8261_v24, %v7631_v59  ;;  %v372_v59 = vld [vmem:[%s7093_s20 + $0x2a0] sm:$0xff] }
 0x166   : > { %v4513_v20 = vadd.f32 %v4256_v13, %v1540_v31  ;;  %v8367_v41 = vpop.permute.xlu1 %3453  ;;  %v8369_v49 = vpop.permute.xlu0 %3448  ;;  %v2847_v31 = vld [vmem:[%s7088_s15 + $0x548] sm:$0xff]  ;;  %v2846_v13 = vld [vmem:[%s7088_s15 + $0x540] sm:$0xff] }
 0x167   : > { %10358 = vst [vmem:[#allocation58_spill] sm:$0xff] %v8367_v41  ;;  %10359 = vst [vmem:[#allocation59_spill] sm:$0xff] %v8369_v49  ;;  %3773 = vperm.xlu1 %6904, %v2845_v23   ;;  %3768 = vperm.xlu0 %6903, %v2844_v5   ;;  %v1544_v12 = vpop.f32.mrb[60].mxu0  ;;  %v8371_v0 = vpop.f32.mrb[60].mxu1  ;;  %v501_v5 = vld [vmem:[%s7093_s20 + $0x6a8] sm:$0xff] }
 0x168   : > { %4770 = vst.msk [vmem:[%s7754_s18 + $0xe8] sm:$0xff] %vm556_vm1, %v4513_v20  ;;  %v1545_v30 = vadd.f32 %v8270_v52, %v1544_v12  ;;  %v6121_v38 = vpop.f32.mrb[61].mxu0  ;;  %6279 = vmatmul.mubr.msk.f32.gmra.mrb[166].mxu0 %vm556_vm1, %v371_v48  ;;  %6666 = vmatmul.mubr.msk.f32.gmra.mrb[166].mxu1 %vm556_vm1, %v500_v57  ;;  %v6508_v23 = vpop.f32.mrb[61].mxu1 }
 0x169   : > { %6281 = vmatprep.mubr.msk.f32.mxu0 %vm7003_vm0, %v10305_v1  ;;  %6668 = vmatprep.mubr.msk.f32.mxu1 %vm7003_vm0, %v10305_v1  ;;  %v4258_v23 = vmul.f32 %v8261_v24, %v7629_v56  ;;  %v373_v56 = vld [vmem:[%s7093_s20 + $0x2a8] sm:$0xff] }
 0x16a   : > { %v4514_v20 = vadd.f32 %v4257_v6, %v1545_v30  ;;  %v8388_v38 = vpop.permute.xlu1 %3463  ;;  %v8390_v48 = vpop.permute.xlu0 %3458  ;;  %v2849_v30 = vld [vmem:[%s7088_s15 + $0x558] sm:$0xff]  ;;  %v2848_v6 = vld [vmem:[%s7088_s15 + $0x550] sm:$0xff] }
 0x16b   : > { %10360 = vst [vmem:[#allocation60_spill] sm:$0xff] %v8388_v38  ;;  %10361 = vst [vmem:[#allocation61_spill] sm:$0xff] %v8390_v48  ;;  %3783 = vperm.xlu1 %6904, %v2847_v31   ;;  %3778 = vperm.xlu0 %6903, %v2846_v13   ;;  %v1549_v57 = vpop.f32.mrb[62].mxu0  ;;  %v8392_v12 = vpop.f32.mrb[62].mxu1  ;;  %v502_v13 = vld [vmem:[%s7093_s20 + $0x6b0] sm:$0xff] }
 0x16c   : > { %4771 = vst.msk [vmem:[%s7754_s18 + $0xf0] sm:$0xff] %vm556_vm1, %v4514_v20  ;;  %v1550_v41 = vadd.f32 %v8270_v52, %v1549_v57  ;;  %v6124_v49 = vpop.f32.mrb[63].mxu0  ;;  %6282 = vmatmul.mubr.msk.f32.gmra.mrb[168].mxu0 %vm556_vm1, %v372_v59  ;;  %6669 = vmatmul.mubr.msk.f32.gmra.mrb[168].mxu1 %vm556_vm1, %v501_v5  ;;  %v6511_v31 = vpop.f32.mrb[63].mxu1 }
 0x16d   : > { %6284 = vmatprep.mubr.msk.f32.mxu0 %vm7003_vm0, %v10305_v1  ;;  %6671 = vmatprep.mubr.msk.f32.mxu1 %vm7003_vm0, %v10305_v1  ;;  %v4259_v31 = vmul.f32 %v8261_v24, %v7645_v3  ;;  %v374_v3 = vld [vmem:[%s7093_s20 + $0x2b0] sm:$0xff] }
 0x16e   : > { %v4515_v20 = vadd.f32 %v4258_v23, %v1550_v41  ;;  %v8409_v49 = vpop.permute.xlu1 %3473  ;;  %v8411_v59 = vpop.permute.xlu0 %3468  ;;  %v2851_v41 = vld [vmem:[%s7088_s15 + $0x568] sm:$0xff]  ;;  %v2850_v23 = vld [vmem:[%s7088_s15 + $0x560] sm:$0xff] }
 0x16f   : > { %10362 = vst [vmem:[#allocation62_spill] sm:$0xff] %v8409_v49  ;;  %10363 = vst [vmem:[#allocation63_spill] sm:$0xff] %v8411_v59  ;;  %3793 = vperm.xlu1 %6904, %v2849_v30   ;;  %3788 = vperm.xlu0 %6903, %v2848_v6   ;;  %v1554_v5 = vpop.f32.mrb[64].mxu0  ;;  %v8413_v57 = vpop.f32.mrb[64].mxu1  ;;  %v503_v6 = vld [vmem:[%s7093_s20 + $0x6b8] sm:$0xff] }
 0x170   : > { %4772 = vst.msk [vmem:[%s7754_s18 + $0xf8] sm:$0xff] %vm556_vm1, %v4515_v20  ;;  %v1555_v38 = vadd.f32 %v8270_v52, %v1554_v5  ;;  %v6127_v48 = vpop.f32.mrb[65].mxu0  ;;  %6285 = vmatmul.mubr.msk.f32.gmra.mrb[170].mxu0 %vm556_vm1, %v373_v56  ;;  %6672 = vmatmul.mubr.msk.f32.gmra.mrb[170].mxu1 %vm556_vm1, %v502_v13  ;;  %v6514_v30 = vpop.f32.mrb[65].mxu1 }
 0x171   : > { %6287 = vmatprep.mubr.msk.f32.mxu0 %vm7003_vm0, %v10305_v1  ;;  %6674 = vmatprep.mubr.msk.f32.mxu1 %vm7003_vm0, %v10305_v1  ;;  %v4260_v30 = vmul.f32 %v8261_v24, %v7643_v2  ;;  %v375_v2 = vld [vmem:[%s7093_s20 + $0x2b8] sm:$0xff] }
 0x172   : > { %v4516_v20 = vadd.f32 %v4259_v31, %v1555_v38  ;;  %v8430_v48 = vpop.permute.xlu1 %3483  ;;  %v8432_v56 = vpop.permute.xlu0 %3478  ;;  %v2853_v38 = vld [vmem:[%s7088_s15 + $0x578] sm:$0xff]  ;;  %v2852_v31 = vld [vmem:[%s7088_s15 + $0x570] sm:$0xff] }
 0x173   : > { %10364 = vst [vmem:[#allocation64_spill] sm:$0xff] %v8430_v48  ;;  %10365 = vst [vmem:[#allocation65_spill] sm:$0xff] %v8432_v56  ;;  %3803 = vperm.xlu1 %6904, %v2851_v41   ;;  %3798 = vperm.xlu0 %6903, %v2850_v23   ;;  %v1559_v13 = vpop.f32.mrb[66].mxu0  ;;  %v8434_v5 = vpop.f32.mrb[66].mxu1  ;;  %v504_v23 = vld [vmem:[%s7093_s20 + $0x6c0] sm:$0xff] }
 0x174   : > { %4773 = vst.msk [vmem:[%s7754_s18 + $0x100] sm:$0xff] %vm556_vm1, %v4516_v20  ;;  %v1560_v49 = vadd.f32 %v8270_v52, %v1559_v13  ;;  %v6130_v59 = vpop.f32.mrb[67].mxu0  ;;  %6288 = vmatmul.mubr.msk.f32.gmra.mrb[172].mxu0 %vm556_vm1, %v374_v3  ;;  %6675 = vmatmul.mubr.msk.f32.gmra.mrb[172].mxu1 %vm556_vm1, %v503_v6  ;;  %v6517_v41 = vpop.f32.mrb[67].mxu1 }
 0x175   : > { %6290 = vmatprep.mubr.msk.f32.mxu0 %vm7003_vm0, %v10305_v1  ;;  %6677 = vmatprep.mubr.msk.f32.mxu1 %vm7003_vm0, %v10305_v1  ;;  %v4261_v41 = vmul.f32 %v8261_v24, %v7659_v14  ;;  %v376_v14 = vld [vmem:[%s7093_s20 + $0x2c0] sm:$0xff] }
 0x176   : > { %v4517_v20 = vadd.f32 %v4260_v30, %v1560_v49  ;;  %v8451_v59 = vpop.permute.xlu1 %3493  ;;  %v8453_v3 = vpop.permute.xlu0 %3488  ;;  %v2855_v49 = vld [vmem:[%s7088_s15 + $0x588] sm:$0xff]  ;;  %v2854_v30 = vld [vmem:[%s7088_s15 + $0x580] sm:$0xff] }
 0x177   : > { %10366 = vst [vmem:[#allocation66_spill] sm:$0xff] %v8451_v59  ;;  %10367 = vst [vmem:[#allocation67_spill] sm:$0xff] %v8453_v3  ;;  %3813 = vperm.xlu1 %6904, %v2853_v38   ;;  %3808 = vperm.xlu0 %6903, %v2852_v31   ;;  %v1564_v6 = vpop.f32.mrb[68].mxu0  ;;  %v8455_v13 = vpop.f32.mrb[68].mxu1  ;;  %v505_v31 = vld [vmem:[%s7093_s20 + $0x6c8] sm:$0xff] }
 0x178   : > { %4774 = vst.msk [vmem:[%s7754_s18 + $0x108] sm:$0xff] %vm556_vm1, %v4517_v20  ;;  %v1565_v48 = vadd.f32 %v8270_v52, %v1564_v6  ;;  %v6133_v56 = vpop.f32.mrb[69].mxu0  ;;  %6291 = vmatmul.mubr.msk.f32.gmra.mrb[174].mxu0 %vm556_vm1, %v375_v2  ;;  %6678 = vmatmul.mubr.msk.f32.gmra.mrb[174].mxu1 %vm556_vm1, %v504_v23  ;;  %v6520_v38 = vpop.f32.mrb[69].mxu1 }
 0x179   : > { %6293 = vmatprep.mubr.msk.f32.mxu0 %vm7003_vm0, %v10305_v1  ;;  %6680 = vmatprep.mubr.msk.f32.mxu1 %vm7003_vm0, %v10305_v1  ;;  %v4262_v38 = vmul.f32 %v8261_v24, %v7657_v11  ;;  %v377_v11 = vld [vmem:[%s7093_s20 + $0x2c8] sm:$0xff] }
 0x17a   : > { %v4518_v20 = vadd.f32 %v4261_v41, %v1565_v48  ;;  %v8472_v56 = vpop.permute.xlu1 %3503  ;;  %v8474_v2 = vpop.permute.xlu0 %3498  ;;  %v2857_v48 = vld [vmem:[%s7088_s15 + $0x598] sm:$0xff]  ;;  %v2856_v41 = vld [vmem:[%s7088_s15 + $0x590] sm:$0xff] }
 0x17b   : > { %10368 = vst [vmem:[#allocation68_spill] sm:$0xff] %v8472_v56  ;;  %10369 = vst [vmem:[#allocation69_spill] sm:$0xff] %v8474_v2  ;;  %3823 = vperm.xlu1 %6904, %v2855_v49   ;;  %3818 = vperm.xlu0 %6903, %v2854_v30   ;;  %v1569_v23 = vpop.f32.mrb[70].mxu0  ;;  %v8476_v6 = vpop.f32.mrb[70].mxu1  ;;  %v506_v30 = vld [vmem:[%s7093_s20 + $0x6d0] sm:$0xff] }
 0x17c   : > { %4775 = vst.msk [vmem:[%s7754_s18 + $0x110] sm:$0xff] %vm556_vm1, %v4518_v20  ;;  %v1570_v59 = vadd.f32 %v8270_v52, %v1569_v23  ;;  %v6136_v3 = vpop.f32.mrb[71].mxu0  ;;  %6294 = vmatmul.mubr.msk.f32.gmra.mrb[176].mxu0 %vm556_vm1, %v376_v14  ;;  %6681 = vmatmul.mubr.msk.f32.gmra.mrb[176].mxu1 %vm556_vm1, %v505_v31  ;;  %v6523_v49 = vpop.f32.mrb[71].mxu1 }
 0x17d   : > { %6296 = vmatprep.mubr.msk.f32.mxu0 %vm7003_vm0, %v10305_v1  ;;  %6683 = vmatprep.mubr.msk.f32.mxu1 %vm7003_vm0, %v10305_v1  ;;  %v4263_v49 = vmul.f32 %v8261_v24, %v7673_v26  ;;  %v378_v26 = vld [vmem:[%s7093_s20 + $0x2d0] sm:$0xff] }
 0x17e   : > { %v4519_v20 = vadd.f32 %v4262_v38, %v1570_v59  ;;  %v8493_v3 = vpop.permute.xlu1 %3513  ;;  %v8495_v14 = vpop.permute.xlu0 %3508  ;;  %v2859_v59 = vld [vmem:[%s7088_s15 + $0x5a8] sm:$0xff]  ;;  %v2858_v38 = vld [vmem:[%s7088_s15 + $0x5a0] sm:$0xff] }
 0x17f   : > { %10370 = vst [vmem:[#allocation70_spill] sm:$0xff] %v8493_v3  ;;  %10371 = vst [vmem:[#allocation71_spill] sm:$0xff] %v8495_v14  ;;  %3833 = vperm.xlu1 %6904, %v2857_v48   ;;  %3828 = vperm.xlu0 %6903, %v2856_v41   ;;  %v1574_v31 = vpop.f32.mrb[72].mxu0  ;;  %v8497_v23 = vpop.f32.mrb[72].mxu1  ;;  %v507_v41 = vld [vmem:[%s7093_s20 + $0x6d8] sm:$0xff] }
 0x180   : > { %4776 = vst.msk [vmem:[%s7754_s18 + $0x118] sm:$0xff] %vm556_vm1, %v4519_v20  ;;  %v1575_v56 = vadd.f32 %v8270_v52, %v1574_v31  ;;  %v6139_v2 = vpop.f32.mrb[73].mxu0  ;;  %6297 = vmatmul.mubr.msk.f32.gmra.mrb[178].mxu0 %vm556_vm1, %v377_v11  ;;  %6684 = vmatmul.mubr.msk.f32.gmra.mrb[178].mxu1 %vm556_vm1, %v506_v30  ;;  %v6526_v48 = vpop.f32.mrb[73].mxu1 }
 0x181   : > { %6299 = vmatprep.mubr.msk.f32.mxu0 %vm7003_vm0, %v10305_v1  ;;  %6686 = vmatprep.mubr.msk.f32.mxu1 %vm7003_vm0, %v10305_v1  ;;  %v4264_v48 = vmul.f32 %v8261_v24, %v7671_v25  ;;  %v379_v25 = vld [vmem:[%s7093_s20 + $0x2d8] sm:$0xff] }
 0x182   : > { %v4520_v20 = vadd.f32 %v4263_v49, %v1575_v56  ;;  %v8514_v2 = vpop.permute.xlu1 %3523  ;;  %v8516_v11 = vpop.permute.xlu0 %3518  ;;  %v2861_v56 = vld [vmem:[%s7088_s15 + $0x5b8] sm:$0xff]  ;;  %v2860_v49 = vld [vmem:[%s7088_s15 + $0x5b0] sm:$0xff] }
 0x183   : > { %10372 = vst [vmem:[#allocation72_spill] sm:$0xff] %v8514_v2  ;;  %10373 = vst [vmem:[#allocation73_spill] sm:$0xff] %v8516_v11  ;;  %3843 = vperm.xlu1 %6904, %v2859_v59   ;;  %3838 = vperm.xlu0 %6903, %v2858_v38   ;;  %v1579_v30 = vpop.f32.mrb[74].mxu0  ;;  %v8518_v31 = vpop.f32.mrb[74].mxu1  ;;  %v508_v38 = vld [vmem:[%s7093_s20 + $0x6e0] sm:$0xff] }
 0x184   : > { %4777 = vst.msk [vmem:[%s7754_s18 + $0x120] sm:$0xff] %vm556_vm1, %v4520_v20  ;;  %v1580_v3 = vadd.f32 %v8270_v52, %v1579_v30  ;;  %v6142_v14 = vpop.f32.mrb[75].mxu0  ;;  %6300 = vmatmul.mubr.msk.f32.gmra.mrb[180].mxu0 %vm556_vm1, %v378_v26  ;;  %6687 = vmatmul.mubr.msk.f32.gmra.mrb[180].mxu1 %vm556_vm1, %v507_v41  ;;  %v6529_v59 = vpop.f32.mrb[75].mxu1 }
 0x185   : > { %6302 = vmatprep.mubr.msk.f32.mxu0 %vm7003_vm0, %v10305_v1  ;;  %6689 = vmatprep.mubr.msk.f32.mxu1 %vm7003_vm0, %v10305_v1  ;;  %v4265_v59 = vmul.f32 %v8261_v24, %v7687_v42  ;;  %v380_v42 = vld [vmem:[%s7093_s20 + $0x2e0] sm:$0xff] }
 0x186   : > { %v4521_v20 = vadd.f32 %v4264_v48, %v1580_v3  ;;  %v8535_v14 = vpop.permute.xlu1 %3533  ;;  %v8537_v26 = vpop.permute.xlu0 %3528  ;;  %v2863_v3 = vld [vmem:[%s7088_s15 + $0x5c8] sm:$0xff]  ;;  %v2862_v48 = vld [vmem:[%s7088_s15 + $0x5c0] sm:$0xff] }
 0x187   : > { %10374 = vst [vmem:[#allocation74_spill] sm:$0xff] %v8535_v14  ;;  %10375 = vst [vmem:[#allocation75_spill] sm:$0xff] %v8537_v26  ;;  %3853 = vperm.xlu1 %6904, %v2861_v56   ;;  %3848 = vperm.xlu0 %6903, %v2860_v49   ;;  %v1584_v41 = vpop.f32.mrb[76].mxu0  ;;  %v8539_v30 = vpop.f32.mrb[76].mxu1  ;;  %v509_v49 = vld [vmem:[%s7093_s20 + $0x6e8] sm:$0xff] }
 0x188   : > { %4778 = vst.msk [vmem:[%s7754_s18 + $0x128] sm:$0xff] %vm556_vm1, %v4521_v20  ;;  %v1585_v2 = vadd.f32 %v8270_v52, %v1584_v41  ;;  %v6145_v11 = vpop.f32.mrb[77].mxu0  ;;  %6303 = vmatmul.mubr.msk.f32.gmra.mrb[182].mxu0 %vm556_vm1, %v379_v25  ;;  %6690 = vmatmul.mubr.msk.f32.gmra.mrb[182].mxu1 %vm556_vm1, %v508_v38  ;;  %v6532_v56 = vpop.f32.mrb[77].mxu1 }
 0x189   : > { %6305 = vmatprep.mubr.msk.f32.mxu0 %vm7003_vm0, %v10305_v1  ;;  %6692 = vmatprep.mubr.msk.f32.mxu1 %vm7003_vm0, %v10305_v1  ;;  %v4266_v56 = vmul.f32 %v8261_v24, %v7685_v37  ;;  %v381_v37 = vld [vmem:[%s7093_s20 + $0x2e8] sm:$0xff] }
 0x18a   : > { %v4522_v20 = vadd.f32 %v4265_v59, %v1585_v2  ;;  %v8556_v11 = vpop.permute.xlu1 %3543  ;;  %v8558_v25 = vpop.permute.xlu0 %3538  ;;  %v2865_v2 = vld [vmem:[%s7088_s15 + $0x5d8] sm:$0xff]  ;;  %v2864_v59 = vld [vmem:[%s7088_s15 + $0x5d0] sm:$0xff] }
 0x18b   : > { %10376 = vst [vmem:[#allocation76_spill] sm:$0xff] %v8556_v11  ;;  %10377 = vst [vmem:[#allocation77_spill] sm:$0xff] %v8558_v25  ;;  %3863 = vperm.xlu1 %6904, %v2863_v3   ;;  %3858 = vperm.xlu0 %6903, %v2862_v48   ;;  %v1589_v38 = vpop.f32.mrb[78].mxu0  ;;  %v8560_v41 = vpop.f32.mrb[78].mxu1  ;;  %v510_v48 = vld [vmem:[%s7093_s20 + $0x6f0] sm:$0xff] }
 0x18c   : > { %4779 = vst.msk [vmem:[%s7754_s18 + $0x130] sm:$0xff] %vm556_vm1, %v4522_v20  ;;  %v1590_v14 = vadd.f32 %v8270_v52, %v1589_v38  ;;  %v6148_v26 = vpop.f32.mrb[79].mxu0  ;;  %6306 = vmatmul.mubr.msk.f32.gmra.mrb[184].mxu0 %vm556_vm1, %v380_v42  ;;  %6693 = vmatmul.mubr.msk.f32.gmra.mrb[184].mxu1 %vm556_vm1, %v509_v49  ;;  %v6535_v3 = vpop.f32.mrb[79].mxu1 }
 0x18d   : > { %6308 = vmatprep.mubr.msk.f32.mxu0 %vm7003_vm0, %v10305_v1  ;;  %6695 = vmatprep.mubr.msk.f32.mxu1 %vm7003_vm0, %v10305_v1  ;;  %v4267_v3 = vmul.f32 %v8261_v24, %v7701_v54  ;;  %v382_v54 = vld [vmem:[%s7093_s20 + $0x2f0] sm:$0xff] }
 0x18e   : > { %v4523_v20 = vadd.f32 %v4266_v56, %v1590_v14  ;;  %v8577_v26 = vpop.permute.xlu1 %3553  ;;  %v8579_v42 = vpop.permute.xlu0 %3548  ;;  %v2867_v14 = vld [vmem:[%s7088_s15 + $0x5e8] sm:$0xff]  ;;  %v2866_v56 = vld [vmem:[%s7088_s15 + $0x5e0] sm:$0xff] }
 0x18f   : > { %10378 = vst [vmem:[#allocation78_spill] sm:$0xff] %v8577_v26  ;;  %10379 = vst [vmem:[#allocation79_spill] sm:$0xff] %v8579_v42  ;;  %3873 = vperm.xlu1 %6904, %v2865_v2   ;;  %3868 = vperm.xlu0 %6903, %v2864_v59   ;;  %v1594_v49 = vpop.f32.mrb[80].mxu0  ;;  %v8581_v38 = vpop.f32.mrb[80].mxu1  ;;  %v511_v59 = vld [vmem:[%s7093_s20 + $0x6f8] sm:$0xff] }
 0x190   : > { %4780 = vst.msk [vmem:[%s7754_s18 + $0x138] sm:$0xff] %vm556_vm1, %v4523_v20  ;;  %v1595_v11 = vadd.f32 %v8270_v52, %v1594_v49  ;;  %v6151_v25 = vpop.f32.mrb[81].mxu0  ;;  %6309 = vmatmul.mubr.msk.f32.gmra.mrb[186].mxu0 %vm556_vm1, %v381_v37  ;;  %6696 = vmatmul.mubr.msk.f32.gmra.mrb[186].mxu1 %vm556_vm1, %v510_v48  ;;  %v6538_v2 = vpop.f32.mrb[81].mxu1 }
 0x191   : > { %6311 = vmatprep.mubr.msk.f32.mxu0 %vm7003_vm0, %v10305_v1  ;;  %6698 = vmatprep.mubr.msk.f32.mxu1 %vm7003_vm0, %v10305_v1  ;;  %v4268_v2 = vmul.f32 %v8261_v24, %v7699_v53  ;;  %v383_v53 = vld [vmem:[%s7093_s20 + $0x2f8] sm:$0xff] }
 0x192   : > { %v4524_v20 = vadd.f32 %v4267_v3, %v1595_v11  ;;  %v8598_v25 = vpop.permute.xlu1 %3563  ;;  %v8600_v37 = vpop.permute.xlu0 %3558  ;;  %v2869_v11 = vld [vmem:[%s7088_s15 + $0x5f8] sm:$0xff]  ;;  %v2868_v3 = vld [vmem:[%s7088_s15 + $0x5f0] sm:$0xff] }
 0x193   : > { %10380 = vst [vmem:[#allocation80_spill] sm:$0xff] %v8598_v25  ;;  %10381 = vst [vmem:[#allocation81_spill] sm:$0xff] %v8600_v37  ;;  %3883 = vperm.xlu1 %6904, %v2867_v14   ;;  %3878 = vperm.xlu0 %6903, %v2866_v56   ;;  %v1599_v48 = vpop.f32.mrb[82].mxu0  ;;  %v8602_v49 = vpop.f32.mrb[82].mxu1  ;;  %v512_v56 = vld [vmem:[%s7093_s20 + $0x700] sm:$0xff] }
 0x194   : > { %4781 = vst.msk [vmem:[%s7754_s18 + $0x140] sm:$0xff] %vm556_vm1, %v4524_v20  ;;  %v1600_v26 = vadd.f32 %v8270_v52, %v1599_v48  ;;  %v6154_v42 = vpop.f32.mrb[83].mxu0  ;;  %6312 = vmatmul.mubr.msk.f32.gmra.mrb[188].mxu0 %vm556_vm1, %v382_v54  ;;  %6699 = vmatmul.mubr.msk.f32.gmra.mrb[188].mxu1 %vm556_vm1, %v511_v59  ;;  %v6541_v14 = vpop.f32.mrb[83].mxu1 }
 0x195   : > { %6314 = vmatprep.mubr.msk.f32.mxu0 %vm7003_vm0, %v10305_v1  ;;  %6701 = vmatprep.mubr.msk.f32.mxu1 %vm7003_vm0, %v10305_v1  ;;  %v4269_v14 = vmul.f32 %v8261_v24, %v7730_v10  ;;  %v384_v10 = vld [vmem:[%s7093_s20 + $0x300] sm:$0xff] }
 0x196   : > { %v4525_v20 = vadd.f32 %v4268_v2, %v1600_v26  ;;  %v8619_v42 = vpop.permute.xlu1 %3573  ;;  %v8621_v54 = vpop.permute.xlu0 %3568  ;;  %v2871_v26 = vld [vmem:[%s7088_s15 + $0x608] sm:$0xff]  ;;  %v2870_v2 = vld [vmem:[%s7088_s15 + $0x600] sm:$0xff] }
 0x197   : > { %10382 = vst [vmem:[#allocation82_spill] sm:$0xff] %v8619_v42  ;;  %10383 = vst [vmem:[#allocation83_spill] sm:$0xff] %v8621_v54  ;;  %3893 = vperm.xlu1 %6904, %v2869_v11   ;;  %3888 = vperm.xlu0 %6903, %v2868_v3   ;;  %v1604_v59 = vpop.f32.mrb[84].mxu0  ;;  %v8623_v48 = vpop.f32.mrb[84].mxu1  ;;  %v513_v3 = vld [vmem:[%s7093_s20 + $0x708] sm:$0xff]  ;;  %v4270_v54 = vmul.f32 %v8261_v24, %v7728_v9 }
 0x198   : > { %4782 = vst.msk [vmem:[%s7754_s18 + $0x148] sm:$0xff] %vm556_vm1, %v4525_v20  ;;  %v1605_v25 = vadd.f32 %v8270_v52, %v1604_v59  ;;  %v6157_v37 = vpop.f32.mrb[85].mxu0  ;;  %6315 = vmatmul.mubr.msk.f32.gmra.mrb[190].mxu0 %vm556_vm1, %v383_v53  ;;  %6702 = vmatmul.mubr.msk.f32.gmra.mrb[190].mxu1 %vm556_vm1, %v512_v56  ;;  %v6544_v11 = vpop.f32.mrb[85].mxu1  ;;  %v2040_v53 = vadd.f32 %v8270_v52, %v7732_v18  ;;  %v2873_v18 = vld [vmem:[%s7088_s15 + $0x618] sm:$0xff]  ;;  %v385_v9 = vld [vmem:[%s7093_s20 + $0x308] sm:$0xff] }
 0x199   : > { %6317 = vmatprep.mubr.msk.f32.mxu0 %vm7003_vm0, %v10305_v1  ;;  %6704 = vmatprep.mubr.msk.f32.mxu1 %vm7003_vm0, %v10305_v1 }
 0x19a   : > { %v4526_v20 = vadd.f32 %v4269_v14, %v1605_v25  ;;  %v3584_v37 = vpop.permute.xlu1 %3583  ;;  %v8640_v59 = vpop.permute.xlu0 %3578 }
 0x19b   : > { %10384 = vst [vmem:[#allocation84_spill] sm:$0xff] %v8640_v59  ;;  %v4356_v56 = vmul.f32 %v8261_v24, %v3584_v37  ;;  %3903 = vperm.xlu1 %6904, %v2871_v26   ;;  %3898 = vperm.xlu0 %6903, %v2870_v2   ;;  %v1609_v11 = vpop.f32.mrb[86].mxu0  ;;  %v8645_v42 = vpop.f32.mrb[86].mxu1  ;;  %v2872_v26 = vld [vmem:[%s7088_s15 + $0x610] sm:$0xff] }
 0x19c   : > { %4783 = vst.msk [vmem:[%s7754_s18 + $0x150] sm:$0xff] %vm556_vm1, %v4526_v20  ;;  %v1610_v25 = vadd.f32 %v8270_v52, %v1609_v11  ;;  %v6160_v14 = vpop.f32.mrb[87].mxu0  ;;  %6318 = vmatmul.mubr.msk.f32.gmra.mrb[192].mxu0 %vm556_vm1, %v384_v10  ;;  %6705 = vmatmul.mubr.msk.f32.gmra.mrb[192].mxu1 %vm556_vm1, %v513_v3  ;;  %v6547_v2 = vpop.f32.mrb[87].mxu1  ;;  %v514_v20 = vld [vmem:[%s7093_s20 + $0x710] sm:$0xff]  ;;  %v2045_v11 = vadd.f32 %v8270_v52, %v7749_v60 }
 0x19d   : > { %v4613_v37 = vadd.f32 %v4356_v56, %v2040_v53  ;;  %6320 = vmatprep.mubr.msk.f32.mxu0 %vm7003_vm0, %v10305_v1  ;;  %6707 = vmatprep.mubr.msk.f32.mxu1 %vm7003_vm0, %v10305_v1  ;;  %v2050_v53 = vadd.f32 %v8270_v52, %v7773_v36 }
 0x19e   : > { %v4527_v14 = vadd.f32 %v4270_v54, %v1610_v25  ;;  %v3594_v10 = vpop.permute.xlu1 %3593  ;;  %v3589_v3 = vpop.permute.xlu0 %3588  ;;  %v4271_v54 = vmul.f32 %v8261_v24, %v7747_v47  ;;  %v386_v47 = vld [vmem:[%s7093_s20 + $0x310] sm:$0xff] }
 0x19f   : > { %4870 = vst.msk [vmem:[%s7754_s18 + $0x408] sm:$0xff] %vm556_vm1, %v4613_v37  ;;  %v4358_v56 = vmul.f32 %v8261_v24, %v3594_v10  ;;  %v4357_v2 = vmul.f32 %v8261_v24, %v3589_v3  ;;  %3913 = vperm.xlu1 %6904, %v2873_v18   ;;  %3908 = vperm.xlu0 %6903, %v2872_v26   ;;  %v1614_v59 = vpop.f32.mrb[88].mxu0  ;;  %v8670_v60 = vpop.f32.mrb[88].mxu1  ;;  %v2875_v18 = vld [vmem:[%s7088_s15 + $0x628] sm:$0xff]  ;;  %v2874_v26 = vld [vmem:[%s7088_s15 + $0x620] sm:$0xff] }
 0x1a0   : > { %4784 = vst.msk [vmem:[%s7754_s18 + $0x158] sm:$0xff] %vm556_vm1, %v4527_v14  ;;  %v1615_v36 = vadd.f32 %v8270_v52, %v1614_v59  ;;  %v6163_v25 = vpop.f32.mrb[89].mxu0  ;;  %6321 = vmatmul.mubr.msk.f32.gmra.mrb[194].mxu0 %vm556_vm1, %v385_v9  ;;  %6708 = vmatmul.mubr.msk.f32.gmra.mrb[194].mxu1 %vm556_vm1, %v514_v20  ;;  %v6550_v37 = vpop.f32.mrb[89].mxu1  ;;  %v515_v59 = vld [vmem:[%s7093_s20 + $0x718] sm:$0xff]  ;;  %v2055_v9 = vadd.f32 %v8270_v52, %v7794_v35 }
 0x1a1   : > { %v4615_v10 = vadd.f32 %v4358_v56, %v2050_v53  ;;  %v4614_v3 = vadd.f32 %v4357_v2, %v2045_v11  ;;  %6323 = vmatprep.mubr.msk.f32.mxu0 %vm7003_vm0, %v10305_v1  ;;  %6710 = vmatprep.mubr.msk.f32.mxu1 %vm7003_vm0, %v10305_v1  ;;  %v2060_v53 = vadd.f32 %v8270_v52, %v7815_v61 }
 0x1a2   : > { %v4528_v14 = vadd.f32 %v4271_v54, %v1615_v36  ;;  %v3604_v20 = vpop.permute.xlu1 %3603  ;;  %v3599_v25 = vpop.permute.xlu0 %3598  ;;  %v4272_v54 = vmul.f32 %v8261_v24, %v7745_v44  ;;  %v387_v44 = vld [vmem:[%s7093_s20 + $0x318] sm:$0xff] }
 0x1a3   : > { %4872 = vst.msk [vmem:[%s7754_s18 + $0x418] sm:$0xff] %vm556_vm1, %v4615_v10  ;;  %4871 = vst.msk [vmem:[%s7754_s18 + $0x410] sm:$0xff] %vm556_vm1, %v4614_v3  ;;  %v4360_v11 = vmul.f32 %v8261_v24, %v3604_v20  ;;  %v4359_v56 = vmul.f32 %v8261_v24, %v3599_v25  ;;  %3923 = vperm.xlu1 %6904, %v2875_v18   ;;  %3918 = vperm.xlu0 %6903, %v2874_v26   ;;  %v1619_v35 = vpop.f32.mrb[90].mxu0  ;;  %v8697_v2 = vpop.f32.mrb[90].mxu1  ;;  %v2877_v18 = vld [vmem:[%s7088_s15 + $0x638] sm:$0xff]  ;;  %v2876_v26 = vld [vmem:[%s7088_s15 + $0x630] sm:$0xff] }
 0x1a4   : > { %4785 = vst.msk [vmem:[%s7754_s18 + $0x160] sm:$0xff] %vm556_vm1, %v4528_v14  ;;  %v1620_v61 = vadd.f32 %v8270_v52, %v1619_v35  ;;  %v6166_v36 = vpop.f32.mrb[91].mxu0  ;;  %6324 = vmatmul.mubr.msk.f32.gmra.mrb[196].mxu0 %vm556_vm1, %v386_v47  ;;  %6711 = vmatmul.mubr.msk.f32.gmra.mrb[196].mxu1 %vm556_vm1, %v515_v59  ;;  %v6553_v37 = vpop.f32.mrb[91].mxu1  ;;  %v516_v14 = vld [vmem:[%s7093_s20 + $0x720] sm:$0xff]  ;;  %v2065_v47 = vadd.f32 %v8270_v52, %v7836_v17 }
 0x1a5   : > { %v4617_v10 = vadd.f32 %v4360_v11, %v2060_v53  ;;  %v4616_v3 = vadd.f32 %v4359_v56, %v2055_v9  ;;  %6326 = vmatprep.mubr.msk.f32.mxu0 %vm7003_vm0, %v10305_v1  ;;  %6713 = vmatprep.mubr.msk.f32.mxu1 %vm7003_vm0, %v10305_v1  ;;  %v2070_v53 = vadd.f32 %v8270_v52, %v7857_v19  ;;  %v2878_v36 = vld [vmem:[%s7088_s15 + $0x640] sm:$0xff] }
 0x1a6   : > { %v4529_v20 = vadd.f32 %v4272_v54, %v1620_v61  ;;  %v3614_v59 = vpop.permute.xlu1 %3613  ;;  %v3609_v25 = vpop.permute.xlu0 %3608  ;;  %v4273_v35 = vmul.f32 %v8261_v24, %v7771_v32  ;;  %v2879_v61 = vld [vmem:[%s7088_s15 + $0x648] sm:$0xff]  ;;  %v388_v32 = vld [vmem:[%s7093_s20 + $0x320] sm:$0xff] }
 0x1a7   : > { %4874 = vst.msk [vmem:[%s7754_s18 + $0x428] sm:$0xff] %vm556_vm1, %v4617_v10  ;;  %4873 = vst.msk [vmem:[%s7754_s18 + $0x420] sm:$0xff] %vm556_vm1, %v4616_v3  ;;  %v4362_v9 = vmul.f32 %v8261_v24, %v3614_v59  ;;  %v4361_v11 = vmul.f32 %v8261_v24, %v3609_v25  ;;  %3933 = vperm.xlu1 %6904, %v2877_v18   ;;  %3928 = vperm.xlu0 %6903, %v2876_v26   ;;  %v1624_v17 = vpop.f32.mrb[92].mxu0  ;;  %v8724_v56 = vpop.f32.mrb[92].mxu1  ;;  %v517_v10 = vld [vmem:[%s7093_s20 + $0x728] sm:$0xff] }
 0x1a8   : > { %4786 = vst.msk [vmem:[%s7754_s18 + $0x168] sm:$0xff] %vm556_vm1, %v4529_v20  ;;  %v1625_v19 = vadd.f32 %v8270_v52, %v1624_v17  ;;  %v6169_v54 = vpop.f32.mrb[93].mxu0  ;;  %6327 = vmatmul.mubr.msk.f32.gmra.mrb[198].mxu0 %vm556_vm1, %v387_v44  ;;  %6714 = vmatmul.mubr.msk.f32.gmra.mrb[198].mxu1 %vm556_vm1, %v516_v14  ;;  %v6556_v18 = vpop.f32.mrb[93].mxu1  ;;  %v2075_v3 = vadd.f32 %v8270_v52, %v7878_v50 }
 0x1a9   : > { %v4619_v26 = vadd.f32 %v4362_v9, %v2070_v53  ;;  %v4618_v37 = vadd.f32 %v4361_v11, %v2065_v47  ;;  %6329 = vmatprep.mubr.msk.f32.mxu0 %vm7003_vm0, %v10305_v1  ;;  %6716 = vmatprep.mubr.msk.f32.mxu1 %vm7003_vm0, %v10305_v1  ;;  %v2080_v59 = vadd.f32 %v8270_v52, %v7899_v7  ;;  %v10385_v9 = vld [vmem:[#allocation3_spill] sm:$0xff]  ;;  %v389_v18 = vld [vmem:[%s7093_s20 + $0x328] sm:$0xff] }
 0x1aa   : > { %v4530_v44 = vadd.f32 %v4273_v35, %v1625_v19  ;;  %v3624_v14 = vpop.permute.xlu1 %3623  ;;  %v3619_v20 = vpop.permute.xlu0 %3618  ;;  %v4274_v11 = vmul.f32 %v8261_v24, %v10385_v9  ;;  %v2881_v35 = vld [vmem:[%s7088_s15 + $0x658] sm:$0xff]  ;;  %v2880_v19 = vld [vmem:[%s7088_s15 + $0x650] sm:$0xff]  ;;  %v2883_v9 = vld [vmem:[%s7088_s15 + $0x668] sm:$0xff] }
 0x1ab   : > { %4876 = vst.msk [vmem:[%s7754_s18 + $0x438] sm:$0xff] %vm556_vm1, %v4619_v26  ;;  %4875 = vst.msk [vmem:[%s7754_s18 + $0x430] sm:$0xff] %vm556_vm1, %v4618_v37  ;;  %v4364_v47 = vmul.f32 %v8261_v24, %v3624_v14  ;;  %v4363_v25 = vmul.f32 %v8261_v24, %v3619_v20  ;;  %3943 = vperm.xlu1 %6904, %v2879_v61   ;;  %3938 = vperm.xlu0 %6903, %v2878_v36   ;;  %v1629_v50 = vpop.f32.mrb[94].mxu0  ;;  %v8751_v53 = vpop.f32.mrb[94].mxu1  ;;  %v518_v26 = vld [vmem:[%s7093_s20 + $0x730] sm:$0xff] }
 0x1ac   : > { %4787 = vst.msk [vmem:[%s7754_s18 + $0x170] sm:$0xff] %vm556_vm1, %v4530_v44  ;;  %v1630_v7 = vadd.f32 %v8270_v52, %v1629_v50  ;;  %v6172_v17 = vpop.f32.mrb[95].mxu0  ;;  %6330 = vmatmul.mubr.msk.f32.gmra.mrb[200].mxu0 %vm556_vm1, %v388_v32  ;;  %6717 = vmatmul.mubr.msk.f32.gmra.mrb[200].mxu1 %vm556_vm1, %v517_v10  ;;  %v6559_v54 = vpop.f32.mrb[95].mxu1  ;;  %v2085_v37 = vadd.f32 %v8270_v52, %v7920_v22 }
 0x1ad   : > { %v4621_v61 = vadd.f32 %v4364_v47, %v2080_v59  ;;  %v4620_v36 = vadd.f32 %v4363_v25, %v2075_v3  ;;  %6332 = vmatprep.mubr.msk.f32.mxu0 %vm7003_vm0, %v10305_v1  ;;  %6719 = vmatprep.mubr.msk.f32.mxu1 %vm7003_vm0, %v10305_v1  ;;  %v2090_v14 = vadd.f32 %v8270_v52, %v7941_v43  ;;  %v10386_v47 = vld [vmem:[#allocation5_spill] sm:$0xff] }
 0x1ae   : > { %v4531_v32 = vadd.f32 %v4274_v11, %v1630_v7  ;;  %v3634_v10 = vpop.permute.xlu1 %3633  ;;  %v3629_v44 = vpop.permute.xlu0 %3628  ;;  %v4275_v25 = vmul.f32 %v8261_v24, %v10386_v47  ;;  %v2882_v11 = vld [vmem:[%s7088_s15 + $0x660] sm:$0xff]  ;;  %v2884_v47 = vld [vmem:[%s7088_s15 + $0x670] sm:$0xff] }
 0x1af   : > { %4878 = vst.msk [vmem:[%s7754_s18 + $0x448] sm:$0xff] %vm556_vm1, %v4621_v61  ;;  %4877 = vst.msk [vmem:[%s7754_s18 + $0x440] sm:$0xff] %vm556_vm1, %v4620_v36  ;;  %v4366_v3 = vmul.f32 %v8261_v24, %v3634_v10  ;;  %v4365_v20 = vmul.f32 %v8261_v24, %v3629_v44  ;;  %3953 = vperm.xlu1 %6904, %v2881_v35   ;;  %3948 = vperm.xlu0 %6903, %v2880_v19   ;;  %v1634_v22 = vpop.f32.mrb[96].mxu0  ;;  %v8778_v59 = vpop.f32.mrb[96].mxu1  ;;  %v390_v24 = vld [vmem:[%s7093_s20 + $0x330] sm:$0xff]  ;;  %v10387_v44 = vld [vmem:[#allocation4_spill] sm:$0xff] }
 0x1b0   : > { %4788 = vst.msk [vmem:[%s7754_s18 + $0x178] sm:$0xff] %vm556_vm1, %v4531_v32  ;;  %v1635_v43 = vadd.f32 %v8270_v52, %v1634_v22  ;;  %v6175_v50 = vpop.f32.mrb[97].mxu0  ;;  %6333 = vmatmul.mubr.msk.f32.gmra.mrb[202].mxu0 %vm556_vm1, %v389_v18  ;;  %6720 = vmatmul.mubr.msk.f32.gmra.mrb[202].mxu1 %vm556_vm1, %v518_v26  ;;  %v6562_v7 = vpop.f32.mrb[97].mxu1  ;;  %v519_v52 = vld [vmem:[%s7093_s20 + $0x738] sm:$0xff]  ;;  %v8798_v19 = vld [vmem:[%s10296_s3] ss:$0 sm:$0xff] }
 0x1b1   : > { %v4623_v17 = vadd.f32 %v4366_v3, %v2090_v14  ;;  %v4622_v35 = vadd.f32 %v4365_v20, %v2085_v37  ;;  %6335 = vmatprep.mubr.msk.f32.mxu0 %vm7003_vm0, %v10305_v1  ;;  %6722 = vmatprep.mubr.msk.f32.mxu1 %vm7003_vm0, %v10305_v1  ;;  %v2095_v54 = vadd.f32 %v8798_v19, %v7962_v4  ;;  %v8811_v37 = vld [vmem:[%s10297_s4] ss:$0 sm:$0xff]  ;;  %v2885_v22 = vld [vmem:[%s7088_s15 + $0x678] sm:$0xff] }
 0x1b2   : > { %v4532_v61 = vadd.f32 %v4275_v25, %v1635_v43  ;;  %v3644_v36 = vpop.permute.xlu1 %3643  ;;  %v3639_v18 = vpop.permute.xlu0 %3638  ;;  %v2100_v26 = vadd.f32 %v8798_v19, %v7983_v16  ;;  %v4276_v14 = vmul.f32 %v8811_v37, %v10387_v44  ;;  %v2105_v7 = vadd.f32 %v8798_v19, %v8004_v8 }
 0x1b3   : > { %4880 = vst.msk [vmem:[%s7754_s18 + $0x458] sm:$0xff] %vm556_vm1, %v4623_v17  ;;  %4879 = vst.msk [vmem:[%s7754_s18 + $0x450] sm:$0xff] %vm556_vm1, %v4622_v35  ;;  %v4368_v32 = vmul.f32 %v8811_v37, %v3644_v36  ;;  %v4367_v4 = vmul.f32 %v8811_v37, %v3639_v18  ;;  %3963 = vperm.xlu1 %6904, %v2883_v9   ;;  %3958 = vperm.xlu0 %6903, %v2882_v11   ;;  %v1639_v10 = vpop.f32.mrb[98].mxu0  ;;  %v8815_v16 = vpop.f32.mrb[98].mxu1  ;;  %v391_v9 = vld [vmem:[%s7093_s20 + $0x338] sm:$0xff]  ;;  %v520_v11 = vld [vmem:[%s7093_s20 + $0x740] sm:$0xff] }
 0x1b4   : > { %4789 = vst.msk [vmem:[%s7754_s18 + $0x180] sm:$0xff] %vm556_vm1, %v4532_v61  ;;  %v1640_v3 = vadd.f32 %v8798_v19, %v1639_v10  ;;  %v6178_v20 = vpop.f32.mrb[99].mxu0  ;;  %6336 = vmatmul.mubr.msk.f32.gmra.mrb[204].mxu0 %vm556_vm1, %v390_v24  ;;  %6723 = vmatmul.mubr.msk.f32.gmra.mrb[204].mxu1 %vm556_vm1, %v519_v52  ;;  %v6565_v25 = vpop.f32.mrb[99].mxu1  ;;  %v2110_v52 = vadd.f32 %v8798_v19, %v8025_v29  ;;  %v10388_v18 = vld [vmem:[#allocation7_spill] sm:$0xff]  ;;  %v2886_v10 = vld [vmem:[%s7088_s15 + $0x680] sm:$0xff] }
 0x1b5   : > { %v4625_v43 = vadd.f32 %v4368_v32, %v2100_v26  ;;  %v4624_v50 = vadd.f32 %v4367_v4, %v2095_v54  ;;  %6338 = vmatprep.mubr.msk.f32.mxu0 %vm7003_vm0, %v10305_v1  ;;  %6725 = vmatprep.mubr.msk.f32.mxu1 %vm7003_vm0, %v10305_v1  ;;  %v4277_v26 = vmul.f32 %v8811_v37, %v10388_v18  ;;  %v2887_v4 = vld [vmem:[%s7088_s15 + $0x688] sm:$0xff]  ;;  %v392_v20 = vld [vmem:[%s7093_s20 + $0x340] sm:$0xff] }
 0x1b6   : > { %v4533_v17 = vadd.f32 %v4276_v14, %v1640_v3  ;;  %v3654_v35 = vpop.permute.xlu1 %3653  ;;  %v3649_v24 = vpop.permute.xlu0 %3648 }
 0x1b7   : > { %4882 = vst.msk [vmem:[%s7754_s18 + $0x468] sm:$0xff] %vm556_vm1, %v4625_v43  ;;  %4881 = vst.msk [vmem:[%s7754_s18 + $0x460] sm:$0xff] %vm556_vm1, %v4624_v50  ;;  %v4370_v54 = vmul.f32 %v8811_v37, %v3654_v35  ;;  %v4369_v61 = vmul.f32 %v8811_v37, %v3649_v24  ;;  %3973 = vperm.xlu1 %6904, %v2885_v22   ;;  %3968 = vperm.xlu0 %6903, %v2884_v47   ;;  %v1644_v8 = vpop.f32.mrb[100].mxu0  ;;  %v8842_v36 = vpop.f32.mrb[100].mxu1  ;;  %v521_v22 = vld [vmem:[%s7093_s20 + $0x748] sm:$0xff]  ;;  %v10389_v35 = vld [vmem:[#allocation6_spill] sm:$0xff] }
 0x1b8   : > { %4790 = vst.msk [vmem:[%s7754_s18 + $0x188] sm:$0xff] %vm556_vm1, %v4533_v17  ;;  %v1645_v29 = vadd.f32 %v8798_v19, %v1644_v8  ;;  %v6181_v32 = vpop.f32.mrb[101].mxu0  ;;  %6339 = vmatmul.mubr.msk.f32.gmra.mrb[206].mxu0 %vm556_vm1, %v391_v9  ;;  %6726 = vmatmul.mubr.msk.f32.gmra.mrb[206].mxu1 %vm556_vm1, %v520_v11  ;;  %v6568_v44 = vpop.f32.mrb[101].mxu1  ;;  %v2115_v47 = vadd.f32 %v8798_v19, %v8046_v15 }
 0x1b9   : > { %v4627_v14 = vadd.f32 %v4370_v54, %v2110_v52  ;;  %v4626_v3 = vadd.f32 %v4369_v61, %v2105_v7  ;;  %6341 = vmatprep.mubr.msk.f32.mxu0 %vm7003_vm0, %v10305_v1  ;;  %6728 = vmatprep.mubr.msk.f32.mxu1 %vm7003_vm0, %v10305_v1  ;;  %v2120_v9 = vadd.f32 %v8798_v19, %v8067_v21  ;;  %v2889_v54 = vld [vmem:[%s7088_s15 + $0x698] sm:$0xff]  ;;  %v2888_v61 = vld [vmem:[%s7088_s15 + $0x690] sm:$0xff] }
 0x1ba   : > { %v4534_v25 = vadd.f32 %v4277_v26, %v1645_v29  ;;  %v3664_v43 = vpop.permute.xlu1 %3663  ;;  %v3659_v50 = vpop.permute.xlu0 %3658  ;;  %v4278_v24 = vmul.f32 %v8811_v37, %v10389_v35  ;;  %v393_v29 = vld [vmem:[%s7093_s20 + $0x348] sm:$0xff]  ;;  %v522_v32 = vld [vmem:[%s7093_s20 + $0x750] sm:$0xff] }
 0x1bb   : > { %4884 = vst.msk [vmem:[%s7754_s18 + $0x478] sm:$0xff] %vm556_vm1, %v4627_v14  ;;  %4883 = vst.msk [vmem:[%s7754_s18 + $0x470] sm:$0xff] %vm556_vm1, %v4626_v3  ;;  %v4372_v11 = vmul.f32 %v8811_v37, %v3664_v43  ;;  %v4371_v7 = vmul.f32 %v8811_v37, %v3659_v50  ;;  %3983 = vperm.xlu1 %6904, %v2887_v4   ;;  %3978 = vperm.xlu0 %6903, %v2886_v10   ;;  %v1649_v15 = vpop.f32.mrb[102].mxu0  ;;  %v8869_v17 = vpop.f32.mrb[102].mxu1 }
 0x1bc   : > { %4791 = vst.msk [vmem:[%s7754_s18 + $0x190] sm:$0xff] %vm556_vm1, %v4534_v25  ;;  %v1650_v21 = vadd.f32 %v8798_v19, %v1649_v15  ;;  %v6184_v52 = vpop.f32.mrb[103].mxu0  ;;  %6342 = vmatmul.mubr.msk.f32.gmra.mrb[208].mxu0 %vm556_vm1, %v392_v20  ;;  %6729 = vmatmul.mubr.msk.f32.gmra.mrb[208].mxu1 %vm556_vm1, %v521_v22  ;;  %v6571_v8 = vpop.f32.mrb[103].mxu1  ;;  %v2125_v4 = vadd.f32 %v8798_v19, %v8088_v28  ;;  %v10390_v25 = vld [vmem:[#allocation9_spill] sm:$0xff] }
 0x1bd   : > { %v4629_v18 = vadd.f32 %v4372_v11, %v2120_v9  ;;  %v4628_v26 = vadd.f32 %v4371_v7, %v2115_v47  ;;  %6344 = vmatprep.mubr.msk.f32.mxu0 %vm7003_vm0, %v10305_v1  ;;  %6731 = vmatprep.mubr.msk.f32.mxu1 %vm7003_vm0, %v10305_v1  ;;  %v2130_v3 = vadd.f32 %v8798_v19, %v8109_v27  ;;  %v2891_v9 = vld [vmem:[%s7088_s15 + $0x6a8] sm:$0xff]  ;;  %v2890_v11 = vld [vmem:[%s7088_s15 + $0x6a0] sm:$0xff] }
 0x1be   : > { %v4535_v10 = vadd.f32 %v4278_v24, %v1650_v21  ;;  %v3674_v44 = vpop.permute.xlu1 %3673  ;;  %v3669_v14 = vpop.permute.xlu0 %3668  ;;  %v4279_v43 = vmul.f32 %v8811_v37, %v10390_v25  ;;  %v394_v24 = vld [vmem:[%s7093_s20 + $0x350] sm:$0xff]  ;;  %v523_v21 = vld [vmem:[%s7093_s20 + $0x758] sm:$0xff]  ;;  %v2135_v52 = vadd.f32 %v8798_v19, %v8130_v34 }
 0x1bf   : > { %4886 = vst.msk [vmem:[%s7754_s18 + $0x488] sm:$0xff] %vm556_vm1, %v4629_v18  ;;  %4885 = vst.msk [vmem:[%s7754_s18 + $0x480] sm:$0xff] %vm556_vm1, %v4628_v26  ;;  %v4374_v20 = vmul.f32 %v8811_v37, %v3674_v44  ;;  %v4373_v22 = vmul.f32 %v8811_v37, %v3669_v14  ;;  %3993 = vperm.xlu1 %6904, %v2889_v54   ;;  %3988 = vperm.xlu0 %6903, %v2888_v61   ;;  %v1654_v28 = vpop.f32.mrb[104].mxu0  ;;  %v8896_v47 = vpop.f32.mrb[104].mxu1  ;;  %v2893_v14 = vld [vmem:[%s7088_s15 + $0x6b8] sm:$0xff] }
 0x1c0   : > { %4792 = vst.msk [vmem:[%s7754_s18 + $0x198] sm:$0xff] %vm556_vm1, %v4535_v10  ;;  %v1655_v27 = vadd.f32 %v8798_v19, %v1654_v28  ;;  %v6187_v50 = vpop.f32.mrb[105].mxu0  ;;  %6345 = vmatmul.mubr.msk.f32.gmra.mrb[210].mxu0 %vm556_vm1, %v393_v29  ;;  %6732 = vmatmul.mubr.msk.f32.gmra.mrb[210].mxu1 %vm556_vm1, %v522_v32  ;;  %v6574_v7 = vpop.f32.mrb[105].mxu1  ;;  %v2140_v18 = vadd.f32 %v8798_v19, %v8151_v33  ;;  %v395_v25 = vld [vmem:[%s7093_s20 + $0x358] sm:$0xff] }
 0x1c1   : > { %v4631_v15 = vadd.f32 %v4374_v20, %v2130_v3  ;;  %v4630_v35 = vadd.f32 %v4373_v22, %v2125_v4  ;;  %6347 = vmatprep.mubr.msk.f32.mxu0 %vm7003_vm0, %v10305_v1  ;;  %6734 = vmatprep.mubr.msk.f32.mxu1 %vm7003_vm0, %v10305_v1  ;;  %v10391_v4 = vld [vmem:[#allocation8_spill] sm:$0xff]  ;;  %v2892_v3 = vld [vmem:[%s7088_s15 + $0x6b0] sm:$0xff]  ;;  %v2150_v7 = vadd.f32 %v8798_v19, %v8193_v39 }
 0x1c2   : > { %v4536_v54 = vadd.f32 %v4279_v43, %v1655_v27  ;;  %v3684_v61 = vpop.permute.xlu1 %3683  ;;  %v3679_v8 = vpop.permute.xlu0 %3678  ;;  %v4280_v10 = vmul.f32 %v8811_v37, %v10391_v4  ;;  %v524_v43 = vld [vmem:[%s7093_s20 + $0x760] sm:$0xff]  ;;  %v2145_v27 = vadd.f32 %v8798_v19, %v8172_v40  ;;  %v525_v4 = vld [vmem:[%s7093_s20 + $0x768] sm:$0xff] }
 0x1c3   : > { %4888 = vst.msk [vmem:[%s7754_s18 + $0x498] sm:$0xff] %vm556_vm1, %v4631_v15  ;;  %4887 = vst.msk [vmem:[%s7754_s18 + $0x490] sm:$0xff] %vm556_vm1, %v4630_v35  ;;  %v4376_v26 = vmul.f32 %v8811_v37, %v3684_v61  ;;  %v4375_v29 = vmul.f32 %v8811_v37, %v3679_v8  ;;  %4003 = vperm.xlu1 %6904, %v2891_v9   ;;  %3998 = vperm.xlu0 %6903, %v2890_v11   ;;  %v1659_v34 = vpop.f32.mrb[106].mxu0  ;;  %v8923_v32 = vpop.f32.mrb[106].mxu1  ;;  %v2895_v61 = vld [vmem:[%s7088_s15 + $0x6c8] sm:$0xff]  ;;  %v2894_v8 = vld [vmem:[%s7088_s15 + $0x6c0] sm:$0xff] }
 0x1c4   : > { %4793 = vst.msk [vmem:[%s7754_s18 + $0x1a0] sm:$0xff] %vm556_vm1, %v4536_v54  ;;  %v1660_v33 = vadd.f32 %v8798_v19, %v1659_v34  ;;  %v6190_v44 = vpop.f32.mrb[107].mxu0  ;;  %6348 = vmatmul.mubr.msk.f32.gmra.mrb[212].mxu0 %vm556_vm1, %v394_v24  ;;  %6735 = vmatmul.mubr.msk.f32.gmra.mrb[212].mxu1 %vm556_vm1, %v523_v21  ;;  %v6577_v20 = vpop.f32.mrb[107].mxu1  ;;  %v10392_v21 = vld [vmem:[#allocation11_spill] sm:$0xff]  ;;  %v396_v34 = vld [vmem:[%s7093_s20 + $0x360] sm:$0xff] }
 0x1c5   : > { %v4633_v22 = vadd.f32 %v4376_v26, %v2140_v18  ;;  %v4632_v28 = vadd.f32 %v4375_v29, %v2135_v52  ;;  %6350 = vmatprep.mubr.msk.f32.mxu0 %vm7003_vm0, %v10305_v1  ;;  %6737 = vmatprep.mubr.msk.f32.mxu1 %vm7003_vm0, %v10305_v1  ;;  %v4281_v52 = vmul.f32 %v8811_v37, %v10392_v21 }
 0x1c6   : > { %v4537_v50 = vadd.f32 %v4280_v10, %v1660_v33  ;;  %v3694_v9 = vpop.permute.xlu1 %3693  ;;  %v3689_v11 = vpop.permute.xlu0 %3688  ;;  %v2155_v10 = vadd.f32 %v8798_v19, %v8214_v46  ;;  %v2165_v21 = vadd.f32 %v8798_v19, %v8256_v51 }
 0x1c7   : > { %4890 = vst.msk [vmem:[%s7754_s18 + $0x4a8] sm:$0xff] %vm556_vm1, %v4633_v22  ;;  %4889 = vst.msk [vmem:[%s7754_s18 + $0x4a0] sm:$0xff] %vm556_vm1, %v4632_v28  ;;  %v4378_v15 = vmul.f32 %v8811_v37, %v3694_v9  ;;  %v4377_v35 = vmul.f32 %v8811_v37, %v3689_v11  ;;  %4013 = vperm.xlu1 %6904, %v2893_v14   ;;  %4008 = vperm.xlu0 %6903, %v2892_v3   ;;  %v1664_v40 = vpop.f32.mrb[108].mxu0  ;;  %v8950_v24 = vpop.f32.mrb[108].mxu1  ;;  %v2896_v9 = vld [vmem:[%s7088_s15 + $0x6d0] sm:$0xff] }
 0x1c8   : > { %4794 = vst.msk [vmem:[%s7754_s18 + $0x1a8] sm:$0xff] %vm556_vm1, %v4537_v50  ;;  %v1665_v39 = vadd.f32 %v8798_v19, %v1664_v40  ;;  %v6193_v54 = vpop.f32.mrb[109].mxu0  ;;  %6351 = vmatmul.mubr.msk.f32.gmra.mrb[214].mxu0 %vm556_vm1, %v395_v25  ;;  %6738 = vmatmul.mubr.msk.f32.gmra.mrb[214].mxu1 %vm556_vm1, %v524_v43  ;;  %v6580_v18 = vpop.f32.mrb[109].mxu1  ;;  %v2160_v3 = vadd.f32 %v8798_v19, %v8235_v45  ;;  %v10393_v25 = vld [vmem:[#allocation10_spill] sm:$0xff]  ;;  %v2897_v50 = vld [vmem:[%s7088_s15 + $0x6d8] sm:$0xff] }
 0x1c9   : > { %v4635_v26 = vadd.f32 %v4378_v15, %v2150_v7  ;;  %v4634_v29 = vadd.f32 %v4377_v35, %v2145_v27  ;;  %6353 = vmatprep.mubr.msk.f32.mxu0 %vm7003_vm0, %v10305_v1  ;;  %6740 = vmatprep.mubr.msk.f32.mxu1 %vm7003_vm0, %v10305_v1  ;;  %v4282_v43 = vmul.f32 %v8811_v37, %v10393_v25  ;;  %v397_v35 = vld [vmem:[%s7093_s20 + $0x368] sm:$0xff]  ;;  %v526_v40 = vld [vmem:[%s7093_s20 + $0x770] sm:$0xff] }
 0x1ca   : > { %v4538_v33 = vadd.f32 %v4281_v52, %v1665_v39  ;;  %v3704_v44 = vpop.permute.xlu1 %3703  ;;  %v3699_v14 = vpop.permute.xlu0 %3698 }
 0x1cb   : > { %4892 = vst.msk [vmem:[%s7754_s18 + $0x4b8] sm:$0xff] %vm556_vm1, %v4635_v26  ;;  %4891 = vst.msk [vmem:[%s7754_s18 + $0x4b0] sm:$0xff] %vm556_vm1, %v4634_v29  ;;  %v4380_v20 = vmul.f32 %v8811_v37, %v3704_v44  ;;  %v4379_v22 = vmul.f32 %v8811_v37, %v3699_v14  ;;  %4023 = vperm.xlu1 %6904, %v2895_v61   ;;  %4018 = vperm.xlu0 %6903, %v2894_v8   ;;  %v1669_v46 = vpop.f32.mrb[110].mxu0  ;;  %v8977_v28 = vpop.f32.mrb[110].mxu1  ;;  %v10394_v29 = vld [vmem:[#allocation13_spill] sm:$0xff] }
 0x1cc   : > { %4795 = vst.msk [vmem:[%s7754_s18 + $0x1b0] sm:$0xff] %vm556_vm1, %v4538_v33  ;;  %v1670_v45 = vadd.f32 %v8798_v19, %v1669_v46  ;;  %v6196_v27 = vpop.f32.mrb[111].mxu0  ;;  %6354 = vmatmul.mubr.msk.f32.gmra.mrb[216].mxu0 %vm556_vm1, %v396_v34  ;;  %6741 = vmatmul.mubr.msk.f32.gmra.mrb[216].mxu1 %vm556_vm1, %v525_v4  ;;  %v6583_v11 = vpop.f32.mrb[111].mxu1  ;;  %v2170_v61 = vadd.f32 %v8798_v19, %v8287_v62  ;;  %v2898_v33 = vld [vmem:[%s7088_s15 + $0x6e0] sm:$0xff] }
 0x1cd   : > { %v4637_v7 = vadd.f32 %v4380_v20, %v2160_v3  ;;  %v4636_v15 = vadd.f32 %v4379_v22, %v2155_v10  ;;  %6356 = vmatprep.mubr.msk.f32.mxu0 %vm7003_vm0, %v10305_v1  ;;  %6743 = vmatprep.mubr.msk.f32.mxu1 %vm7003_vm0, %v10305_v1  ;;  %v4283_v34 = vmul.f32 %v8811_v37, %v10394_v29  ;;  %v2899_v10 = vld [vmem:[%s7088_s15 + $0x6e8] sm:$0xff]  ;;  %v398_v20 = vld [vmem:[%s7093_s20 + $0x370] sm:$0xff]  ;;  %v527_v22 = vld [vmem:[%s7093_s20 + $0x778] sm:$0xff] }
 0x1ce   : > { %v4539_v52 = vadd.f32 %v4282_v43, %v1670_v45  ;;  %v3714_v39 = vpop.permute.xlu1 %3713  ;;  %v3709_v54 = vpop.permute.xlu0 %3708  ;;  %v2175_v46 = vadd.f32 %v8798_v19, %v8308_v55  ;;  %v2180_v27 = vadd.f32 %v8798_v19, %v8329_v58 }
 0x1cf   : > { %4894 = vst.msk [vmem:[%s7754_s18 + $0x4c8] sm:$0xff] %vm556_vm1, %v4637_v7  ;;  %4893 = vst.msk [vmem:[%s7754_s18 + $0x4c0] sm:$0xff] %vm556_vm1, %v4636_v15  ;;  %v4382_v8 = vmul.f32 %v8811_v37, %v3714_v39  ;;  %v4381_v18 = vmul.f32 %v8811_v37, %v3709_v54  ;;  %4033 = vperm.xlu1 %6904, %v2897_v50   ;;  %4028 = vperm.xlu0 %6903, %v2896_v9   ;;  %v1674_v51 = vpop.f32.mrb[112].mxu0  ;;  %v9004_v26 = vpop.f32.mrb[112].mxu1  ;;  %v10395_v7 = vld [vmem:[#allocation12_spill] sm:$0xff] }
 0x1d0   : > { %4796 = vst.msk [vmem:[%s7754_s18 + $0x1b8] sm:$0xff] %vm556_vm1, %v4539_v52  ;;  %v1675_v62 = vadd.f32 %v8798_v19, %v1674_v51  ;;  %v6199_v4 = vpop.f32.mrb[113].mxu0  ;;  %6357 = vmatmul.mubr.msk.f32.gmra.mrb[218].mxu0 %vm556_vm1, %v397_v35  ;;  %6744 = vmatmul.mubr.msk.f32.gmra.mrb[218].mxu1 %vm556_vm1, %v526_v40  ;;  %v6586_v44 = vpop.f32.mrb[113].mxu1  ;;  %v4284_v15 = vmul.f32 %v8811_v37, %v10395_v7  ;;  %v2901_v40 = vld [vmem:[%s7088_s15 + $0x6f8] sm:$0xff] }
 0x1d1   : > { %v4639_v14 = vadd.f32 %v4382_v8, %v2170_v61  ;;  %v4638_v3 = vadd.f32 %v4381_v18, %v2165_v21  ;;  %6359 = vmatprep.mubr.msk.f32.mxu0 %vm7003_vm0, %v10305_v1  ;;  %6746 = vmatprep.mubr.msk.f32.mxu1 %vm7003_vm0, %v10305_v1  ;;  %v2900_v21 = vld [vmem:[%s7088_s15 + $0x6f0] sm:$0xff]  ;;  %v399_v61 = vld [vmem:[%s7093_s20 + $0x378] sm:$0xff]  ;;  %v528_v8 = vld [vmem:[%s7093_s20 + $0x780] sm:$0xff]  ;;  %v2185_v18 = vadd.f32 %v8798_v19, %v8350_v63 }
 0x1d2   : > { %v4540_v25 = vadd.f32 %v4283_v34, %v1675_v62  ;;  %v3724_v43 = vpop.permute.xlu1 %3723  ;;  %v3719_v45 = vpop.permute.xlu0 %3718  ;;  %v2190_v62 = vadd.f32 %v8798_v19, %v8371_v0  ;;  %v10396_v44 = vld [vmem:[#allocation15_spill] sm:$0xff] }
 0x1d3   : > { %4896 = vst.msk [vmem:[%s7754_s18 + $0x4d8] sm:$0xff] %vm556_vm1, %v4639_v14  ;;  %4895 = vst.msk [vmem:[%s7754_s18 + $0x4d0] sm:$0xff] %vm556_vm1, %v4638_v3  ;;  %v4384_v50 = vmul.f32 %v8811_v37, %v3724_v43  ;;  %v4383_v9 = vmul.f32 %v8811_v37, %v3719_v45  ;;  %4043 = vperm.xlu1 %6904, %v2899_v10   ;;  %4038 = vperm.xlu0 %6903, %v2898_v33   ;;  %v1679_v55 = vpop.f32.mrb[114].mxu0  ;;  %v9031_v11 = vpop.f32.mrb[114].mxu1  ;;  %v400_v45 = vld [vmem:[%s7093_s20 + $0x380] sm:$0xff] }
 0x1d4   : > { %4797 = vst.msk [vmem:[%s7754_s18 + $0x1c0] sm:$0xff] %vm556_vm1, %v4540_v25  ;;  %v1680_v58 = vadd.f32 %v8798_v19, %v1679_v55  ;;  %v6202_v35 = vpop.f32.mrb[115].mxu0  ;;  %6360 = vmatmul.mubr.msk.f32.gmra.mrb[220].mxu0 %vm556_vm1, %v398_v20  ;;  %6747 = vmatmul.mubr.msk.f32.gmra.mrb[220].mxu1 %vm556_vm1, %v527_v22  ;;  %v6589_v52 = vpop.f32.mrb[115].mxu1  ;;  %v4285_v14 = vmul.f32 %v8811_v37, %v10396_v44  ;;  %v2903_v20 = vld [vmem:[%s7088_s15 + $0x708] sm:$0xff]  ;;  %v2902_v22 = vld [vmem:[%s7088_s15 + $0x700] sm:$0xff] }
 0x1d5   : > { %v4641_v39 = vadd.f32 %v4384_v50, %v2180_v27  ;;  %v4640_v54 = vadd.f32 %v4383_v9, %v2175_v46  ;;  %6362 = vmatprep.mubr.msk.f32.mxu0 %vm7003_vm0, %v10305_v1  ;;  %6749 = vmatprep.mubr.msk.f32.mxu1 %vm7003_vm0, %v10305_v1  ;;  %v529_v27 = vld [vmem:[%s7093_s20 + $0x788] sm:$0xff]  ;;  %v2195_v50 = vadd.f32 %v8798_v19, %v8392_v12 }
 0x1d6   : > { %v4541_v51 = vadd.f32 %v4284_v15, %v1680_v58  ;;  %v3734_v29 = vpop.permute.xlu1 %3733  ;;  %v3729_v34 = vpop.permute.xlu0 %3728  ;;  %v2200_v15 = vadd.f32 %v8798_v19, %v8413_v57  ;;  %v2210_v44 = vadd.f32 %v8798_v19, %v8455_v13 }
 0x1d7   : > { %4898 = vst.msk [vmem:[%s7754_s18 + $0x4e8] sm:$0xff] %vm556_vm1, %v4641_v39  ;;  %4897 = vst.msk [vmem:[%s7754_s18 + $0x4e0] sm:$0xff] %vm556_vm1, %v4640_v54  ;;  %v4386_v4 = vmul.f32 %v8811_v37, %v3734_v29  ;;  %v4385_v10 = vmul.f32 %v8811_v37, %v3729_v34  ;;  %4053 = vperm.xlu1 %6904, %v2901_v40   ;;  %4048 = vperm.xlu0 %6903, %v2900_v21   ;;  %v1684_v63 = vpop.f32.mrb[116].mxu0  ;;  %v9058_v33 = vpop.f32.mrb[116].mxu1  ;;  %v10397_v21 = vld [vmem:[#allocation14_spill] sm:$0xff]  ;;  %v2905_v54 = vld [vmem:[%s7088_s15 + $0x718] sm:$0xff] }
 0x1d8   : > { %4798 = vst.msk [vmem:[%s7754_s18 + $0x1c8] sm:$0xff] %vm556_vm1, %v4541_v51  ;;  %v1685_v0 = vadd.f32 %v8798_v19, %v1684_v63  ;;  %v6205_v3 = vpop.f32.mrb[117].mxu0  ;;  %6363 = vmatmul.mubr.msk.f32.gmra.mrb[222].mxu0 %vm556_vm1, %v399_v61  ;;  %6750 = vmatmul.mubr.msk.f32.gmra.mrb[222].mxu1 %vm556_vm1, %v528_v8  ;;  %v6592_v46 = vpop.f32.mrb[117].mxu1  ;;  %v4286_v52 = vmul.f32 %v8811_v37, %v10397_v21  ;;  %v2904_v61 = vld [vmem:[%s7088_s15 + $0x710] sm:$0xff]  ;;  %v401_v29 = vld [vmem:[%s7093_s20 + $0x388] sm:$0xff] }
 0x1d9   : > { %v4643_v25 = vadd.f32 %v4386_v4, %v2190_v62  ;;  %v4642_v43 = vadd.f32 %v4385_v10, %v2185_v18  ;;  %6365 = vmatprep.mubr.msk.f32.mxu0 %vm7003_vm0, %v10305_v1  ;;  %6752 = vmatprep.mubr.msk.f32.mxu1 %vm7003_vm0, %v10305_v1  ;;  %v530_v34 = vld [vmem:[%s7093_s20 + $0x790] sm:$0xff]  ;;  %v2205_v62 = vadd.f32 %v8798_v19, %v8434_v5 }
 0x1da   : > { %v4542_v9 = vadd.f32 %v4285_v14, %v1685_v0  ;;  %v3744_v55 = vpop.permute.xlu1 %3743  ;;  %v3739_v7 = vpop.permute.xlu0 %3738 }
 0x1db   : > { %4900 = vst.msk [vmem:[%s7754_s18 + $0x4f8] sm:$0xff] %vm556_vm1, %v4643_v25  ;;  %4899 = vst.msk [vmem:[%s7754_s18 + $0x4f0] sm:$0xff] %vm556_vm1, %v4642_v43  ;;  %v4388_v58 = vmul.f32 %v8811_v37, %v3744_v55  ;;  %v4387_v35 = vmul.f32 %v8811_v37, %v3739_v7  ;;  %4063 = vperm.xlu1 %6904, %v2903_v20   ;;  %4058 = vperm.xlu0 %6903, %v2902_v22   ;;  %v1689_v12 = vpop.f32.mrb[118].mxu0  ;;  %v9085_v40 = vpop.f32.mrb[118].mxu1  ;;  %v10398_v20 = vld [vmem:[#allocation17_spill] sm:$0xff]  ;;  %v2906_v43 = vld [vmem:[%s7088_s15 + $0x720] sm:$0xff] }
 0x1dc   : > { %4799 = vst.msk [vmem:[%s7754_s18 + $0x1d0] sm:$0xff] %vm556_vm1, %v4542_v9  ;;  %v1690_v57 = vadd.f32 %v8798_v19, %v1689_v12  ;;  %v6208_v39 = vpop.f32.mrb[119].mxu0  ;;  %6366 = vmatmul.mubr.msk.f32.gmra.mrb[224].mxu0 %vm556_vm1, %v400_v45  ;;  %6753 = vmatmul.mubr.msk.f32.gmra.mrb[224].mxu1 %vm556_vm1, %v529_v27  ;;  %v6595_v8 = vpop.f32.mrb[119].mxu1  ;;  %v4287_v22 = vmul.f32 %v8811_v37, %v10398_v20  ;;  %v2907_v25 = vld [vmem:[%s7088_s15 + $0x728] sm:$0xff]  ;;  %v402_v9 = vld [vmem:[%s7093_s20 + $0x390] sm:$0xff]  ;;  %v531_v55 = vld [vmem:[%s7093_s20 + $0x798] sm:$0xff] }
 0x1dd   : > { %v4645_v18 = vadd.f32 %v4388_v58, %v2200_v15  ;;  %v4644_v51 = vadd.f32 %v4387_v35, %v2195_v50  ;;  %6368 = vmatprep.mubr.msk.f32.mxu0 %vm7003_vm0, %v10305_v1  ;;  %6755 = vmatprep.mubr.msk.f32.mxu1 %vm7003_vm0, %v10305_v1  ;;  %v2215_v7 = vadd.f32 %v8798_v19, %v8476_v6  ;;  %v10399_v39 = vld [vmem:[#allocation16_spill] sm:$0xff]  ;;  %v2909_v8 = vld [vmem:[%s7088_s15 + $0x738] sm:$0xff] }
 0x1de   : > { %v4543_v4 = vadd.f32 %v4286_v52, %v1690_v57  ;;  %v3754_v10 = vpop.permute.xlu1 %3753  ;;  %v3749_v63 = vpop.permute.xlu0 %3748  ;;  %v2220_v12 = vadd.f32 %v8798_v19, %v8497_v23 }
 0x1df   : > { %4902 = vst.msk [vmem:[%s7754_s18 + $0x508] sm:$0xff] %vm556_vm1, %v4645_v18  ;;  %4901 = vst.msk [vmem:[%s7754_s18 + $0x500] sm:$0xff] %vm556_vm1, %v4644_v51  ;;  %v4390_v14 = vmul.f32 %v8811_v37, %v3754_v10  ;;  %v4389_v0 = vmul.f32 %v8811_v37, %v3749_v63  ;;  %4073 = vperm.xlu1 %6904, %v2905_v54   ;;  %4068 = vperm.xlu0 %6903, %v2904_v61   ;;  %v1694_v5 = vpop.f32.mrb[120].mxu0  ;;  %v9112_v3 = vpop.f32.mrb[120].mxu1  ;;  %v2908_v18 = vld [vmem:[%s7088_s15 + $0x730] sm:$0xff] }
 0x1e0   : > { %4800 = vst.msk [vmem:[%s7754_s18 + $0x1d8] sm:$0xff] %vm556_vm1, %v4543_v4  ;;  %v1695_v13 = vadd.f32 %v8798_v19, %v1694_v5  ;;  %v6211_v46 = vpop.f32.mrb[121].mxu0  ;;  %6369 = vmatmul.mubr.msk.f32.gmra.mrb[226].mxu0 %vm556_vm1, %v401_v29  ;;  %6756 = vmatmul.mubr.msk.f32.gmra.mrb[226].mxu1 %vm556_vm1, %v530_v34  ;;  %v6598_v45 = vpop.f32.mrb[121].mxu1  ;;  %v4288_v54 = vmul.f32 %v8811_v37, %v10399_v39  ;;  %v532_v4 = vld [vmem:[%s7093_s20 + $0x7a0] sm:$0xff] }
 0x1e1   : > { %v4647_v27 = vadd.f32 %v4390_v14, %v2210_v44  ;;  %v4646_v50 = vadd.f32 %v4389_v0, %v2205_v62  ;;  %6371 = vmatprep.mubr.msk.f32.mxu0 %vm7003_vm0, %v10305_v1  ;;  %6758 = vmatprep.mubr.msk.f32.mxu1 %vm7003_vm0, %v10305_v1  ;;  %v403_v62 = vld [vmem:[%s7093_s20 + $0x398] sm:$0xff]  ;;  %v2225_v10 = vadd.f32 %v8798_v19, %v8518_v31  ;;  %v2910_v45 = vld [vmem:[%s7088_s15 + $0x740] sm:$0xff] }
 0x1e2   : > { %v4544_v15 = vadd.f32 %v4287_v22, %v1695_v13  ;;  %v3764_v58 = vpop.permute.xlu1 %3763  ;;  %v3759_v35 = vpop.permute.xlu0 %3758  ;;  %v2230_v0 = vadd.f32 %v8798_v19, %v8539_v30  ;;  %v10400_v13 = vld [vmem:[#allocation19_spill] sm:$0xff] }
 0x1e3   : > { %4904 = vst.msk [vmem:[%s7754_s18 + $0x518] sm:$0xff] %vm556_vm1, %v4647_v27  ;;  %4903 = vst.msk [vmem:[%s7754_s18 + $0x510] sm:$0xff] %vm556_vm1, %v4646_v50  ;;  %v4392_v21 = vmul.f32 %v8811_v37, %v3764_v58  ;;  %v4391_v52 = vmul.f32 %v8811_v37, %v3759_v35  ;;  %4083 = vperm.xlu1 %6904, %v2907_v25   ;;  %4078 = vperm.xlu0 %6903, %v2906_v43   ;;  %v1699_v6 = vpop.f32.mrb[122].mxu0  ;;  %v9139_v57 = vpop.f32.mrb[122].mxu1  ;;  %v2911_v43 = vld [vmem:[%s7088_s15 + $0x748] sm:$0xff] }
 0x1e4   : > { %4801 = vst.msk [vmem:[%s7754_s18 + $0x1e0] sm:$0xff] %vm556_vm1, %v4544_v15  ;;  %v1700_v23 = vadd.f32 %v8798_v19, %v1699_v6  ;;  %v6214_v61 = vpop.f32.mrb[123].mxu0  ;;  %6372 = vmatmul.mubr.msk.f32.gmra.mrb[228].mxu0 %vm556_vm1, %v402_v9  ;;  %6759 = vmatmul.mubr.msk.f32.gmra.mrb[228].mxu1 %vm556_vm1, %v531_v55  ;;  %v6601_v51 = vpop.f32.mrb[123].mxu1  ;;  %v4289_v46 = vmul.f32 %v8811_v37, %v10400_v13  ;;  %v404_v55 = vld [vmem:[%s7093_s20 + $0x3a0] sm:$0xff]  ;;  %v10402_v13 = vld [vmem:[#allocation21_spill] sm:$0xff] }
 0x1e5   : > { %v4649_v29 = vadd.f32 %v4392_v21, %v2220_v12  ;;  %v4648_v34 = vadd.f32 %v4391_v52, %v2215_v7  ;;  %6374 = vmatprep.mubr.msk.f32.mxu0 %vm7003_vm0, %v10305_v1  ;;  %6761 = vmatprep.mubr.msk.f32.mxu1 %vm7003_vm0, %v10305_v1  ;;  %v533_v7 = vld [vmem:[%s7093_s20 + $0x7a8] sm:$0xff]  ;;  %v2235_v15 = vadd.f32 %v8798_v19, %v8560_v41 }
 0x1e6   : > { %v4545_v63 = vadd.f32 %v4288_v54, %v1700_v23  ;;  %v3774_v44 = vpop.permute.xlu1 %3773  ;;  %v3769_v14 = vpop.permute.xlu0 %3768  ;;  %v2240_v21 = vadd.f32 %v8798_v19, %v8581_v38  ;;  %v10401_v54 = vld [vmem:[#allocation18_spill] sm:$0xff] }
 0x1e7   : > { %4906 = vst.msk [vmem:[%s7754_s18 + $0x528] sm:$0xff] %vm556_vm1, %v4649_v29  ;;  %4905 = vst.msk [vmem:[%s7754_s18 + $0x520] sm:$0xff] %vm556_vm1, %v4648_v34  ;;  %v4394_v5 = vmul.f32 %v8811_v37, %v3774_v44  ;;  %v4393_v20 = vmul.f32 %v8811_v37, %v3769_v14  ;;  %4093 = vperm.xlu1 %6904, %v2909_v8   ;;  %4088 = vperm.xlu0 %6903, %v2908_v18   ;;  %v1704_v31 = vpop.f32.mrb[124].mxu0  ;;  %v9166_v22 = vpop.f32.mrb[124].mxu1  ;;  %v2913_v8 = vld [vmem:[%s7088_s15 + $0x758] sm:$0xff]  ;;  %v2912_v18 = vld [vmem:[%s7088_s15 + $0x750] sm:$0xff] }
 0x1e8   : > { %4802 = vst.msk [vmem:[%s7754_s18 + $0x1e8] sm:$0xff] %vm556_vm1, %v4545_v63  ;;  %v1705_v30 = vadd.f32 %v8798_v19, %v1704_v31  ;;  %v6217_v25 = vpop.f32.mrb[125].mxu0  ;;  %6375 = vmatmul.mubr.msk.f32.gmra.mrb[230].mxu0 %vm556_vm1, %v403_v62  ;;  %6762 = vmatmul.mubr.msk.f32.gmra.mrb[230].mxu1 %vm556_vm1, %v532_v4  ;;  %v6604_v27 = vpop.f32.mrb[125].mxu1  ;;  %v4290_v23 = vmul.f32 %v8811_v37, %v10401_v54  ;;  %v405_v62 = vld [vmem:[%s7093_s20 + $0x3a8] sm:$0xff]  ;;  %v534_v4 = vld [vmem:[%s7093_s20 + $0x7b0] sm:$0xff] }
 0x1e9   : > { %v4651_v50 = vadd.f32 %v4394_v5, %v2230_v0  ;;  %v4650_v9 = vadd.f32 %v4393_v20, %v2225_v10  ;;  %6377 = vmatprep.mubr.msk.f32.mxu0 %vm7003_vm0, %v10305_v1  ;;  %6764 = vmatprep.mubr.msk.f32.mxu1 %vm7003_vm0, %v10305_v1  ;;  %v2245_v10 = vadd.f32 %v8798_v19, %v8602_v49  ;;  %v2915_v25 = vld [vmem:[%s7088_s15 + $0x768] sm:$0xff] }
 0x1ea   : > { %v4546_v58 = vadd.f32 %v4289_v46, %v1705_v30  ;;  %v3784_v35 = vpop.permute.xlu1 %3783  ;;  %v3779_v12 = vpop.permute.xlu0 %3778  ;;  %v2250_v0 = vadd.f32 %v8798_v19, %v8623_v48  ;;  %v4291_v46 = vmul.f32 %v8811_v37, %v10402_v13 }
 0x1eb   : > { %4908 = vst.msk [vmem:[%s7754_s18 + $0x538] sm:$0xff] %vm556_vm1, %v4651_v50  ;;  %4907 = vst.msk [vmem:[%s7754_s18 + $0x530] sm:$0xff] %vm556_vm1, %v4650_v9  ;;  %v4396_v52 = vmul.f32 %v8811_v37, %v3784_v35  ;;  %v4395_v6 = vmul.f32 %v8811_v37, %v3779_v12  ;;  %4103 = vperm.xlu1 %6904, %v2911_v43   ;;  %4098 = vperm.xlu0 %6903, %v2910_v45   ;;  %v1709_v41 = vpop.f32.mrb[126].mxu0  ;;  %v9193_v39 = vpop.f32.mrb[126].mxu1  ;;  %v2914_v43 = vld [vmem:[%s7088_s15 + $0x760] sm:$0xff]  ;;  %v406_v9 = vld [vmem:[%s7093_s20 + $0x3b0] sm:$0xff] }
 0x1ec   : > { %4803 = vst.msk [vmem:[%s7754_s18 + $0x1f0] sm:$0xff] %vm556_vm1, %v4546_v58  ;;  %v1710_v38 = vadd.f32 %v8798_v19, %v1709_v41  ;;  %v6220_v61 = vpop.f32.mrb[127].mxu0  ;;  %6378 = vmatmul.mubr.msk.f32.gmra.mrb[232].mxu0 %vm556_vm1, %v404_v55  ;;  %6765 = vmatmul.mubr.msk.f32.gmra.mrb[232].mxu1 %vm556_vm1, %v533_v7  ;;  %v6607_v51 = vpop.f32.mrb[127].mxu1  ;;  %v535_v55 = vld [vmem:[%s7093_s20 + $0x7b8] sm:$0xff]  ;;  %v2255_v7 = vadd.f32 %v8798_v19, %v8645_v42  ;;  %v10403_v41 = vld [vmem:[#allocation20_spill] sm:$0xff] }
 0x1ed   : > { %v4653_v29 = vadd.f32 %v4396_v52, %v2240_v21  ;;  %v4652_v34 = vadd.f32 %v4395_v6, %v2235_v15  ;;  %6380 = vmatprep.mubr.msk.f32.mxu0 %vm7003_vm0, %v10305_v1  ;;  %6767 = vmatprep.mubr.msk.f32.mxu1 %vm7003_vm0, %v10305_v1  ;;  %v2260_v12 = vadd.f32 %v8798_v19, %v8670_v60  ;;  %v2916_v61 = vld [vmem:[%s7088_s15 + $0x770] sm:$0xff] }
 0x1ee   : > { %v4547_v63 = vadd.f32 %v4290_v23, %v1710_v38  ;;  %v3794_v44 = vpop.permute.xlu1 %3793  ;;  %v3789_v14 = vpop.permute.xlu0 %3788  ;;  %v4292_v54 = vmul.f32 %v8811_v37, %v10403_v41  ;;  %v2917_v38 = vld [vmem:[%s7088_s15 + $0x778] sm:$0xff] }
 0x1ef   : > { %4910 = vst.msk [vmem:[%s7754_s18 + $0x548] sm:$0xff] %vm556_vm1, %v4653_v29  ;;  %4909 = vst.msk [vmem:[%s7754_s18 + $0x540] sm:$0xff] %vm556_vm1, %v4652_v34  ;;  %v4398_v5 = vmul.f32 %v8811_v37, %v3794_v44  ;;  %v4397_v20 = vmul.f32 %v8811_v37, %v3789_v14  ;;  %4113 = vperm.xlu1 %6904, %v2913_v8   ;;  %4108 = vperm.xlu0 %6903, %v2912_v18   ;;  %v1714_v49 = vpop.f32.mrb[128].mxu0  ;;  %v9220_v31 = vpop.f32.mrb[128].mxu1  ;;  %v407_v29 = vld [vmem:[%s7093_s20 + $0x3b8] sm:$0xff]  ;;  %v536_v34 = vld [vmem:[%s7093_s20 + $0x7c0] sm:$0xff] }
 0x1f0   : > { %4804 = vst.msk [vmem:[%s7754_s18 + $0x1f8] sm:$0xff] %vm556_vm1, %v4547_v63  ;;  %v1715_v48 = vadd.f32 %v8798_v19, %v1714_v49  ;;  %v6223_v30 = vpop.f32.mrb[129].mxu0  ;;  %6381 = vmatmul.mubr.msk.f32.gmra.mrb[234].mxu0 %vm556_vm1, %v405_v62  ;;  %6768 = vmatmul.mubr.msk.f32.gmra.mrb[234].mxu1 %vm556_vm1, %v534_v4  ;;  %v6610_v45 = vpop.f32.mrb[129].mxu1  ;;  %v2265_v62 = vadd.f32 %v8798_v19, %v8697_v2  ;;  %v2921_v41 = vld [vmem:[%s7088_s15 + $0x798] sm:$0xff] }
 0x1f1   : > { %v4655_v27 = vadd.f32 %v4398_v5, %v2250_v0  ;;  %v4654_v50 = vadd.f32 %v4397_v20, %v2245_v10  ;;  %6383 = vmatprep.mubr.msk.f32.mxu0 %vm7003_vm0, %v10305_v1  ;;  %6770 = vmatprep.mubr.msk.f32.mxu1 %vm7003_vm0, %v10305_v1  ;;  %v2270_v44 = vadd.f32 %v8798_v19, %v8724_v56  ;;  %v10404_v20 = vld [vmem:[#allocation23_spill] sm:$0xff]  ;;  %v408_v45 = vld [vmem:[%s7093_s20 + $0x3c0] sm:$0xff] }
 0x1f2   : > { %v4548_v15 = vadd.f32 %v4291_v46, %v1715_v48  ;;  %v3804_v58 = vpop.permute.xlu1 %3803  ;;  %v3799_v35 = vpop.permute.xlu0 %3798  ;;  %v4293_v49 = vmul.f32 %v8811_v37, %v10404_v20  ;;  %v2919_v46 = vld [vmem:[%s7088_s15 + $0x788] sm:$0xff]  ;;  %v2918_v48 = vld [vmem:[%s7088_s15 + $0x780] sm:$0xff] }
 0x1f3   : > { %4912 = vst.msk [vmem:[%s7754_s18 + $0x558] sm:$0xff] %vm556_vm1, %v4655_v27  ;;  %4911 = vst.msk [vmem:[%s7754_s18 + $0x550] sm:$0xff] %vm556_vm1, %v4654_v50  ;;  %v4400_v21 = vmul.f32 %v8811_v37, %v3804_v58  ;;  %v4399_v52 = vmul.f32 %v8811_v37, %v3799_v35  ;;  %4123 = vperm.xlu1 %6904, %v2915_v25   ;;  %4118 = vperm.xlu0 %6903, %v2914_v43   ;;  %v1719_v42 = vpop.f32.mrb[130].mxu0  ;;  %v9247_v6 = vpop.f32.mrb[130].mxu1  ;;  %v537_v27 = vld [vmem:[%s7093_s20 + $0x7c8] sm:$0xff]  ;;  %v2922_v20 = vld [vmem:[%s7088_s15 + $0x7a0] sm:$0xff] }
 0x1f4   : > { %4805 = vst.msk [vmem:[%s7754_s18 + $0x200] sm:$0xff] %vm556_vm1, %v4548_v15  ;;  %v1720_v60 = vadd.f32 %v8798_v19, %v1719_v42  ;;  %v6226_v23 = vpop.f32.mrb[131].mxu0  ;;  %6384 = vmatmul.mubr.msk.f32.gmra.mrb[236].mxu0 %vm556_vm1, %v406_v9  ;;  %6771 = vmatmul.mubr.msk.f32.gmra.mrb[236].mxu1 %vm556_vm1, %v535_v55  ;;  %v6613_v8 = vpop.f32.mrb[131].mxu1  ;;  %v2275_v50 = vadd.f32 %v8798_v19, %v8751_v53 }
 0x1f5   : > { %v4657_v18 = vadd.f32 %v4400_v21, %v2260_v12  ;;  %v4656_v51 = vadd.f32 %v4399_v52, %v2255_v7  ;;  %6386 = vmatprep.mubr.msk.f32.mxu0 %vm7003_vm0, %v10305_v1  ;;  %6773 = vmatprep.mubr.msk.f32.mxu1 %vm7003_vm0, %v10305_v1  ;;  %v2280_v15 = vadd.f32 %v8798_v19, %v8778_v59  ;;  %v10405_v21 = vld [vmem:[#allocation22_spill] sm:$0xff] }
 0x1f6   : > { %v4549_v4 = vadd.f32 %v4292_v54, %v1720_v60  ;;  %v3814_v10 = vpop.permute.xlu1 %3813  ;;  %v3809_v63 = vpop.permute.xlu0 %3808  ;;  %v4294_v59 = vmul.f32 %v8811_v37, %v10405_v21  ;;  %v2920_v54 = vld [vmem:[%s7088_s15 + $0x790] sm:$0xff] }
 0x1f7   : > { %4914 = vst.msk [vmem:[%s7754_s18 + $0x568] sm:$0xff] %vm556_vm1, %v4657_v18  ;;  %4913 = vst.msk [vmem:[%s7754_s18 + $0x560] sm:$0xff] %vm556_vm1, %v4656_v51  ;;  %v4402_v14 = vmul.f32 %v8811_v37, %v3814_v10  ;;  %v4401_v0 = vmul.f32 %v8811_v37, %v3809_v63  ;;  %4133 = vperm.xlu1 %6904, %v2917_v38   ;;  %4128 = vperm.xlu0 %6903, %v2916_v61   ;;  %v1724_v2 = vpop.f32.mrb[132].mxu0  ;;  %v9274_v5 = vpop.f32.mrb[132].mxu1  ;;  %v409_v38 = vld [vmem:[%s7093_s20 + $0x3c8] sm:$0xff]  ;;  %v538_v61 = vld [vmem:[%s7093_s20 + $0x7d0] sm:$0xff] }
 0x1f8   : > { %4806 = vst.msk [vmem:[%s7754_s18 + $0x208] sm:$0xff] %vm556_vm1, %v4549_v4  ;;  %v1725_v56 = vadd.f32 %v8798_v19, %v1724_v2  ;;  %v6229_v13 = vpop.f32.mrb[133].mxu0  ;;  %6387 = vmatmul.mubr.msk.f32.gmra.mrb[238].mxu0 %vm556_vm1, %v407_v29  ;;  %6774 = vmatmul.mubr.msk.f32.gmra.mrb[238].mxu1 %vm556_vm1, %v536_v34  ;;  %v6616_v30 = vpop.f32.mrb[133].mxu1  ;;  %v9310_v19 = vld [vmem:[%s10296_s3] ss:$0 sm:$0xff]  ;;  %v10406_v63 = vld [vmem:[#allocation25_spill] sm:$0xff] }
 0x1f9   : > { %v4659_v25 = vadd.f32 %v4402_v14, %v2270_v44  ;;  %v4658_v43 = vadd.f32 %v4401_v0, %v2265_v62  ;;  %6389 = vmatprep.mubr.msk.f32.mxu0 %vm7003_vm0, %v10305_v1  ;;  %6776 = vmatprep.mubr.msk.f32.mxu1 %vm7003_vm0, %v10305_v1  ;;  %v2285_v8 = vadd.f32 %v9310_v19, %v8815_v16  ;;  %v9334_v62 = vld [vmem:[%s10297_s4] ss:$0 sm:$0xff]  ;;  %v2923_v2 = vld [vmem:[%s7088_s15 + $0x7a8] sm:$0xff] }
 0x1fa   : > { %v4550_v9 = vadd.f32 %v4293_v49, %v1725_v56  ;;  %v3824_v55 = vpop.permute.xlu1 %3823  ;;  %v3819_v7 = vpop.permute.xlu0 %3818  ;;  %v2290_v34 = vadd.f32 %v9310_v19, %v8842_v36  ;;  %v4295_v44 = vmul.f32 %v9334_v62, %v10406_v63  ;;  %v2295_v30 = vadd.f32 %v9310_v19, %v8869_v17 }
 0x1fb   : > { %4916 = vst.msk [vmem:[%s7754_s18 + $0x578] sm:$0xff] %vm556_vm1, %v4659_v25  ;;  %4915 = vst.msk [vmem:[%s7754_s18 + $0x570] sm:$0xff] %vm556_vm1, %v4658_v43  ;;  %v4404_v58 = vmul.f32 %v8811_v37, %v3824_v55  ;;  %v4403_v35 = vmul.f32 %v8811_v37, %v3819_v7  ;;  %4143 = vperm.xlu1 %6904, %v2919_v46   ;;  %4138 = vperm.xlu0 %6903, %v2918_v48   ;;  %v1729_v12 = vpop.f32.mrb[134].mxu0  ;;  %v9301_v53 = vpop.f32.mrb[134].mxu1  ;;  %v410_v46 = vld [vmem:[%s7093_s20 + $0x3d0] sm:$0xff]  ;;  %v539_v48 = vld [vmem:[%s7093_s20 + $0x7d8] sm:$0xff] }
 0x1fc   : > { %4807 = vst.msk [vmem:[%s7754_s18 + $0x210] sm:$0xff] %vm556_vm1, %v4550_v9  ;;  %v1730_v52 = vadd.f32 %v9310_v19, %v1729_v12  ;;  %v6232_v42 = vpop.f32.mrb[135].mxu0  ;;  %6390 = vmatmul.mubr.msk.f32.gmra.mrb[240].mxu0 %vm556_vm1, %v408_v45  ;;  %6777 = vmatmul.mubr.msk.f32.gmra.mrb[240].mxu1 %vm556_vm1, %v537_v27  ;;  %v6619_v60 = vpop.f32.mrb[135].mxu1  ;;  %v2300_v27 = vadd.f32 %v9310_v19, %v8896_v47  ;;  %v10407_v7 = vld [vmem:[#allocation24_spill] sm:$0xff]  ;;  %v2924_v12 = vld [vmem:[%s7088_s15 + $0x7b0] sm:$0xff] }
 0x1fd   : > { %v4661_v37 = vadd.f32 %v4404_v58, %v2280_v15  ;;  %v4660_v23 = vadd.f32 %v4403_v35, %v2275_v50  ;;  %6392 = vmatprep.mubr.msk.f32.mxu0 %vm7003_vm0, %v10305_v1  ;;  %6779 = vmatprep.mubr.msk.f32.mxu1 %vm7003_vm0, %v10305_v1  ;;  %v4296_v15 = vmul.f32 %v9334_v62, %v10407_v7  ;;  %v2925_v35 = vld [vmem:[%s7088_s15 + $0x7b8] sm:$0xff] }
 0x1fe   : > { %v4551_v18 = vadd.f32 %v4294_v59, %v1730_v52  ;;  %v3834_v51 = vpop.permute.xlu1 %3833  ;;  %v3829_v29 = vpop.permute.xlu0 %3828  ;;  %v411_v42 = vld [vmem:[%s7093_s20 + $0x3d8] sm:$0xff] }
 0x1ff   : > { %4918 = vst.msk [vmem:[%s7754_s18 + $0x588] sm:$0xff] %vm556_vm1, %v4661_v37  ;;  %4917 = vst.msk [vmem:[%s7754_s18 + $0x580] sm:$0xff] %vm556_vm1, %v4660_v23  ;;  %v4406_v4 = vmul.f32 %v9334_v62, %v3834_v51  ;;  %v4405_v16 = vmul.f32 %v9334_v62, %v3829_v29  ;;  %4153 = vperm.xlu1 %6904, %v2921_v41   ;;  %4148 = vperm.xlu0 %6903, %v2920_v54   ;;  %v1734_v10 = vpop.f32.mrb[136].mxu0  ;;  %v9338_v36 = vpop.f32.mrb[136].mxu1  ;;  %v540_v41 = vld [vmem:[%s7093_s20 + $0x7e0] sm:$0xff]  ;;  %v10408_v51 = vld [vmem:[#allocation27_spill] sm:$0xff] }
 0x200   : > { %4808 = vst.msk [vmem:[%s7754_s18 + $0x218] sm:$0xff] %vm556_vm1, %v4551_v18  ;;  %v1735_v14 = vadd.f32 %v9310_v19, %v1734_v10  ;;  %v6235_v0 = vpop.f32.mrb[137].mxu0  ;;  %6393 = vmatmul.mubr.msk.f32.gmra.mrb[242].mxu0 %vm556_vm1, %v409_v38  ;;  %6780 = vmatmul.mubr.msk.f32.gmra.mrb[242].mxu1 %vm556_vm1, %v538_v61  ;;  %v6622_v49 = vpop.f32.mrb[137].mxu1  ;;  %v2305_v54 = vadd.f32 %v9310_v19, %v8923_v32 }
 0x201   : > { %v4663_v56 = vadd.f32 %v4406_v4, %v2290_v34  ;;  %v4662_v13 = vadd.f32 %v4405_v16, %v2285_v8  ;;  %6395 = vmatprep.mubr.msk.f32.mxu0 %vm7003_vm0, %v10305_v1  ;;  %6782 = vmatprep.mubr.msk.f32.mxu1 %vm7003_vm0, %v10305_v1  ;;  %v2310_v38 = vadd.f32 %v9310_v19, %v8950_v24  ;;  %v2927_v4 = vld [vmem:[%s7088_s15 + $0x7c8] sm:$0xff]  ;;  %v2926_v16 = vld [vmem:[%s7088_s15 + $0x7c0] sm:$0xff] }
 0x202   : > { %v4552_v25 = vadd.f32 %v4295_v44, %v1735_v14  ;;  %v3844_v43 = vpop.permute.xlu1 %3843  ;;  %v3839_v45 = vpop.permute.xlu0 %3838  ;;  %v4297_v29 = vmul.f32 %v9334_v62, %v10408_v51  ;;  %v412_v14 = vld [vmem:[%s7093_s20 + $0x3e0] sm:$0xff]  ;;  %v541_v0 = vld [vmem:[%s7093_s20 + $0x7e8] sm:$0xff]  ;;  %v414_v51 = vld [vmem:[%s7093_s20 + $0x3f0] sm:$0xff] }
 0x203   : > { %4920 = vst.msk [vmem:[%s7754_s18 + $0x598] sm:$0xff] %vm556_vm1, %v4663_v56  ;;  %4919 = vst.msk [vmem:[%s7754_s18 + $0x590] sm:$0xff] %vm556_vm1, %v4662_v13  ;;  %v4408_v50 = vmul.f32 %v9334_v62, %v3844_v43  ;;  %v4407_v9 = vmul.f32 %v9334_v62, %v3839_v45  ;;  %4163 = vperm.xlu1 %6904, %v2923_v2   ;;  %4158 = vperm.xlu0 %6903, %v2922_v20   ;;  %v1739_v17 = vpop.f32.mrb[138].mxu0  ;;  %v9365_v55 = vpop.f32.mrb[138].mxu1 }
 0x204   : > { %4809 = vst.msk [vmem:[%s7754_s18 + $0x220] sm:$0xff] %vm556_vm1, %v4552_v25  ;;  %v1740_v47 = vadd.f32 %v9310_v19, %v1739_v17  ;;  %v6238_v58 = vpop.f32.mrb[139].mxu0  ;;  %6396 = vmatmul.mubr.msk.f32.gmra.mrb[244].mxu0 %vm556_vm1, %v410_v46  ;;  %6783 = vmatmul.mubr.msk.f32.gmra.mrb[244].mxu1 %vm556_vm1, %v539_v48  ;;  %v6625_v21 = vpop.f32.mrb[139].mxu1  ;;  %v2315_v2 = vadd.f32 %v9310_v19, %v8977_v28  ;;  %v10409_v25 = vld [vmem:[#allocation26_spill] sm:$0xff] }
 0x205   : > { %v4665_v59 = vadd.f32 %v4408_v50, %v2300_v27  ;;  %v4664_v52 = vadd.f32 %v4407_v9, %v2295_v30  ;;  %6398 = vmatprep.mubr.msk.f32.mxu0 %vm7003_vm0, %v10305_v1  ;;  %6785 = vmatprep.mubr.msk.f32.mxu1 %vm7003_vm0, %v10305_v1  ;;  %v2320_v13 = vadd.f32 %v9310_v19, %v9004_v26  ;;  %v2929_v27 = vld [vmem:[%s7088_s15 + $0x7d8] sm:$0xff]  ;;  %v2928_v50 = vld [vmem:[%s7088_s15 + $0x7d0] sm:$0xff] }
 0x206   : > { %v4553_v60 = vadd.f32 %v4296_v15, %v1740_v47  ;;  %v3854_v37 = vpop.permute.xlu1 %3853  ;;  %v3849_v23 = vpop.permute.xlu0 %3848  ;;  %v4298_v43 = vmul.f32 %v9334_v62, %v10409_v25  ;;  %v413_v15 = vld [vmem:[%s7093_s20 + $0x3e8] sm:$0xff]  ;;  %v542_v47 = vld [vmem:[%s7093_s20 + $0x7f0] sm:$0xff]  ;;  %v2325_v58 = vadd.f32 %v9310_v19, %v9031_v11  ;;  %v544_v25 = vld [vmem:[%s7093_s20 + $0x800] sm:$0xff] }
 0x207   : > { %4922 = vst.msk [vmem:[%s7754_s18 + $0x5a8] sm:$0xff] %vm556_vm1, %v4665_v59  ;;  %4921 = vst.msk [vmem:[%s7754_s18 + $0x5a0] sm:$0xff] %vm556_vm1, %v4664_v52  ;;  %v4410_v61 = vmul.f32 %v9334_v62, %v3854_v37  ;;  %v4409_v8 = vmul.f32 %v9334_v62, %v3849_v23  ;;  %4173 = vperm.xlu1 %6904, %v2925_v35   ;;  %4168 = vperm.xlu0 %6903, %v2924_v12   ;;  %v1744_v32 = vpop.f32.mrb[140].mxu0  ;;  %v9392_v18 = vpop.f32.mrb[140].mxu1  ;;  %v2931_v23 = vld [vmem:[%s7088_s15 + $0x7e8] sm:$0xff] }
 0x208   : > { %4810 = vst.msk [vmem:[%s7754_s18 + $0x228] sm:$0xff] %vm556_vm1, %v4553_v60  ;;  %v1745_v24 = vadd.f32 %v9310_v19, %v1744_v32  ;;  %v6241_v34 = vpop.f32.mrb[141].mxu0  ;;  %6399 = vmatmul.mubr.msk.f32.gmra.mrb[246].mxu0 %vm556_vm1, %v411_v42  ;;  %6786 = vmatmul.mubr.msk.f32.gmra.mrb[246].mxu1 %vm556_vm1, %v540_v41  ;;  %v6628_v10 = vpop.f32.mrb[141].mxu1  ;;  %v2330_v59 = vadd.f32 %v9310_v19, %v9058_v33 }
 0x209   : > { %v4667_v63 = vadd.f32 %v4410_v61, %v2310_v38  ;;  %v4666_v44 = vadd.f32 %v4409_v8, %v2305_v54  ;;  %6401 = vmatprep.mubr.msk.f32.mxu0 %vm7003_vm0, %v10305_v1  ;;  %6788 = vmatprep.mubr.msk.f32.mxu1 %vm7003_vm0, %v10305_v1  ;;  %v10410_v54 = vld [vmem:[#allocation29_spill] sm:$0xff]  ;;  %v2930_v38 = vld [vmem:[%s7088_s15 + $0x7e0] sm:$0xff]  ;;  %v2340_v10 = vadd.f32 %v9310_v19, %v9112_v3 }
 0x20a   : > { %v4554_v20 = vadd.f32 %v4297_v29, %v1745_v24  ;;  %v3864_v49 = vpop.permute.xlu1 %3863  ;;  %v3859_v56 = vpop.permute.xlu0 %3858  ;;  %v4299_v60 = vmul.f32 %v9334_v62, %v10410_v54  ;;  %v543_v29 = vld [vmem:[%s7093_s20 + $0x7f8] sm:$0xff]  ;;  %v2335_v24 = vadd.f32 %v9310_v19, %v9085_v40 }
 0x20b   : > { %4924 = vst.msk [vmem:[%s7754_s18 + $0x5b8] sm:$0xff] %vm556_vm1, %v4667_v63  ;;  %4923 = vst.msk [vmem:[%s7754_s18 + $0x5b0] sm:$0xff] %vm556_vm1, %v4666_v44  ;;  %v4412_v46 = vmul.f32 %v9334_v62, %v3864_v49  ;;  %v4411_v48 = vmul.f32 %v9334_v62, %v3859_v56  ;;  %4183 = vperm.xlu1 %6904, %v2927_v4   ;;  %4178 = vperm.xlu0 %6903, %v2926_v16   ;;  %v1749_v28 = vpop.f32.mrb[142].mxu0  ;;  %v9419_v30 = vpop.f32.mrb[142].mxu1  ;;  %v2933_v49 = vld [vmem:[%s7088_s15 + $0x7f8] sm:$0xff]  ;;  %v2932_v56 = vld [vmem:[%s7088_s15 + $0x7f0] sm:$0xff] }
 0x20c   : > { %4811 = vst.msk [vmem:[%s7754_s18 + $0x230] sm:$0xff] %vm556_vm1, %v4554_v20  ;;  %v1750_v26 = vadd.f32 %v9310_v19, %v1749_v28  ;;  %v6244_v45 = vpop.f32.mrb[143].mxu0  ;;  %6402 = vmatmul.mubr.msk.f32.gmra.mrb[248].mxu0 %vm556_vm1, %v412_v14  ;;  %6789 = vmatmul.mubr.msk.f32.gmra.mrb[248].mxu1 %vm556_vm1, %v541_v0  ;;  %v6631_v9 = vpop.f32.mrb[143].mxu1  ;;  %v10411_v0 = vld [vmem:[#allocation28_spill] sm:$0xff]  ;;  %v415_v28 = vld [vmem:[%s7093_s20 + $0x3f8] sm:$0xff] }
 0x20d   : > { %v4669_v17 = vadd.f32 %v4412_v46, %v2320_v13  ;;  %v4668_v7 = vadd.f32 %v4411_v48, %v2315_v2  ;;  %6404 = vmatprep.mubr.msk.f32.mxu0 %vm7003_vm0, %v10305_v1  ;;  %6791 = vmatprep.mubr.msk.f32.mxu1 %vm7003_vm0, %v10305_v1  ;;  %v4300_v2 = vmul.f32 %v9334_v62, %v10411_v0 }
 0x20e   : > { %v4555_v35 = vadd.f32 %v4298_v43, %v1750_v26  ;;  %v3874_v12 = vpop.permute.xlu1 %3873  ;;  %v3869_v21 = vpop.permute.xlu0 %3868  ;;  %v2345_v43 = vadd.f32 %v9310_v19, %v9139_v57 }
 0x20f   : > { %4926 = vst.msk [vmem:[%s7754_s18 + $0x5c8] sm:$0xff] %vm556_vm1, %v4669_v17  ;;  %4925 = vst.msk [vmem:[%s7754_s18 + $0x5c0] sm:$0xff] %vm556_vm1, %v4668_v7  ;;  %v4414_v52 = vmul.f32 %v9334_v62, %v3874_v12  ;;  %v4413_v42 = vmul.f32 %v9334_v62, %v3869_v21  ;;  %4193 = vperm.xlu1 %6904, %v2929_v27   ;;  %4188 = vperm.xlu0 %6903, %v2928_v50   ;;  %v1754_v11 = vpop.f32.mrb[144].mxu0  ;;  %v9446_v41 = vpop.f32.mrb[144].mxu1 }
 0x210   : > { %4812 = vst.msk [vmem:[%s7754_s18 + $0x238] sm:$0xff] %vm556_vm1, %v4555_v35  ;;  %v1755_v33 = vadd.f32 %v9310_v19, %v1754_v11  ;;  %v6247_v37 = vpop.f32.mrb[145].mxu0  ;;  %6405 = vmatmul.mubr.msk.f32.gmra.mrb[250].mxu0 %vm556_vm1, %v413_v15  ;;  %6792 = vmatmul.mubr.msk.f32.gmra.mrb[250].mxu1 %vm556_vm1, %v542_v47  ;;  %v6634_v61 = vpop.f32.mrb[145].mxu1  ;;  %v2350_v50 = vadd.f32 %v9310_v19, %v9166_v22  ;;  %v10412_v15 = vld [vmem:[#allocation31_spill] sm:$0xff]  ;;  %v2934_v35 = vld [vmem:[%s7088_s15 + $0x800] sm:$0xff] }
 0x211   : > { %v4671_v8 = vadd.f32 %v4414_v52, %v2330_v59  ;;  %v4670_v32 = vadd.f32 %v4413_v42, %v2325_v58  ;;  %6407 = vmatprep.mubr.msk.f32.mxu0 %vm7003_vm0, %v10305_v1  ;;  %6794 = vmatprep.mubr.msk.f32.mxu1 %vm7003_vm0, %v10305_v1  ;;  %v4301_v47 = vmul.f32 %v9334_v62, %v10412_v15  ;;  %v416_v52 = vld [vmem:[%s7093_s20 + $0x400] sm:$0xff]  ;;  %v10413_v61 = vld [vmem:[#allocation30_spill] sm:$0xff] }
 0x212   : > { %v4556_v34 = vadd.f32 %v4299_v60, %v1755_v33  ;;  %v3884_v4 = vpop.permute.xlu1 %3883  ;;  %v3879_v16 = vpop.permute.xlu0 %3878  ;;  %v2355_v60 = vadd.f32 %v9310_v19, %v9193_v39  ;;  %v2360_v33 = vadd.f32 %v9310_v19, %v9220_v31  ;;  %v4302_v39 = vmul.f32 %v9334_v62, %v10413_v61 }
 0x213   : > { %4928 = vst.msk [vmem:[%s7754_s18 + $0x5d8] sm:$0xff] %vm556_vm1, %v4671_v8  ;;  %4927 = vst.msk [vmem:[%s7754_s18 + $0x5d0] sm:$0xff] %vm556_vm1, %v4670_v32  ;;  %v4416_v63 = vmul.f32 %v9334_v62, %v3884_v4  ;;  %v4415_v44 = vmul.f32 %v9334_v62, %v3879_v16  ;;  %4203 = vperm.xlu1 %6904, %v2931_v23   ;;  %4198 = vperm.xlu0 %6903, %v2930_v38   ;;  %v1759_v40 = vpop.f32.mrb[146].mxu0  ;;  %v9473_v14 = vpop.f32.mrb[146].mxu1 }
 0x214   : > { %4813 = vst.msk [vmem:[%s7754_s18 + $0x240] sm:$0xff] %vm556_vm1, %v4556_v34  ;;  %v1760_v3 = vadd.f32 %v9310_v19, %v1759_v40  ;;  %v6250_v20 = vpop.f32.mrb[147].mxu0  ;;  %6408 = vmatmul.mubr.msk.f32.gmra.mrb[252].mxu0 %vm556_vm1, %v414_v51  ;;  %6795 = vmatmul.mubr.msk.f32.gmra.mrb[252].mxu1 %vm556_vm1, %v543_v29  ;;  %v6637_v13 = vpop.f32.mrb[147].mxu1  ;;  %v2365_v16 = vadd.f32 %v9310_v19, %v9247_v6 }
 0x215   : > { %v4673_v46 = vadd.f32 %v4416_v63, %v2340_v10  ;;  %v4672_v48 = vadd.f32 %v4415_v44, %v2335_v24  ;;  %6410 = vmatprep.mubr.msk.f32.mxu0 %vm7003_vm0, %v10305_v1  ;;  %6797 = vmatprep.mubr.msk.f32.mxu1 %vm7003_vm0, %v10305_v1  ;;  %v2370_v10 = vadd.f32 %v9310_v19, %v9274_v5 }
 0x216   : > { %v4557_v26 = vadd.f32 %v4300_v2, %v1760_v3  ;;  %v3894_v45 = vpop.permute.xlu1 %3893  ;;  %v3889_v27 = vpop.permute.xlu0 %3888  ;;  %v10414_v2 = vld [vmem:[#allocation33_spill] sm:$0xff] }
 0x217   : > { %4930 = vst.msk [vmem:[%s7754_s18 + $0x5e8] sm:$0xff] %vm556_vm1, %v4673_v46  ;;  %4929 = vst.msk [vmem:[%s7754_s18 + $0x5e0] sm:$0xff] %vm556_vm1, %v4672_v48  ;;  %v4418_v9 = vmul.f32 %v9334_v62, %v3894_v45  ;;  %v4417_v17 = vmul.f32 %v9334_v62, %v3889_v27  ;;  %4213 = vperm.xlu1 %6904, %v2933_v49   ;;  %4208 = vperm.xlu0 %6903, %v2932_v56   ;;  %v1764_v7 = vpop.f32.mrb[148].mxu0  ;;  %v9500_v57 = vpop.f32.mrb[148].mxu1 }
 0x218   : > { %4814 = vst.msk [vmem:[%s7754_s18 + $0x248] sm:$0xff] %vm556_vm1, %v4557_v26  ;;  %v1765_v22 = vadd.f32 %v9310_v19, %v1764_v7  ;;  %v6253_v58 = vpop.f32.mrb[149].mxu0  ;;  %6411 = vmatmul.mubr.msk.f32.gmra.mrb[254].mxu0 %vm556_vm1, %v415_v28  ;;  %6798 = vmatmul.mubr.msk.f32.gmra.mrb[254].mxu1 %vm556_vm1, %v544_v25  ;;  %v6640_v12 = vpop.f32.mrb[149].mxu1  ;;  %v4303_v3 = vmul.f32 %v9334_v62, %v10414_v2 }
 0x219   : > { %v4675_v21 = vadd.f32 %v4418_v9, %v2350_v50  ;;  %v4674_v59 = vadd.f32 %v4417_v17, %v2345_v43  ;;  %6413 = vmatprep.mubr.msk.f32.mxu0 %vm7003_vm0, %v10305_v1  ;;  %v2375_v28 = vadd.f32 %v9310_v19, %v9301_v53  ;;  %v2380_v25 = vadd.f32 %v9310_v19, %v9338_v36  ;;  %v10415_v50 = vld [vmem:[#allocation32_spill] sm:$0xff] }
 0x21a   : > { %v4558_v42 = vadd.f32 %v4301_v47, %v1765_v22  ;;  %v3904_v11 = vpop.permute.xlu1 %3903  ;;  %v3899_v54 = vpop.permute.xlu0 %3898  ;;  %v4304_v9 = vmul.f32 %v9334_v62, %v10415_v50  ;;  %v2390_v12 = vadd.f32 %v9310_v19, %v9392_v18  ;;  %v2405_v2 = vadd.f32 %v9310_v19, %v9473_v14 }
 0x21b   : > { %4932 = vst.msk [vmem:[%s7754_s18 + $0x5f8] sm:$0xff] %vm556_vm1, %v4675_v21  ;;  %4931 = vst.msk [vmem:[%s7754_s18 + $0x5f0] sm:$0xff] %vm556_vm1, %v4674_v59  ;;  %v4420_v37 = vmul.f32 %v9334_v62, %v3904_v11  ;;  %v4419_v23 = vmul.f32 %v9334_v62, %v3899_v54  ;;  %4218 = vperm.xlu0 %6903, %v2934_v35   ;;  %v1769_v1 = vpop.f32.mrb[150].mxu0  ;;  %v9523_v38 = vpop.f32.mrb[150].mxu1  ;;  %v2385_v35 = vadd.f32 %v9310_v19, %v9365_v55  ;;  %v10416_v11 = vld [vmem:[#allocation35_spill] sm:$0xff] }
 0x21c   : > { %4815 = vst.msk [vmem:[%s7754_s18 + $0x250] sm:$0xff] %vm556_vm1, %v4558_v42  ;;  %v1770_v31 = vadd.f32 %v9310_v19, %v1769_v1  ;;  %v6256_v8 = vpop.f32.mrb[151].mxu0  ;;  %6414 = vmatmul.mubr.msk.f32.gmra.mrb[0].mxu0 %vm556_vm1, %v416_v52  ;;  %v6643_v32 = vpop.f32.mrb[151].mxu1  ;;  %v4305_v54 = vmul.f32 %v9334_v62, %v10416_v11 }
 0x21d   : > { %v4677_v51 = vadd.f32 %v4420_v37, %v2360_v33  ;;  %v4676_v29 = vadd.f32 %v4419_v23, %v2355_v60 }
 0x21e   : > { %v4559_v24 = vadd.f32 %v4302_v39, %v1770_v31  ;;  %v3914_v34 = vpop.permute.xlu1 %3913  ;;  %v3909_v4 = vpop.permute.xlu0 %3908  ;;  %v2395_v39 = vadd.f32 %v9310_v19, %v9419_v30  ;;  %v2400_v31 = vadd.f32 %v9310_v19, %v9446_v41 }
 0x21f   : > { %4934 = vst.msk [vmem:[%s7754_s18 + $0x608] sm:$0xff] %vm556_vm1, %v4677_v51  ;;  %4933 = vst.msk [vmem:[%s7754_s18 + $0x600] sm:$0xff] %vm556_vm1, %v4676_v29  ;;  %v4422_v63 = vmul.f32 %v9334_v62, %v3914_v34  ;;  %v4421_v44 = vmul.f32 %v9334_v62, %v3909_v4  ;;  %v1774_v40 = vpop.f32.mrb[152].mxu0  ;;  %v9541_v0 = vpop.f32.mrb[152].mxu1 }
 0x220   : > { %4816 = vst.msk [vmem:[%s7754_s18 + $0x258] sm:$0xff] %vm556_vm1, %v4559_v24  ;;  %v1775_v6 = vadd.f32 %v9310_v19, %v1774_v40  ;;  %v6259_v5 = vpop.f32.mrb[153].mxu0  ;;  %v6646_v20 = vpop.f32.mrb[153].mxu1  ;;  %v10417_v24 = vld [vmem:[#allocation34_spill] sm:$0xff]  ;;  %v2420_v50 = vadd.f32 %v9310_v19, %v9541_v0 }
 0x221   : > { %v4679_v49 = vadd.f32 %v4422_v63, %v2370_v10  ;;  %v4678_v56 = vadd.f32 %v4421_v44, %v2365_v16  ;;  %v4306_v34 = vmul.f32 %v9334_v62, %v10417_v24 }
 0x222   : > { %v4560_v13 = vadd.f32 %v4303_v3, %v1775_v6  ;;  %v3924_v46 = vpop.permute.xlu1 %3923  ;;  %v3919_v48 = vpop.permute.xlu0 %3918  ;;  %v2410_v3 = vadd.f32 %v9310_v19, %v9500_v57 }
 0x223   : > { %4936 = vst.msk [vmem:[%s7754_s18 + $0x618] sm:$0xff] %vm556_vm1, %v4679_v49  ;;  %4935 = vst.msk [vmem:[%s7754_s18 + $0x610] sm:$0xff] %vm556_vm1, %v4678_v56  ;;  %v4424_v43 = vmul.f32 %v9334_v62, %v3924_v46  ;;  %v4423_v26 = vmul.f32 %v9334_v62, %v3919_v48  ;;  %v1779_v45 = vpop.f32.mrb[154].mxu0  ;;  %v9558_v27 = vpop.f32.mrb[154].mxu1  ;;  %v10418_v56 = vld [vmem:[#allocation37_spill] sm:$0xff] }
 0x224   : > { %4817 = vst.msk [vmem:[%s7754_s18 + $0x260] sm:$0xff] %vm556_vm1, %v4560_v13  ;;  %v1780_v53 = vadd.f32 %v9310_v19, %v1779_v45  ;;  %v6262_v36 = vpop.f32.mrb[155].mxu0  ;;  %v6649_v17 = vpop.f32.mrb[155].mxu1  ;;  %v4307_v13 = vmul.f32 %v9334_v62, %v10418_v56  ;;  %v2415_v45 = vadd.f32 %v9310_v19, %v9523_v38 }
 0x225   : > { %v4681_v7 = vadd.f32 %v4424_v43, %v2380_v25  ;;  %v4680_v15 = vadd.f32 %v4423_v26, %v2375_v28 }
 0x226   : > { %v4561_v47 = vadd.f32 %v4304_v9, %v1780_v53  ;;  %v3934_v22 = vpop.permute.xlu1 %3933  ;;  %v3929_v58 = vpop.permute.xlu0 %3928 }
 0x227   : > { %4938 = vst.msk [vmem:[%s7754_s18 + $0x628] sm:$0xff] %vm556_vm1, %v4681_v7  ;;  %4937 = vst.msk [vmem:[%s7754_s18 + $0x620] sm:$0xff] %vm556_vm1, %v4680_v15  ;;  %v4426_v21 = vmul.f32 %v9334_v62, %v3934_v22  ;;  %v4425_v59 = vmul.f32 %v9334_v62, %v3929_v58  ;;  %v1784_v52 = vpop.f32.mrb[156].mxu0  ;;  %v9575_v42 = vpop.f32.mrb[156].mxu1  ;;  %v10419_v7 = vld [vmem:[#allocation36_spill] sm:$0xff] }
 0x228   : > { %4818 = vst.msk [vmem:[%s7754_s18 + $0x268] sm:$0xff] %vm556_vm1, %v4561_v47  ;;  %v1785_v55 = vadd.f32 %v9310_v19, %v1784_v52  ;;  %v6265_v18 = vpop.f32.mrb[157].mxu0  ;;  %v6652_v60 = vpop.f32.mrb[157].mxu1  ;;  %v4308_v15 = vmul.f32 %v9334_v62, %v10419_v7  ;;  %v2430_v52 = vadd.f32 %v9310_v19, %v9575_v42 }
 0x229   : > { %v4683_v33 = vadd.f32 %v4426_v21, %v2390_v12  ;;  %v4682_v37 = vadd.f32 %v4425_v59, %v2385_v35  ;;  %v2425_v59 = vadd.f32 %v9310_v19, %v9558_v27  ;;  %v10420_v60 = vld [vmem:[#allocation39_spill] sm:$0xff] }
 0x22a   : > { %v4562_v23 = vadd.f32 %v4305_v54, %v1785_v55  ;;  %v3944_v1 = vpop.permute.xlu1 %3943  ;;  %v3939_v61 = vpop.permute.xlu0 %3938 }
 0x22b   : > { %4940 = vst.msk [vmem:[%s7754_s18 + $0x638] sm:$0xff] %vm556_vm1, %v4683_v33  ;;  %4939 = vst.msk [vmem:[%s7754_s18 + $0x630] sm:$0xff] %vm556_vm1, %v4682_v37  ;;  %v4428_v8 = vmul.f32 %v9334_v62, %v3944_v1  ;;  %v4427_v32 = vmul.f32 %v9334_v62, %v3939_v61  ;;  %v1789_v51 = vpop.f32.mrb[158].mxu0  ;;  %v9592_v29 = vpop.f32.mrb[158].mxu1  ;;  %v4309_v33 = vmul.f32 %v9334_v62, %v10420_v60 }
 0x22c   : > { %4819 = vst.msk [vmem:[%s7754_s18 + $0x270] sm:$0xff] %vm556_vm1, %v4562_v23  ;;  %v1790_v30 = vadd.f32 %v9310_v19, %v1789_v51  ;;  %v6268_v41 = vpop.f32.mrb[159].mxu0  ;;  %v6655_v4 = vpop.f32.mrb[159].mxu1 }
 0x22d   : > { %v4685_v16 = vadd.f32 %v4428_v8, %v2400_v31  ;;  %v4684_v10 = vadd.f32 %v4427_v32, %v2395_v39  ;;  %v2435_v8 = vadd.f32 %v9310_v19, %v9592_v29  ;;  %v10421_v41 = vld [vmem:[#allocation38_spill] sm:$0xff] }
 0x22e   : > { %v4563_v63 = vadd.f32 %v4306_v34, %v1790_v30  ;;  %v3954_v44 = vpop.permute.xlu1 %3953  ;;  %v3949_v40 = vpop.permute.xlu0 %3948  ;;  %v4310_v4 = vmul.f32 %v9334_v62, %v10421_v41 }
 0x22f   : > { %4942 = vst.msk [vmem:[%s7754_s18 + $0x648] sm:$0xff] %vm556_vm1, %v4685_v16  ;;  %4941 = vst.msk [vmem:[%s7754_s18 + $0x640] sm:$0xff] %vm556_vm1, %v4684_v10  ;;  %v4430_v6 = vmul.f32 %v9334_v62, %v3954_v44  ;;  %v4429_v5 = vmul.f32 %v9334_v62, %v3949_v40  ;;  %v1794_v20 = vpop.f32.mrb[160].mxu0  ;;  %v2439_v49 = vpop.f32.mrb[160].mxu1 }
 0x230   : > { %4820 = vst.msk [vmem:[%s7754_s18 + $0x278] sm:$0xff] %vm556_vm1, %v4563_v63  ;;  %v1795_v14 = vadd.f32 %v9310_v19, %v1794_v20  ;;  %v6271_v57 = vpop.f32.mrb[161].mxu0  ;;  %v6658_v46 = vpop.f32.mrb[161].mxu1  ;;  %v2440_v32 = vadd.f32 %v9310_v19, %v2439_v49 }
 0x231   : > { %v4687_v48 = vadd.f32 %v4430_v6, %v2410_v3  ;;  %v4686_v28 = vadd.f32 %v4429_v5, %v2405_v2 }
 0x232   : > { %v4564_v25 = vadd.f32 %v4307_v13, %v1795_v14  ;;  %v3964_v43 = vpop.permute.xlu1 %3963  ;;  %v3959_v26 = vpop.permute.xlu0 %3958  ;;  %v10422_v14 = vld [vmem:[#allocation41_spill] sm:$0xff] }
 0x233   : > { %4944 = vst.msk [vmem:[%s7754_s18 + $0x658] sm:$0xff] %vm556_vm1, %v4687_v48  ;;  %4943 = vst.msk [vmem:[%s7754_s18 + $0x650] sm:$0xff] %vm556_vm1, %v4686_v28  ;;  %v4432_v9 = vmul.f32 %v9334_v62, %v3964_v43  ;;  %v4431_v53 = vmul.f32 %v9334_v62, %v3959_v26  ;;  %v1799_v36 = vpop.f32.mrb[162].mxu0  ;;  %v2444_v17 = vpop.f32.mrb[162].mxu1  ;;  %v4311_v57 = vmul.f32 %v9334_v62, %v10422_v14 }
 0x234   : > { %4821 = vst.msk [vmem:[%s7754_s18 + $0x280] sm:$0xff] %vm556_vm1, %v4564_v25  ;;  %v1800_v38 = vadd.f32 %v9310_v19, %v1799_v36  ;;  %v6274_v0 = vpop.f32.mrb[163].mxu0  ;;  %v6661_v47 = vpop.f32.mrb[163].mxu1  ;;  %v2445_v6 = vadd.f32 %v9310_v19, %v2444_v17 }
 0x235   : > { %v4689_v22 = vadd.f32 %v4432_v9, %v2420_v50  ;;  %v4688_v58 = vadd.f32 %v4431_v53, %v2415_v45 }
 0x236   : > { %v4565_v35 = vadd.f32 %v4308_v15, %v1800_v38  ;;  %v3974_v12 = vpop.permute.xlu1 %3973  ;;  %v3969_v21 = vpop.permute.xlu0 %3968  ;;  %v10423_v38 = vld [vmem:[#allocation40_spill] sm:$0xff] }
 0x237   : > { %4946 = vst.msk [vmem:[%s7754_s18 + $0x668] sm:$0xff] %vm556_vm1, %v4689_v22  ;;  %4945 = vst.msk [vmem:[%s7754_s18 + $0x660] sm:$0xff] %vm556_vm1, %v4688_v58  ;;  %v4434_v11 = vmul.f32 %v9334_v62, %v3974_v12  ;;  %v4433_v54 = vmul.f32 %v9334_v62, %v3969_v21  ;;  %v1804_v55 = vpop.f32.mrb[164].mxu0  ;;  %v2449_v18 = vpop.f32.mrb[164].mxu1  ;;  %v4312_v0 = vmul.f32 %v9334_v62, %v10423_v38 }
 0x238   : > { %4822 = vst.msk [vmem:[%s7754_s18 + $0x288] sm:$0xff] %vm556_vm1, %v4565_v35  ;;  %v1805_v27 = vadd.f32 %v9310_v19, %v1804_v55  ;;  %v6277_v42 = vpop.f32.mrb[165].mxu0  ;;  %v6664_v37 = vpop.f32.mrb[165].mxu1  ;;  %v2450_v5 = vadd.f32 %v9310_v19, %v2449_v18 }
 0x239   : > { %v4691_v23 = vadd.f32 %v4434_v11, %v2430_v52  ;;  %v4690_v1 = vadd.f32 %v4433_v54, %v2425_v59 }
 0x23a   : > { %v4566_v61 = vadd.f32 %v4309_v33, %v1805_v27  ;;  %v3984_v39 = vpop.permute.xlu1 %3983  ;;  %v3979_v31 = vpop.permute.xlu0 %3978  ;;  %v10424_v33 = vld [vmem:[#allocation43_spill] sm:$0xff] }
 0x23b   : > { %4948 = vst.msk [vmem:[%s7754_s18 + $0x678] sm:$0xff] %vm556_vm1, %v4691_v23  ;;  %4947 = vst.msk [vmem:[%s7754_s18 + $0x670] sm:$0xff] %vm556_vm1, %v4690_v1  ;;  %v4436_v51 = vmul.f32 %v9334_v62, %v3984_v39  ;;  %v4435_v24 = vmul.f32 %v9334_v62, %v3979_v31  ;;  %v1809_v34 = vpop.f32.mrb[166].mxu0  ;;  %v2454_v30 = vpop.f32.mrb[166].mxu1  ;;  %v4313_v27 = vmul.f32 %v9334_v62, %v10424_v33 }
 0x23c   : > { %4823 = vst.msk [vmem:[%s7754_s18 + $0x290] sm:$0xff] %vm556_vm1, %v4566_v61  ;;  %v1810_v29 = vadd.f32 %v9310_v19, %v1809_v34  ;;  %v6280_v16 = vpop.f32.mrb[167].mxu0  ;;  %v6667_v10 = vpop.f32.mrb[167].mxu1  ;;  %v2455_v53 = vadd.f32 %v9310_v19, %v2454_v30  ;;  %v10425_v34 = vld [vmem:[#allocation42_spill] sm:$0xff] }
 0x23d   : > { %v4693_v63 = vadd.f32 %v4436_v51, %v2440_v32  ;;  %v4692_v44 = vadd.f32 %v4435_v24, %v2435_v8  ;;  %v4314_v30 = vmul.f32 %v9334_v62, %v10425_v34 }
 0x23e   : > { %v4567_v40 = vadd.f32 %v4310_v4, %v1810_v29  ;;  %v3994_v2 = vpop.permute.xlu1 %3993  ;;  %v3989_v3 = vpop.permute.xlu0 %3988 }
 0x23f   : > { %4950 = vst.msk [vmem:[%s7754_s18 + $0x688] sm:$0xff] %vm556_vm1, %v4693_v63  ;;  %4949 = vst.msk [vmem:[%s7754_s18 + $0x680] sm:$0xff] %vm556_vm1, %v4692_v44  ;;  %v4438_v20 = vmul.f32 %v9334_v62, %v3994_v2  ;;  %v4437_v49 = vmul.f32 %v9334_v62, %v3989_v3  ;;  %v1814_v56 = vpop.f32.mrb[168].mxu0  ;;  %v2459_v13 = vpop.f32.mrb[168].mxu1  ;;  %v10426_v3 = vld [vmem:[#allocation45_spill] sm:$0xff] }
 0x240   : > { %4824 = vst.msk [vmem:[%s7754_s18 + $0x298] sm:$0xff] %vm556_vm1, %v4567_v40  ;;  %v1815_v46 = vadd.f32 %v9310_v19, %v1814_v56  ;;  %v6283_v48 = vpop.f32.mrb[169].mxu0  ;;  %v6670_v28 = vpop.f32.mrb[169].mxu1  ;;  %v2460_v26 = vadd.f32 %v9310_v19, %v2459_v13 }
 0x241   : > { %v4695_v25 = vadd.f32 %v4438_v20, %v2450_v5  ;;  %v4694_v43 = vadd.f32 %v4437_v49, %v2445_v6  ;;  %v4315_v6 = vmul.f32 %v9334_v62, %v10426_v3 }
 0x242   : > { %v4568_v45 = vadd.f32 %v4311_v57, %v1815_v46  ;;  %v4004_v50 = vpop.permute.xlu1 %4003  ;;  %v3999_v9 = vpop.permute.xlu0 %3998 }
 0x243   : > { %4952 = vst.msk [vmem:[%s7754_s18 + $0x698] sm:$0xff] %vm556_vm1, %v4695_v25  ;;  %4951 = vst.msk [vmem:[%s7754_s18 + $0x690] sm:$0xff] %vm556_vm1, %v4694_v43  ;;  %v4440_v36 = vmul.f32 %v9334_v62, %v4004_v50  ;;  %v4439_v17 = vmul.f32 %v9334_v62, %v3999_v9  ;;  %v1819_v7 = vpop.f32.mrb[170].mxu0  ;;  %v2464_v15 = vpop.f32.mrb[170].mxu1  ;;  %v10427_v25 = vld [vmem:[#allocation44_spill] sm:$0xff] }
 0x244   : > { %4825 = vst.msk [vmem:[%s7754_s18 + $0x2a0] sm:$0xff] %vm556_vm1, %v4568_v45  ;;  %v1820_v47 = vadd.f32 %v9310_v19, %v1819_v7  ;;  %v6286_v22 = vpop.f32.mrb[171].mxu0  ;;  %v6673_v58 = vpop.f32.mrb[171].mxu1  ;;  %v2465_v21 = vadd.f32 %v9310_v19, %v2464_v15  ;;  %v4316_v43 = vmul.f32 %v9334_v62, %v10427_v25 }
 0x245   : > { %v4696_v35 = vadd.f32 %v4439_v17, %v2455_v53  ;;  %v4697_v12 = vadd.f32 %v4440_v36, %v2460_v26 }
 0x246   : > { %v4569_v59 = vadd.f32 %v4312_v0, %v1820_v47  ;;  %v4014_v52 = vpop.permute.xlu1 %4013  ;;  %v4009_v11 = vpop.permute.xlu0 %4008  ;;  %v10428_v0 = vld [vmem:[#allocation47_spill] sm:$0xff] }
 0x247   : > { %4953 = vst.msk [vmem:[%s7754_s18 + $0x6a0] sm:$0xff] %vm556_vm1, %v4696_v35  ;;  %4954 = vst.msk [vmem:[%s7754_s18 + $0x6a8] sm:$0xff] %vm556_vm1, %v4697_v12  ;;  %v4442_v54 = vmul.f32 %v9334_v62, %v4014_v52  ;;  %v4441_v55 = vmul.f32 %v9334_v62, %v4009_v11  ;;  %v1824_v18 = vpop.f32.mrb[172].mxu0  ;;  %v2469_v60 = vpop.f32.mrb[172].mxu1  ;;  %v4317_v47 = vmul.f32 %v9334_v62, %v10428_v0 }
 0x248   : > { %4826 = vst.msk [vmem:[%s7754_s18 + $0x2a8] sm:$0xff] %vm556_vm1, %v4569_v59  ;;  %v1825_v42 = vadd.f32 %v9310_v19, %v1824_v18  ;;  %v2470_v37 = vadd.f32 %v9310_v19, %v2469_v60  ;;  %v6289_v23 = vpop.f32.mrb[173].mxu0  ;;  %v6676_v1 = vpop.f32.mrb[173].mxu1  ;;  %v10429_v18 = vld [vmem:[#allocation46_spill] sm:$0xff] }
 0x249   : > { %v4698_v61 = vadd.f32 %v4441_v55, %v2465_v21  ;;  %v4318_v60 = vmul.f32 %v9334_v62, %v10429_v18 }
 0x24a   : > { %v4570_v39 = vadd.f32 %v4313_v27, %v1825_v42  ;;  %v4699_v31 = vadd.f32 %v4442_v54, %v2470_v37  ;;  %v4019_v8 = vpop.permute.xlu0 %4018  ;;  %v4024_v10 = vpop.permute.xlu1 %4023 }
 0x24b   : > { %4955 = vst.msk [vmem:[%s7754_s18 + $0x6b0] sm:$0xff] %vm556_vm1, %v4698_v61  ;;  %v4443_v32 = vmul.f32 %v9334_v62, %v4019_v8  ;;  %v1829_v51 = vpop.f32.mrb[174].mxu0  ;;  %v2474_v24 = vpop.f32.mrb[174].mxu1  ;;  %v4444_v5 = vmul.f32 %v9334_v62, %v4024_v10 }
 0x24c   : > { %4827 = vst.msk [vmem:[%s7754_s18 + $0x2b0] sm:$0xff] %vm556_vm1, %v4570_v39  ;;  %4956 = vst.msk [vmem:[%s7754_s18 + $0x6b8] sm:$0xff] %vm556_vm1, %v4699_v31  ;;  %v1830_v41 = vadd.f32 %v9310_v19, %v1829_v51  ;;  %v2475_v4 = vadd.f32 %v9310_v19, %v2474_v24  ;;  %v6292_v29 = vpop.f32.mrb[175].mxu0  ;;  %v6679_v16 = vpop.f32.mrb[175].mxu1 }
 0x24e   : > { %v4571_v63 = vadd.f32 %v4314_v30, %v1830_v41  ;;  %v4700_v44 = vadd.f32 %v4443_v32, %v2475_v4  ;;  %v4029_v14 = vpop.permute.xlu0 %4028  ;;  %v4034_v36 = vpop.permute.xlu1 %4033  ;;  %v10430_v32 = vld [vmem:[#allocation49_spill] sm:$0xff] }
 0x24f   : > { %v1834_v40 = vpop.f32.mrb[176].mxu0  ;;  %v2479_v2 = vpop.f32.mrb[176].mxu1  ;;  %v4445_v26 = vmul.f32 %v9334_v62, %v4029_v14  ;;  %v4446_v22 = vmul.f32 %v9334_v62, %v4034_v36  ;;  %v4319_v51 = vmul.f32 %v9334_v62, %v10430_v32 }
 0x250   : > { %4828 = vst.msk [vmem:[%s7754_s18 + $0x2b8] sm:$0xff] %vm556_vm1, %v4571_v63  ;;  %4957 = vst.msk [vmem:[%s7754_s18 + $0x6c0] sm:$0xff] %vm556_vm1, %v4700_v44  ;;  %v1835_v20 = vadd.f32 %v9310_v19, %v1834_v40  ;;  %v2480_v49 = vadd.f32 %v9310_v19, %v2479_v2  ;;  %v6295_v56 = vpop.f32.mrb[177].mxu0  ;;  %v6682_v13 = vpop.f32.mrb[177].mxu1  ;;  %v10431_v40 = vld [vmem:[#allocation48_spill] sm:$0xff] }
 0x251   : > { %v4320_v2 = vmul.f32 %v9334_v62, %v10431_v40 }
 0x252   : > { %v4572_v57 = vadd.f32 %v4315_v6, %v1835_v20  ;;  %v4701_v46 = vadd.f32 %v4444_v5, %v2480_v49  ;;  %v4039_v59 = vpop.permute.xlu0 %4038  ;;  %v4044_v1 = vpop.permute.xlu1 %4043  ;;  %v9764_v5 = vld [vmem:[%s10296_s3] ss:$0 sm:$0xff] }
 0x253   : > { %v1839_v48 = vpop.f32.mrb[178].mxu0  ;;  %v2484_v28 = vpop.f32.mrb[178].mxu1  ;;  %v4447_v33 = vmul.f32 %v9334_v62, %v4039_v59  ;;  %v4448_v24 = vmul.f32 %v9334_v62, %v4044_v1 }
 0x254   : > { %4829 = vst.msk [vmem:[%s7754_s18 + $0x2c0] sm:$0xff] %vm556_vm1, %v4572_v57  ;;  %4958 = vst.msk [vmem:[%s7754_s18 + $0x6c8] sm:$0xff] %vm556_vm1, %v4701_v46  ;;  %v1840_v45 = vadd.f32 %v9310_v19, %v1839_v48  ;;  %v2485_v50 = vadd.f32 %v9310_v19, %v2484_v28  ;;  %v6298_v9 = vpop.f32.mrb[179].mxu0  ;;  %v6685_v53 = vpop.f32.mrb[179].mxu1  ;;  %v10432_v28 = vld [vmem:[#allocation51_spill] sm:$0xff] }
 0x255   : > { %v4321_v25 = vmul.f32 %v9334_v62, %v10432_v28 }
 0x256   : > { %v4573_v17 = vadd.f32 %v4316_v43, %v1840_v45  ;;  %v4702_v7 = vadd.f32 %v4445_v26, %v2485_v50  ;;  %v4049_v29 = vpop.permute.xlu0 %4048  ;;  %v4054_v13 = vpop.permute.xlu1 %4053 }
 0x257   : > { %v1844_v15 = vpop.f32.mrb[180].mxu0  ;;  %v2489_v38 = vpop.f32.mrb[180].mxu1  ;;  %v4449_v3 = vmul.f32 %v9334_v62, %v4049_v29 }
 0x258   : > { %4830 = vst.msk [vmem:[%s7754_s18 + $0x2c8] sm:$0xff] %vm556_vm1, %v4573_v17  ;;  %4959 = vst.msk [vmem:[%s7754_s18 + $0x6d0] sm:$0xff] %vm556_vm1, %v4702_v7  ;;  %v1845_v58 = vadd.f32 %v9310_v19, %v1844_v15  ;;  %v2490_v35 = vadd.f32 %v9310_v19, %v2489_v38  ;;  %v6301_v12 = vpop.f32.mrb[181].mxu0  ;;  %v6688_v21 = vpop.f32.mrb[181].mxu1  ;;  %v10433_v15 = vld [vmem:[#allocation50_spill] sm:$0xff] }
 0x25a   : > { %v4574_v52 = vadd.f32 %v4317_v47, %v1845_v58  ;;  %v4703_v11 = vadd.f32 %v4446_v22, %v2490_v35  ;;  %v4059_v9 = vpop.permute.xlu0 %4058  ;;  %v4064_v12 = vpop.permute.xlu1 %4063 }
 0x25b   : > { %v1849_v54 = vpop.f32.mrb[182].mxu0  ;;  %v2494_v55 = vpop.f32.mrb[182].mxu1 }
 0x25c   : > { %4831 = vst.msk [vmem:[%s7754_s18 + $0x2d0] sm:$0xff] %vm556_vm1, %v4574_v52  ;;  %4960 = vst.msk [vmem:[%s7754_s18 + $0x6d8] sm:$0xff] %vm556_vm1, %v4703_v11  ;;  %v1850_v27 = vadd.f32 %v9310_v19, %v1849_v54  ;;  %v2495_v42 = vadd.f32 %v9310_v19, %v2494_v55  ;;  %v6304_v37 = vpop.f32.mrb[183].mxu0  ;;  %v6691_v23 = vpop.f32.mrb[183].mxu1  ;;  %v10434_v54 = vld [vmem:[#allocation53_spill] sm:$0xff] }
 0x25e   : > { %v4575_v61 = vadd.f32 %v4318_v60, %v1850_v27  ;;  %v4704_v39 = vadd.f32 %v4447_v33, %v2495_v42  ;;  %v4069_v37 = vpop.permute.xlu0 %4068 }
 0x25f   : > { %v1854_v31 = vpop.f32.mrb[184].mxu0  ;;  %v2499_v8 = vpop.f32.mrb[184].mxu1 }
 0x260   : > { %4832 = vst.msk [vmem:[%s7754_s18 + $0x2d8] sm:$0xff] %vm556_vm1, %v4575_v61  ;;  %4961 = vst.msk [vmem:[%s7754_s18 + $0x6e0] sm:$0xff] %vm556_vm1, %v4704_v39  ;;  %v1855_v34 = vadd.f32 %v9310_v19, %v1854_v31  ;;  %v2500_v30 = vadd.f32 %v9310_v19, %v2499_v8  ;;  %v6307_v41 = vpop.f32.mrb[185].mxu0  ;;  %v6694_v4 = vpop.f32.mrb[185].mxu1  ;;  %v10435_v31 = vld [vmem:[#allocation52_spill] sm:$0xff] }
 0x261   : > { %v4074_v41 = vpop.permute.xlu1 %4073 }
 0x262   : > { %v4576_v16 = vadd.f32 %v4319_v51, %v1855_v34  ;;  %v4705_v10 = vadd.f32 %v4448_v24, %v2500_v30 }
 0x263   : > { %v1859_v63 = vpop.f32.mrb[186].mxu0  ;;  %v2504_v44 = vpop.f32.mrb[186].mxu1 }
 0x264   : > { %4833 = vst.msk [vmem:[%s7754_s18 + $0x2e0] sm:$0xff] %vm556_vm1, %v4576_v16  ;;  %4962 = vst.msk [vmem:[%s7754_s18 + $0x6e8] sm:$0xff] %vm556_vm1, %v4705_v10  ;;  %v1860_v6 = vadd.f32 %v9310_v19, %v1859_v63  ;;  %v2505_v20 = vadd.f32 %v9764_v5, %v2504_v44  ;;  %v6310_v49 = vpop.f32.mrb[187].mxu0  ;;  %v6697_v56 = vpop.f32.mrb[187].mxu1  ;;  %v4450_v19 = vmul.f32 %v9334_v62, %v4054_v13  ;;  %v9779_v62 = vld [vmem:[%s10297_s4] ss:$0 sm:$0xff] }
 0x265   : > { %v4322_v38 = vmul.f32 %v9779_v62, %v10433_v15  ;;  %v4451_v0 = vmul.f32 %v9779_v62, %v4059_v9  ;;  %v4323_v55 = vmul.f32 %v9779_v62, %v10434_v54  ;;  %v4452_v18 = vmul.f32 %v9779_v62, %v4064_v12  ;;  %v10436_v63 = vld [vmem:[#allocation55_spill] sm:$0xff]  ;;  %v4079_v49 = vpop.permute.xlu0 %4078 }
 0x266   : > { %v4577_v14 = vadd.f32 %v4320_v2, %v1860_v6  ;;  %v4706_v57 = vadd.f32 %v4449_v3, %v2505_v20  ;;  %v4324_v8 = vmul.f32 %v9779_v62, %v10435_v31  ;;  %v4453_v32 = vmul.f32 %v9779_v62, %v4069_v37 }
 0x267   : > { %v1864_v46 = vpop.f32.mrb[188].mxu0  ;;  %v2509_v48 = vpop.f32.mrb[188].mxu1  ;;  %v4325_v44 = vmul.f32 %v9779_v62, %v10436_v63  ;;  %v4454_v40 = vmul.f32 %v9779_v62, %v4074_v41  ;;  %v4455_v28 = vmul.f32 %v9779_v62, %v4079_v49 }
 0x268   : > { %4834 = vst.msk [vmem:[%s7754_s18 + $0x2e8] sm:$0xff] %vm556_vm1, %v4577_v14  ;;  %4963 = vst.msk [vmem:[%s7754_s18 + $0x6f0] sm:$0xff] %vm556_vm1, %v4706_v57  ;;  %v1865_v43 = vadd.f32 %v9764_v5, %v1864_v46  ;;  %v2510_v26 = vadd.f32 %v9764_v5, %v2509_v48  ;;  %v6313_v45 = vpop.f32.mrb[189].mxu0  ;;  %v6700_v50 = vpop.f32.mrb[189].mxu1  ;;  %v10437_v46 = vld [vmem:[#allocation54_spill] sm:$0xff] }
 0x269   : > { %v4326_v48 = vmul.f32 %v9779_v62, %v10437_v46  ;;  %v4084_v45 = vpop.permute.xlu1 %4083 }
 0x26a   : > { %v4578_v53 = vadd.f32 %v4321_v25, %v1865_v43  ;;  %v4707_v36 = vadd.f32 %v4450_v19, %v2510_v26  ;;  %v4456_v15 = vmul.f32 %v9779_v62, %v4084_v45 }
 0x26b   : > { %v1869_v17 = vpop.f32.mrb[190].mxu0  ;;  %v2514_v7 = vpop.f32.mrb[190].mxu1 }
 0x26c   : > { %4835 = vst.msk [vmem:[%s7754_s18 + $0x2f0] sm:$0xff] %vm556_vm1, %v4578_v53  ;;  %4964 = vst.msk [vmem:[%s7754_s18 + $0x6f8] sm:$0xff] %vm556_vm1, %v4707_v36  ;;  %v1870_v47 = vadd.f32 %v9764_v5, %v1869_v17  ;;  %v2515_v22 = vadd.f32 %v9764_v5, %v2514_v7  ;;  %v6316_v58 = vpop.f32.mrb[191].mxu0  ;;  %v6703_v35 = vpop.f32.mrb[191].mxu1  ;;  %v10438_v17 = vld [vmem:[#allocation57_spill] sm:$0xff] }
 0x26d   : > { %v4327_v7 = vmul.f32 %v9779_v62, %v10438_v17  ;;  %v4089_v58 = vpop.permute.xlu0 %4088 }
 0x26e   : > { %v4579_v21 = vadd.f32 %v4322_v38, %v1870_v47  ;;  %v4708_v59 = vadd.f32 %v4451_v0, %v2515_v22  ;;  %v4457_v54 = vmul.f32 %v9779_v62, %v4089_v58 }
 0x26f   : > { %v1874_v52 = vpop.f32.mrb[192].mxu0  ;;  %v2519_v11 = vpop.f32.mrb[192].mxu1 }
 0x270   : > { %4836 = vst.msk [vmem:[%s7754_s18 + $0x2f8] sm:$0xff] %vm556_vm1, %v4579_v21  ;;  %4965 = vst.msk [vmem:[%s7754_s18 + $0x700] sm:$0xff] %vm556_vm1, %v4708_v59  ;;  %v1875_v60 = vadd.f32 %v9764_v5, %v1874_v52  ;;  %v2520_v33 = vadd.f32 %v9764_v5, %v2519_v11  ;;  %v6319_v27 = vpop.f32.mrb[193].mxu0  ;;  %v6706_v42 = vpop.f32.mrb[193].mxu1  ;;  %v10439_v52 = vld [vmem:[#allocation56_spill] sm:$0xff] }
 0x271   : > { %v4328_v11 = vmul.f32 %v9779_v62, %v10439_v52  ;;  %v4094_v27 = vpop.permute.xlu1 %4093 }
 0x272   : > { %v4580_v23 = vadd.f32 %v4323_v55, %v1875_v60  ;;  %v4709_v1 = vadd.f32 %v4452_v18, %v2520_v33  ;;  %v4458_v31 = vmul.f32 %v9779_v62, %v4094_v27 }
 0x273   : > { %v1879_v61 = vpop.f32.mrb[194].mxu0  ;;  %v2524_v39 = vpop.f32.mrb[194].mxu1 }
 0x274   : > { %4837 = vst.msk [vmem:[%s7754_s18 + $0x300] sm:$0xff] %vm556_vm1, %v4580_v23  ;;  %4966 = vst.msk [vmem:[%s7754_s18 + $0x708] sm:$0xff] %vm556_vm1, %v4709_v1  ;;  %v1880_v51 = vadd.f32 %v9764_v5, %v1879_v61  ;;  %v2525_v24 = vadd.f32 %v9764_v5, %v2524_v39  ;;  %v6322_v34 = vpop.f32.mrb[195].mxu0  ;;  %v6709_v30 = vpop.f32.mrb[195].mxu1  ;;  %v10440_v61 = vld [vmem:[#allocation59_spill] sm:$0xff] }
 0x275   : > { %v4329_v39 = vmul.f32 %v9779_v62, %v10440_v61  ;;  %v4099_v34 = vpop.permute.xlu0 %4098 }
 0x276   : > { %v4581_v4 = vadd.f32 %v4324_v8, %v1880_v51  ;;  %v4710_v29 = vadd.f32 %v4453_v32, %v2525_v24  ;;  %v4459_v63 = vmul.f32 %v9779_v62, %v4099_v34 }
 0x277   : > { %v1884_v16 = vpop.f32.mrb[196].mxu0  ;;  %v2529_v10 = vpop.f32.mrb[196].mxu1 }
 0x278   : > { %4838 = vst.msk [vmem:[%s7754_s18 + $0x308] sm:$0xff] %vm556_vm1, %v4581_v4  ;;  %4967 = vst.msk [vmem:[%s7754_s18 + $0x710] sm:$0xff] %vm556_vm1, %v4710_v29  ;;  %v1885_v2 = vadd.f32 %v9764_v5, %v1884_v16  ;;  %v2530_v3 = vadd.f32 %v9764_v5, %v2529_v10  ;;  %v6325_v6 = vpop.f32.mrb[197].mxu0  ;;  %v6712_v20 = vpop.f32.mrb[197].mxu1  ;;  %v10441_v16 = vld [vmem:[#allocation58_spill] sm:$0xff] }
 0x279   : > { %v4330_v10 = vmul.f32 %v9779_v62, %v10441_v16  ;;  %v4104_v6 = vpop.permute.xlu1 %4103 }
 0x27a   : > { %v4582_v56 = vadd.f32 %v4325_v44, %v1885_v2  ;;  %v4711_v13 = vadd.f32 %v4454_v40, %v2530_v3  ;;  %v4460_v46 = vmul.f32 %v9779_v62, %v4104_v6 }
 0x27b   : > { %v1889_v14 = vpop.f32.mrb[198].mxu0  ;;  %v2534_v57 = vpop.f32.mrb[198].mxu1 }
 0x27c   : > { %4839 = vst.msk [vmem:[%s7754_s18 + $0x310] sm:$0xff] %vm556_vm1, %v4582_v56  ;;  %4968 = vst.msk [vmem:[%s7754_s18 + $0x718] sm:$0xff] %vm556_vm1, %v4711_v13  ;;  %v1890_v25 = vadd.f32 %v9764_v5, %v1889_v14  ;;  %v2535_v19 = vadd.f32 %v9764_v5, %v2534_v57  ;;  %v6328_v43 = vpop.f32.mrb[199].mxu0  ;;  %v6715_v26 = vpop.f32.mrb[199].mxu1  ;;  %v10442_v14 = vld [vmem:[#allocation61_spill] sm:$0xff] }
 0x27d   : > { %v4331_v57 = vmul.f32 %v9779_v62, %v10442_v14  ;;  %v4109_v43 = vpop.permute.xlu0 %4108 }
 0x27e   : > { %v4583_v50 = vadd.f32 %v4326_v48, %v1890_v25  ;;  %v4712_v9 = vadd.f32 %v4455_v28, %v2535_v19  ;;  %v4461_v17 = vmul.f32 %v9779_v62, %v4109_v43 }
 0x27f   : > { %v1894_v53 = vpop.f32.mrb[200].mxu0  ;;  %v2539_v36 = vpop.f32.mrb[200].mxu1 }
 0x280   : > { %4840 = vst.msk [vmem:[%s7754_s18 + $0x318] sm:$0xff] %vm556_vm1, %v4583_v50  ;;  %4969 = vst.msk [vmem:[%s7754_s18 + $0x720] sm:$0xff] %vm556_vm1, %v4712_v9  ;;  %v1895_v38 = vadd.f32 %v9764_v5, %v1894_v53  ;;  %v2540_v0 = vadd.f32 %v9764_v5, %v2539_v36  ;;  %v6331_v47 = vpop.f32.mrb[201].mxu0  ;;  %v6718_v22 = vpop.f32.mrb[201].mxu1  ;;  %v10443_v53 = vld [vmem:[#allocation60_spill] sm:$0xff] }
 0x281   : > { %v4332_v36 = vmul.f32 %v9779_v62, %v10443_v53  ;;  %v4114_v47 = vpop.permute.xlu1 %4113 }
 0x282   : > { %v4584_v35 = vadd.f32 %v4327_v7, %v1895_v38  ;;  %v4713_v12 = vadd.f32 %v4456_v15, %v2540_v0  ;;  %v4462_v52 = vmul.f32 %v9779_v62, %v4114_v47 }
 0x283   : > { %v1899_v21 = vpop.f32.mrb[202].mxu0  ;;  %v2544_v59 = vpop.f32.mrb[202].mxu1 }
 0x284   : > { %4841 = vst.msk [vmem:[%s7754_s18 + $0x320] sm:$0xff] %vm556_vm1, %v4584_v35  ;;  %4970 = vst.msk [vmem:[%s7754_s18 + $0x728] sm:$0xff] %vm556_vm1, %v4713_v12  ;;  %v1900_v55 = vadd.f32 %v9764_v5, %v1899_v21  ;;  %v2545_v18 = vadd.f32 %v9764_v5, %v2544_v59  ;;  %v6334_v60 = vpop.f32.mrb[203].mxu0  ;;  %v6721_v33 = vpop.f32.mrb[203].mxu1  ;;  %v10444_v21 = vld [vmem:[#allocation63_spill] sm:$0xff] }
 0x285   : > { %v4333_v59 = vmul.f32 %v9779_v62, %v10444_v21  ;;  %v4119_v60 = vpop.permute.xlu0 %4118 }
 0x286   : > { %v4585_v42 = vadd.f32 %v4328_v11, %v1900_v55  ;;  %v4714_v37 = vadd.f32 %v4457_v54, %v2545_v18  ;;  %v4463_v61 = vmul.f32 %v9779_v62, %v4119_v60 }
 0x287   : > { %v1904_v23 = vpop.f32.mrb[204].mxu0  ;;  %v2549_v1 = vpop.f32.mrb[204].mxu1 }
 0x288   : > { %4842 = vst.msk [vmem:[%s7754_s18 + $0x328] sm:$0xff] %vm556_vm1, %v4585_v42  ;;  %4971 = vst.msk [vmem:[%s7754_s18 + $0x730] sm:$0xff] %vm556_vm1, %v4714_v37  ;;  %v1905_v8 = vadd.f32 %v9764_v5, %v1904_v23  ;;  %v2550_v32 = vadd.f32 %v9764_v5, %v2549_v1  ;;  %v6337_v51 = vpop.f32.mrb[205].mxu0  ;;  %v6724_v24 = vpop.f32.mrb[205].mxu1  ;;  %v10445_v23 = vld [vmem:[#allocation62_spill] sm:$0xff] }
 0x289   : > { %v4334_v1 = vmul.f32 %v9779_v62, %v10445_v23  ;;  %v4124_v51 = vpop.permute.xlu1 %4123 }
 0x28a   : > { %v4586_v30 = vadd.f32 %v4329_v39, %v1905_v8  ;;  %v4715_v41 = vadd.f32 %v4458_v31, %v2550_v32  ;;  %v4464_v16 = vmul.f32 %v9779_v62, %v4124_v51 }
 0x28b   : > { %v1909_v4 = vpop.f32.mrb[206].mxu0  ;;  %v2554_v29 = vpop.f32.mrb[206].mxu1 }
 0x28c   : > { %4843 = vst.msk [vmem:[%s7754_s18 + $0x330] sm:$0xff] %vm556_vm1, %v4586_v30  ;;  %4972 = vst.msk [vmem:[%s7754_s18 + $0x738] sm:$0xff] %vm556_vm1, %v4715_v41  ;;  %v1910_v44 = vadd.f32 %v9764_v5, %v1909_v4  ;;  %v2555_v40 = vadd.f32 %v9764_v5, %v2554_v29  ;;  %v6340_v2 = vpop.f32.mrb[207].mxu0  ;;  %v6727_v3 = vpop.f32.mrb[207].mxu1  ;;  %v10446_v4 = vld [vmem:[#allocation65_spill] sm:$0xff] }
 0x28d   : > { %v4335_v29 = vmul.f32 %v9779_v62, %v10446_v4  ;;  %v4129_v2 = vpop.permute.xlu0 %4128 }
 0x28e   : > { %v4587_v20 = vadd.f32 %v4330_v10, %v1910_v44  ;;  %v4716_v49 = vadd.f32 %v4459_v63, %v2555_v40  ;;  %v4465_v14 = vmul.f32 %v9779_v62, %v4129_v2 }
 0x28f   : > { %v1914_v56 = vpop.f32.mrb[208].mxu0  ;;  %v2559_v13 = vpop.f32.mrb[208].mxu1 }
 0x290   : > { %4844 = vst.msk [vmem:[%s7754_s18 + $0x338] sm:$0xff] %vm556_vm1, %v4587_v20  ;;  %4973 = vst.msk [vmem:[%s7754_s18 + $0x740] sm:$0xff] %vm556_vm1, %v4716_v49  ;;  %v1915_v48 = vadd.f32 %v9764_v5, %v1914_v56  ;;  %v2560_v28 = vadd.f32 %v9764_v5, %v2559_v13  ;;  %v6343_v25 = vpop.f32.mrb[209].mxu0  ;;  %v6730_v19 = vpop.f32.mrb[209].mxu1  ;;  %v10447_v56 = vld [vmem:[#allocation64_spill] sm:$0xff] }
 0x291   : > { %v4336_v13 = vmul.f32 %v9779_v62, %v10447_v56  ;;  %v4134_v25 = vpop.permute.xlu1 %4133 }
 0x292   : > { %v4588_v26 = vadd.f32 %v4331_v57, %v1915_v48  ;;  %v4717_v45 = vadd.f32 %v4460_v46, %v2560_v28  ;;  %v4466_v53 = vmul.f32 %v9779_v62, %v4134_v25 }
 0x293   : > { %v1919_v50 = vpop.f32.mrb[210].mxu0  ;;  %v2564_v9 = vpop.f32.mrb[210].mxu1 }
 0x294   : > { %4845 = vst.msk [vmem:[%s7754_s18 + $0x340] sm:$0xff] %vm556_vm1, %v4588_v26  ;;  %4974 = vst.msk [vmem:[%s7754_s18 + $0x748] sm:$0xff] %vm556_vm1, %v4717_v45  ;;  %v1920_v7 = vadd.f32 %v9764_v5, %v1919_v50  ;;  %v2565_v15 = vadd.f32 %v9764_v5, %v2564_v9  ;;  %v6346_v38 = vpop.f32.mrb[211].mxu0  ;;  %v6733_v0 = vpop.f32.mrb[211].mxu1  ;;  %v10448_v50 = vld [vmem:[#allocation67_spill] sm:$0xff] }
 0x295   : > { %v4337_v9 = vmul.f32 %v9779_v62, %v10448_v50  ;;  %v4139_v38 = vpop.permute.xlu0 %4138 }
 0x296   : > { %v4589_v22 = vadd.f32 %v4332_v36, %v1920_v7  ;;  %v4718_v58 = vadd.f32 %v4461_v17, %v2565_v15  ;;  %v4467_v21 = vmul.f32 %v9779_v62, %v4139_v38 }
 0x297   : > { %v1924_v35 = vpop.f32.mrb[212].mxu0  ;;  %v2569_v12 = vpop.f32.mrb[212].mxu1 }
 0x298   : > { %4846 = vst.msk [vmem:[%s7754_s18 + $0x348] sm:$0xff] %vm556_vm1, %v4589_v22  ;;  %4975 = vst.msk [vmem:[%s7754_s18 + $0x750] sm:$0xff] %vm556_vm1, %v4718_v58  ;;  %v1925_v11 = vadd.f32 %v9764_v5, %v1924_v35  ;;  %v2570_v54 = vadd.f32 %v9764_v5, %v2569_v12  ;;  %v6349_v55 = vpop.f32.mrb[213].mxu0  ;;  %v6736_v18 = vpop.f32.mrb[213].mxu1  ;;  %v10449_v35 = vld [vmem:[#allocation66_spill] sm:$0xff] }
 0x299   : > { %v4338_v12 = vmul.f32 %v9779_v62, %v10449_v35  ;;  %v4144_v55 = vpop.permute.xlu1 %4143 }
 0x29a   : > { %v4590_v33 = vadd.f32 %v4333_v59, %v1925_v11  ;;  %v4719_v27 = vadd.f32 %v4462_v52, %v2570_v54  ;;  %v4468_v23 = vmul.f32 %v9779_v62, %v4144_v55 }
 0x29b   : > { %v1929_v42 = vpop.f32.mrb[214].mxu0  ;;  %v2574_v37 = vpop.f32.mrb[214].mxu1 }
 0x29c   : > { %4847 = vst.msk [vmem:[%s7754_s18 + $0x350] sm:$0xff] %vm556_vm1, %v4590_v33  ;;  %4976 = vst.msk [vmem:[%s7754_s18 + $0x758] sm:$0xff] %vm556_vm1, %v4719_v27  ;;  %v1930_v39 = vadd.f32 %v9764_v5, %v1929_v42  ;;  %v2575_v31 = vadd.f32 %v9764_v5, %v2574_v37  ;;  %v6352_v8 = vpop.f32.mrb[215].mxu0  ;;  %v6739_v32 = vpop.f32.mrb[215].mxu1  ;;  %v10450_v42 = vld [vmem:[#allocation69_spill] sm:$0xff] }
 0x29d   : > { %v4339_v37 = vmul.f32 %v9779_v62, %v10450_v42  ;;  %v4149_v8 = vpop.permute.xlu0 %4148 }
 0x29e   : > { %v4591_v24 = vadd.f32 %v4334_v1, %v1930_v39  ;;  %v4720_v34 = vadd.f32 %v4463_v61, %v2575_v31  ;;  %v4469_v4 = vmul.f32 %v9779_v62, %v4149_v8 }
 0x29f   : > { %v1934_v30 = vpop.f32.mrb[216].mxu0  ;;  %v2579_v41 = vpop.f32.mrb[216].mxu1 }
 0x2a0   : > { %4848 = vst.msk [vmem:[%s7754_s18 + $0x358] sm:$0xff] %vm556_vm1, %v4591_v24  ;;  %4977 = vst.msk [vmem:[%s7754_s18 + $0x760] sm:$0xff] %vm556_vm1, %v4720_v34  ;;  %v1935_v10 = vadd.f32 %v9764_v5, %v1934_v30  ;;  %v2580_v63 = vadd.f32 %v9764_v5, %v2579_v41  ;;  %v6355_v44 = vpop.f32.mrb[217].mxu0  ;;  %v6742_v40 = vpop.f32.mrb[217].mxu1  ;;  %v10451_v30 = vld [vmem:[#allocation68_spill] sm:$0xff] }
 0x2a1   : > { %v4340_v41 = vmul.f32 %v9779_v62, %v10451_v30  ;;  %v4154_v44 = vpop.permute.xlu1 %4153 }
 0x2a2   : > { %v4592_v3 = vadd.f32 %v4335_v29, %v1935_v10  ;;  %v4721_v6 = vadd.f32 %v4464_v16, %v2580_v63  ;;  %v4470_v56 = vmul.f32 %v9779_v62, %v4154_v44 }
 0x2a3   : > { %v1939_v20 = vpop.f32.mrb[218].mxu0  ;;  %v2584_v49 = vpop.f32.mrb[218].mxu1 }
 0x2a4   : > { %4849 = vst.msk [vmem:[%s7754_s18 + $0x360] sm:$0xff] %vm556_vm1, %v4592_v3  ;;  %4978 = vst.msk [vmem:[%s7754_s18 + $0x768] sm:$0xff] %vm556_vm1, %v4721_v6  ;;  %v1940_v57 = vadd.f32 %v9764_v5, %v1939_v20  ;;  %v2585_v46 = vadd.f32 %v9764_v5, %v2584_v49  ;;  %v6358_v48 = vpop.f32.mrb[219].mxu0  ;;  %v6745_v28 = vpop.f32.mrb[219].mxu1  ;;  %v10452_v20 = vld [vmem:[#allocation71_spill] sm:$0xff] }
 0x2a5   : > { %v4341_v49 = vmul.f32 %v9779_v62, %v10452_v20  ;;  %v4159_v48 = vpop.permute.xlu0 %4158 }
 0x2a6   : > { %v4593_v19 = vadd.f32 %v4336_v13, %v1940_v57  ;;  %v4722_v43 = vadd.f32 %v4465_v14, %v2585_v46  ;;  %v4471_v50 = vmul.f32 %v9779_v62, %v4159_v48 }
 0x2a7   : > { %v1944_v26 = vpop.f32.mrb[220].mxu0  ;;  %v2589_v45 = vpop.f32.mrb[220].mxu1 }
 0x2a8   : > { %4850 = vst.msk [vmem:[%s7754_s18 + $0x368] sm:$0xff] %vm556_vm1, %v4593_v19  ;;  %4979 = vst.msk [vmem:[%s7754_s18 + $0x770] sm:$0xff] %vm556_vm1, %v4722_v43  ;;  %v1945_v36 = vadd.f32 %v9764_v5, %v1944_v26  ;;  %v2590_v17 = vadd.f32 %v9764_v5, %v2589_v45  ;;  %v6361_v7 = vpop.f32.mrb[221].mxu0  ;;  %v6748_v15 = vpop.f32.mrb[221].mxu1  ;;  %v10453_v26 = vld [vmem:[#allocation70_spill] sm:$0xff] }
 0x2a9   : > { %v4342_v45 = vmul.f32 %v9779_v62, %v10453_v26  ;;  %v4164_v7 = vpop.permute.xlu1 %4163 }
 0x2aa   : > { %v4594_v0 = vadd.f32 %v4337_v9, %v1945_v36  ;;  %v4723_v47 = vadd.f32 %v4466_v53, %v2590_v17  ;;  %v4472_v35 = vmul.f32 %v9779_v62, %v4164_v7 }
 0x2ab   : > { %v1949_v22 = vpop.f32.mrb[222].mxu0  ;;  %v2594_v58 = vpop.f32.mrb[222].mxu1 }
 0x2ac   : > { %4851 = vst.msk [vmem:[%s7754_s18 + $0x370] sm:$0xff] %vm556_vm1, %v4594_v0  ;;  %4980 = vst.msk [vmem:[%s7754_s18 + $0x778] sm:$0xff] %vm556_vm1, %v4723_v47  ;;  %v1950_v59 = vadd.f32 %v9764_v5, %v1949_v22  ;;  %v2595_v52 = vadd.f32 %v9764_v5, %v2594_v58  ;;  %v6364_v11 = vpop.f32.mrb[223].mxu0  ;;  %v6751_v54 = vpop.f32.mrb[223].mxu1  ;;  %v10454_v22 = vld [vmem:[#allocation73_spill] sm:$0xff] }
 0x2ad   : > { %v4343_v58 = vmul.f32 %v9779_v62, %v10454_v22  ;;  %v4169_v11 = vpop.permute.xlu0 %4168 }
 0x2ae   : > { %v4595_v18 = vadd.f32 %v4338_v12, %v1950_v59  ;;  %v4724_v60 = vadd.f32 %v4467_v21, %v2595_v52  ;;  %v4473_v42 = vmul.f32 %v9779_v62, %v4169_v11 }
 0x2af   : > { %v1954_v33 = vpop.f32.mrb[224].mxu0  ;;  %v2599_v27 = vpop.f32.mrb[224].mxu1 }
 0x2b0   : > { %4852 = vst.msk [vmem:[%s7754_s18 + $0x378] sm:$0xff] %vm556_vm1, %v4595_v18  ;;  %4981 = vst.msk [vmem:[%s7754_s18 + $0x780] sm:$0xff] %vm556_vm1, %v4724_v60  ;;  %v1955_v1 = vadd.f32 %v9764_v5, %v1954_v33  ;;  %v2600_v61 = vadd.f32 %v9764_v5, %v2599_v27  ;;  %v6367_v39 = vpop.f32.mrb[225].mxu0  ;;  %v6754_v31 = vpop.f32.mrb[225].mxu1  ;;  %v10455_v33 = vld [vmem:[#allocation72_spill] sm:$0xff] }
 0x2b1   : > { %v4344_v27 = vmul.f32 %v9779_v62, %v10455_v33  ;;  %v4174_v39 = vpop.permute.xlu1 %4173 }
 0x2b2   : > { %v4596_v32 = vadd.f32 %v4339_v37, %v1955_v1  ;;  %v4725_v51 = vadd.f32 %v4468_v23, %v2600_v61  ;;  %v4474_v30 = vmul.f32 %v9779_v62, %v4174_v39 }
 0x2b3   : > { %v1959_v24 = vpop.f32.mrb[226].mxu0  ;;  %v2604_v34 = vpop.f32.mrb[226].mxu1 }
 0x2b4   : > { %4853 = vst.msk [vmem:[%s7754_s18 + $0x380] sm:$0xff] %vm556_vm1, %v4596_v32  ;;  %4982 = vst.msk [vmem:[%s7754_s18 + $0x788] sm:$0xff] %vm556_vm1, %v4725_v51  ;;  %v1960_v29 = vadd.f32 %v9764_v5, %v1959_v24  ;;  %v2605_v16 = vadd.f32 %v9764_v5, %v2604_v34  ;;  %v6370_v10 = vpop.f32.mrb[227].mxu0  ;;  %v6757_v63 = vpop.f32.mrb[227].mxu1  ;;  %v10456_v24 = vld [vmem:[#allocation75_spill] sm:$0xff] }
 0x2b5   : > { %v4345_v34 = vmul.f32 %v9779_v62, %v10456_v24  ;;  %v4179_v10 = vpop.permute.xlu0 %4178 }
 0x2b6   : > { %v4597_v40 = vadd.f32 %v4340_v41, %v1960_v29  ;;  %v4726_v2 = vadd.f32 %v4469_v4, %v2605_v16  ;;  %v4475_v20 = vmul.f32 %v9779_v62, %v4179_v10 }
 0x2b7   : > { %v1964_v3 = vpop.f32.mrb[228].mxu0  ;;  %v2609_v6 = vpop.f32.mrb[228].mxu1 }
 0x2b8   : > { %4854 = vst.msk [vmem:[%s7754_s18 + $0x388] sm:$0xff] %vm556_vm1, %v4597_v40  ;;  %4983 = vst.msk [vmem:[%s7754_s18 + $0x790] sm:$0xff] %vm556_vm1, %v4726_v2  ;;  %v1965_v13 = vadd.f32 %v9764_v5, %v1964_v3  ;;  %v2610_v14 = vadd.f32 %v9764_v5, %v2609_v6  ;;  %v6373_v57 = vpop.f32.mrb[229].mxu0  ;;  %v6760_v46 = vpop.f32.mrb[229].mxu1  ;;  %v10457_v3 = vld [vmem:[#allocation74_spill] sm:$0xff] }
 0x2b9   : > { %v4346_v6 = vmul.f32 %v9779_v62, %v10457_v3  ;;  %v4184_v57 = vpop.permute.xlu1 %4183 }
 0x2ba   : > { %v4598_v28 = vadd.f32 %v4341_v49, %v1965_v13  ;;  %v4727_v25 = vadd.f32 %v4470_v56, %v2610_v14  ;;  %v4476_v26 = vmul.f32 %v9779_v62, %v4184_v57 }
 0x2bb   : > { %v1969_v19 = vpop.f32.mrb[230].mxu0  ;;  %v2614_v43 = vpop.f32.mrb[230].mxu1 }
 0x2bc   : > { %4855 = vst.msk [vmem:[%s7754_s18 + $0x390] sm:$0xff] %vm556_vm1, %v4598_v28  ;;  %4984 = vst.msk [vmem:[%s7754_s18 + $0x798] sm:$0xff] %vm556_vm1, %v4727_v25  ;;  %v1970_v9 = vadd.f32 %v9764_v5, %v1969_v19  ;;  %v2615_v53 = vadd.f32 %v9764_v5, %v2614_v43  ;;  %v6376_v36 = vpop.f32.mrb[231].mxu0  ;;  %v6763_v17 = vpop.f32.mrb[231].mxu1  ;;  %v10458_v19 = vld [vmem:[#allocation77_spill] sm:$0xff] }
 0x2bd   : > { %v4347_v43 = vmul.f32 %v9779_v62, %v10458_v19  ;;  %v4189_v36 = vpop.permute.xlu0 %4188 }
 0x2be   : > { %v4599_v15 = vadd.f32 %v4342_v45, %v1970_v9  ;;  %v4728_v38 = vadd.f32 %v4471_v50, %v2615_v53  ;;  %v4477_v22 = vmul.f32 %v9779_v62, %v4189_v36 }
 0x2bf   : > { %v1974_v0 = vpop.f32.mrb[232].mxu0  ;;  %v2619_v47 = vpop.f32.mrb[232].mxu1 }
 0x2c0   : > { %4856 = vst.msk [vmem:[%s7754_s18 + $0x398] sm:$0xff] %vm556_vm1, %v4599_v15  ;;  %4985 = vst.msk [vmem:[%s7754_s18 + $0x7a0] sm:$0xff] %vm556_vm1, %v4728_v38  ;;  %v1975_v12 = vadd.f32 %v9764_v5, %v1974_v0  ;;  %v2620_v21 = vadd.f32 %v9764_v5, %v2619_v47  ;;  %v6379_v59 = vpop.f32.mrb[233].mxu0  ;;  %v6766_v52 = vpop.f32.mrb[233].mxu1  ;;  %v10459_v0 = vld [vmem:[#allocation76_spill] sm:$0xff] }
 0x2c1   : > { %v4348_v47 = vmul.f32 %v9779_v62, %v10459_v0  ;;  %v4194_v59 = vpop.permute.xlu1 %4193 }
 0x2c2   : > { %v4600_v54 = vadd.f32 %v4343_v58, %v1975_v12  ;;  %v4729_v55 = vadd.f32 %v4472_v35, %v2620_v21  ;;  %v4478_v33 = vmul.f32 %v9779_v62, %v4194_v59 }
 0x2c3   : > { %v1979_v18 = vpop.f32.mrb[234].mxu0  ;;  %v2624_v60 = vpop.f32.mrb[234].mxu1 }
 0x2c4   : > { %4857 = vst.msk [vmem:[%s7754_s18 + $0x3a0] sm:$0xff] %vm556_vm1, %v4600_v54  ;;  %4986 = vst.msk [vmem:[%s7754_s18 + $0x7a8] sm:$0xff] %vm556_vm1, %v4729_v55  ;;  %v1980_v37 = vadd.f32 %v9764_v5, %v1979_v18  ;;  %v2625_v23 = vadd.f32 %v9764_v5, %v2624_v60  ;;  %v6382_v1 = vpop.f32.mrb[235].mxu0  ;;  %v6769_v61 = vpop.f32.mrb[235].mxu1  ;;  %v10460_v18 = vld [vmem:[#allocation79_spill] sm:$0xff] }
 0x2c5   : > { %v4349_v60 = vmul.f32 %v9779_v62, %v10460_v18  ;;  %v4199_v1 = vpop.permute.xlu0 %4198 }
 0x2c6   : > { %v4601_v31 = vadd.f32 %v4344_v27, %v1980_v37  ;;  %v4730_v8 = vadd.f32 %v4473_v42, %v2625_v23  ;;  %v4479_v24 = vmul.f32 %v9779_v62, %v4199_v1 }
 0x2c7   : > { %v1984_v32 = vpop.f32.mrb[236].mxu0  ;;  %v2629_v51 = vpop.f32.mrb[236].mxu1 }
 0x2c8   : > { %4858 = vst.msk [vmem:[%s7754_s18 + $0x3a8] sm:$0xff] %vm556_vm1, %v4601_v31  ;;  %4987 = vst.msk [vmem:[%s7754_s18 + $0x7b0] sm:$0xff] %vm556_vm1, %v4730_v8  ;;  %v1985_v41 = vadd.f32 %v9764_v5, %v1984_v32  ;;  %v2630_v4 = vadd.f32 %v9764_v5, %v2629_v51  ;;  %v6385_v29 = vpop.f32.mrb[237].mxu0  ;;  %v6772_v16 = vpop.f32.mrb[237].mxu1  ;;  %v10461_v32 = vld [vmem:[#allocation78_spill] sm:$0xff] }
 0x2c9   : > { %v4350_v51 = vmul.f32 %v9779_v62, %v10461_v32  ;;  %v4204_v29 = vpop.permute.xlu1 %4203 }
 0x2ca   : > { %v4602_v63 = vadd.f32 %v4345_v34, %v1985_v41  ;;  %v4731_v44 = vadd.f32 %v4474_v30, %v2630_v4  ;;  %v4480_v3 = vmul.f32 %v9779_v62, %v4204_v29 }
 0x2cb   : > { %v1989_v40 = vpop.f32.mrb[238].mxu0  ;;  %v2634_v2 = vpop.f32.mrb[238].mxu1 }
 0x2cc   : > { %4859 = vst.msk [vmem:[%s7754_s18 + $0x3b0] sm:$0xff] %vm556_vm1, %v4602_v63  ;;  %4988 = vst.msk [vmem:[%s7754_s18 + $0x7b8] sm:$0xff] %vm556_vm1, %v4731_v44  ;;  %v1990_v49 = vadd.f32 %v9764_v5, %v1989_v40  ;;  %v2635_v56 = vadd.f32 %v9764_v5, %v2634_v2  ;;  %v6388_v13 = vpop.f32.mrb[239].mxu0  ;;  %v6775_v14 = vpop.f32.mrb[239].mxu1  ;;  %v10462_v40 = vld [vmem:[#allocation81_spill] sm:$0xff] }
 0x2cd   : > { %v4351_v2 = vmul.f32 %v9779_v62, %v10462_v40  ;;  %v4209_v13 = vpop.permute.xlu0 %4208 }
 0x2ce   : > { %v4603_v46 = vadd.f32 %v4346_v6, %v1990_v49  ;;  %v4732_v48 = vadd.f32 %v4475_v20, %v2635_v56  ;;  %v4481_v19 = vmul.f32 %v9779_v62, %v4209_v13 }
 0x2cf   : > { %v1994_v28 = vpop.f32.mrb[240].mxu0  ;;  %v2639_v25 = vpop.f32.mrb[240].mxu1 }
 0x2d0   : > { %4860 = vst.msk [vmem:[%s7754_s18 + $0x3b8] sm:$0xff] %vm556_vm1, %v4603_v46  ;;  %4989 = vst.msk [vmem:[%s7754_s18 + $0x7c0] sm:$0xff] %vm556_vm1, %v4732_v48  ;;  %v1995_v45 = vadd.f32 %v9764_v5, %v1994_v28  ;;  %v2640_v50 = vadd.f32 %v9764_v5, %v2639_v25  ;;  %v6391_v9 = vpop.f32.mrb[241].mxu0  ;;  %v6778_v53 = vpop.f32.mrb[241].mxu1  ;;  %v10463_v28 = vld [vmem:[#allocation80_spill] sm:$0xff] }
 0x2d1   : > { %v4352_v25 = vmul.f32 %v9779_v62, %v10463_v28  ;;  %v4214_v9 = vpop.permute.xlu1 %4213 }
 0x2d2   : > { %v4604_v17 = vadd.f32 %v4347_v43, %v1995_v45  ;;  %v4733_v7 = vadd.f32 %v4476_v26, %v2640_v50  ;;  %v4482_v0 = vmul.f32 %v9779_v62, %v4214_v9 }
 0x2d3   : > { %v1999_v15 = vpop.f32.mrb[242].mxu0  ;;  %v2644_v38 = vpop.f32.mrb[242].mxu1 }
 0x2d4   : > { %4861 = vst.msk [vmem:[%s7754_s18 + $0x3c0] sm:$0xff] %vm556_vm1, %v4604_v17  ;;  %4990 = vst.msk [vmem:[%s7754_s18 + $0x7c8] sm:$0xff] %vm556_vm1, %v4733_v7  ;;  %v2000_v58 = vadd.f32 %v9764_v5, %v1999_v15  ;;  %v2645_v35 = vadd.f32 %v9764_v5, %v2644_v38  ;;  %v6394_v12 = vpop.f32.mrb[243].mxu0  ;;  %v6781_v21 = vpop.f32.mrb[243].mxu1  ;;  %v10464_v15 = vld [vmem:[#allocation83_spill] sm:$0xff] }
 0x2d5   : > { %v4353_v38 = vmul.f32 %v9779_v62, %v10464_v15  ;;  %v4219_v12 = vpop.permute.xlu0 %4218 }
 0x2d6   : > { %v4605_v52 = vadd.f32 %v4348_v47, %v2000_v58  ;;  %v4734_v11 = vadd.f32 %v4477_v22, %v2645_v35  ;;  %v4483_v18 = vmul.f32 %v9779_v62, %v4219_v12 }
 0x2d7   : > { %v2004_v54 = vpop.f32.mrb[244].mxu0  ;;  %v2649_v55 = vpop.f32.mrb[244].mxu1 }
 0x2d8   : > { %4862 = vst.msk [vmem:[%s7754_s18 + $0x3c8] sm:$0xff] %vm556_vm1, %v4605_v52  ;;  %4991 = vst.msk [vmem:[%s7754_s18 + $0x7d0] sm:$0xff] %vm556_vm1, %v4734_v11  ;;  %v2005_v27 = vadd.f32 %v9764_v5, %v2004_v54  ;;  %v2650_v42 = vadd.f32 %v9764_v5, %v2649_v55  ;;  %v6397_v37 = vpop.f32.mrb[245].mxu0  ;;  %v6784_v23 = vpop.f32.mrb[245].mxu1  ;;  %v10465_v54 = vld [vmem:[#allocation82_spill] sm:$0xff] }
 0x2d9   : > { %v4354_v55 = vmul.f32 %v9779_v62, %v10465_v54 }
 0x2da   : > { %v4606_v61 = vadd.f32 %v4349_v60, %v2005_v27  ;;  %v4735_v39 = vadd.f32 %v4478_v33, %v2650_v42 }
 0x2db   : > { %v2009_v31 = vpop.f32.mrb[246].mxu0  ;;  %v2654_v8 = vpop.f32.mrb[246].mxu1 }
 0x2dc   : > { %4863 = vst.msk [vmem:[%s7754_s18 + $0x3d0] sm:$0xff] %vm556_vm1, %v4606_v61  ;;  %4992 = vst.msk [vmem:[%s7754_s18 + $0x7d8] sm:$0xff] %vm556_vm1, %v4735_v39  ;;  %v2010_v34 = vadd.f32 %v9764_v5, %v2009_v31  ;;  %v2655_v30 = vadd.f32 %v9764_v5, %v2654_v8  ;;  %v6400_v41 = vpop.f32.mrb[247].mxu0  ;;  %v6787_v4 = vpop.f32.mrb[247].mxu1  ;;  %v10466_v61 = vld [vmem:[#allocation84_spill] sm:$0xff] }
 0x2dd   : > { %v4355_v39 = vmul.f32 %v9779_v62, %v10466_v61 }
 0x2de   : > { %v4607_v16 = vadd.f32 %v4350_v51, %v2010_v34  ;;  %v4736_v10 = vadd.f32 %v4479_v24, %v2655_v30 }
 0x2df   : > { %v2014_v63 = vpop.f32.mrb[248].mxu0  ;;  %v2659_v44 = vpop.f32.mrb[248].mxu1 }
 0x2e0   : > { %4864 = vst.msk [vmem:[%s7754_s18 + $0x3d8] sm:$0xff] %vm556_vm1, %v4607_v16  ;;  %4993 = vst.msk [vmem:[%s7754_s18 + $0x7e0] sm:$0xff] %vm556_vm1, %v4736_v10  ;;  %v2015_v6 = vadd.f32 %v9764_v5, %v2014_v63  ;;  %v2660_v20 = vadd.f32 %v9764_v5, %v2659_v44  ;;  %v6403_v49 = vpop.f32.mrb[249].mxu0  ;;  %v6790_v56 = vpop.f32.mrb[249].mxu1 }
 0x2e2   : > { %v4608_v14 = vadd.f32 %v4351_v2, %v2015_v6  ;;  %v4737_v57 = vadd.f32 %v4480_v3, %v2660_v20 }
 0x2e3   : > { %v2019_v46 = vpop.f32.mrb[250].mxu0  ;;  %v2664_v48 = vpop.f32.mrb[250].mxu1 }
 0x2e4   : > { %4865 = vst.msk [vmem:[%s7754_s18 + $0x3e0] sm:$0xff] %vm556_vm1, %v4608_v14  ;;  %4994 = vst.msk [vmem:[%s7754_s18 + $0x7e8] sm:$0xff] %vm556_vm1, %v4737_v57  ;;  %v2020_v43 = vadd.f32 %v9764_v5, %v2019_v46  ;;  %v2665_v26 = vadd.f32 %v9764_v5, %v2664_v48  ;;  %v6406_v45 = vpop.f32.mrb[251].mxu0  ;;  %v6793_v50 = vpop.f32.mrb[251].mxu1 }
 0x2e6   : > { %v4609_v53 = vadd.f32 %v4352_v25, %v2020_v43  ;;  %v4738_v36 = vadd.f32 %v4481_v19, %v2665_v26 }
 0x2e7   : > { %v2024_v17 = vpop.f32.mrb[252].mxu0  ;;  %v2669_v7 = vpop.f32.mrb[252].mxu1 }
 0x2e8   : > { %4866 = vst.msk [vmem:[%s7754_s18 + $0x3e8] sm:$0xff] %vm556_vm1, %v4609_v53  ;;  %4995 = vst.msk [vmem:[%s7754_s18 + $0x7f0] sm:$0xff] %vm556_vm1, %v4738_v36  ;;  %v2025_v47 = vadd.f32 %v9764_v5, %v2024_v17  ;;  %v2670_v22 = vadd.f32 %v9764_v5, %v2669_v7  ;;  %v6409_v58 = vpop.f32.mrb[253].mxu0  ;;  %v6796_v35 = vpop.f32.mrb[253].mxu1 }
 0x2ea   : > { %v4610_v21 = vadd.f32 %v4353_v38, %v2025_v47  ;;  %v4739_v59 = vadd.f32 %v4482_v0, %v2670_v22 }
 0x2eb   : > { %v2029_v52 = vpop.f32.mrb[254].mxu0  ;;  %v2674_v11 = vpop.f32.mrb[254].mxu1 }
 0x2ec   : > { %4867 = vst.msk [vmem:[%s7754_s18 + $0x3f0] sm:$0xff] %vm556_vm1, %v4610_v21  ;;  %4996 = vst.msk [vmem:[%s7754_s18 + $0x7f8] sm:$0xff] %vm556_vm1, %v4739_v59  ;;  %v2030_v60 = vadd.f32 %v9764_v5, %v2029_v52  ;;  %v2675_v33 = vadd.f32 %v9764_v5, %v2674_v11  ;;  %v6412_v27 = vpop.f32.mrb[255].mxu0  ;;  %v6799_v42 = vpop.f32.mrb[255].mxu1 }
 0x2ee   : > { %v4611_v37 = vadd.f32 %v4354_v55, %v2030_v60  ;;  %v4740_v23 = vadd.f32 %v4483_v18, %v2675_v33  ;;  %5004 = sbr.rel (!%p7060_p4) target bundleno = 829 (0x33d), region = 44 }
 0x2ef   : > { %v2034_v1 = vpop.f32.mrb[0].mxu0 }
 0x2f0   : > { %4868 = vst.msk [vmem:[%s7754_s18 + $0x3f8] sm:$0xff] %vm556_vm1, %v4611_v37  ;;  %4997 = vst.msk [vmem:[%s7754_s18 + $0x800] sm:$0xff] %vm556_vm1, %v4740_v23  ;;  %v2035_v31 = vadd.f32 %v9764_v5, %v2034_v1  ;;  %v6415_v8 = vpop.f32.mrb[1].mxu0 }
 0x2f2   : > { %v4612_v32 = vadd.f32 %v4355_v39, %v2035_v31 }
 0x2f4   : > { %4869 = vst.msk [vmem:[%s7754_s18 + $0x400] sm:$0xff] %vm556_vm1, %v4612_v32 }
 0x2f5   : > { %s10476_s29 = smov (!%p5007_p8, %s5006_s29), 257 }
 0x2f6   : > { %s5742_s9 = sshll.u32 %s10476_s29, 7 }
 0x2f7   : > { %p5745_p9 = scmp.eq.s32.totalorder %s5742_s9, 0 }
 0x2f8   : > { %s10100_s11 = sshrl.u32 (!%p5745_p9), %s10476_s29, 6 }
 0x2f9   : > { %5015 = sbr.rel (%p5745_p9) target bundleno = 829 (0x33d), region = 48  ;;  %p5746_p10 = scmp.le.s32.totalorder (!%p5745_p9), %s10100_s11, 0 }
 0x300   : > { %5427 = sbr.rel (%p5746_p10) target bundleno = 808 (0x328), region = 127  ;;  %s10467_s21 = smov (!%p5746_p10), %s10094_s8 }
 0x301   : > { %s10468_s26 = smov (!%p5746_p10), %s7754_s18  ;;  %s10109_s10 = smov (!%p5746_p10), 0  }
 0x302   : > { %s10111_s12 = smov (!%p5746_p10), 0  }
 0x307 LB: >> { %v5203_v5 = vld [vmem:[%s6975_s26] sm:$0xff]  ;;  %v5205_v62 = vld [vmem:[%s6975_s26 + $0x8] sm:$0xff]  ;;  %v5207_v51 = vld [vmem:[%s6975_s26 + $0x10] sm:$0xff]  ;;  %s5331_s13 = sadd.s32 1, %s6979_s10  ;;  %s5197_s12 = sadd.s32 1, %s6983_s12   ;;  %s6983_s12 = sphi %s10111_s12, %s5197_s12   ;;  %s6979_s10 = sphi %s10109_s10, %s10471_s10   ;;  %s6975_s26 = sphi %s10468_s26, %s10470_s26   ;;  %s6971_s21 = sphi %s10467_s21, %s10469_s21  }
 0x308   : >> { %5204 = vst [vmem:[%s6971_s21] sm:$0xff] %v5203_v5  ;;  %5206 = vst [vmem:[%s6971_s21 + $0x8] sm:$0xff] %v5205_v62  ;;  %v5209_v24 = vld [vmem:[%s6975_s26 + $0x18] sm:$0xff]  ;;  %v5211_v34 = vld [vmem:[%s6975_s26 + $0x20] sm:$0xff]  ;;  %p5332_p11 = scmp.ge.s32.totalorder %s5331_s13, %s10100_s11  ;;  %p5196_p12 = scmp.ge.s32.totalorder %s5197_s12, %s10100_s11 }
 0x309   : >> { %5208 = vst [vmem:[%s6971_s21 + $0x10] sm:$0xff] %v5207_v51  ;;  %v5213_v30 = vld [vmem:[%s6975_s26 + $0x28] sm:$0xff]  ;;  %5210 = vst [vmem:[%s6971_s21 + $0x18] sm:$0xff] %v5209_v24  ;;  %v5215_v41 = vld [vmem:[%s6975_s26 + $0x30] sm:$0xff] }
 0x30a   : >> { %5212 = vst [vmem:[%s6971_s21 + $0x20] sm:$0xff] %v5211_v34  ;;  %5214 = vst [vmem:[%s6971_s21 + $0x28] sm:$0xff] %v5213_v30  ;;  %v5217_v4 = vld [vmem:[%s6975_s26 + $0x38] sm:$0xff]  ;;  %v5219_v29 = vld [vmem:[%s6975_s26 + $0x40] sm:$0xff]  ;;  %s10478_s13 = smov (%p5332_p11, %s5331_s13), 0 }
 0x30b   : >> { %5216 = vst [vmem:[%s6971_s21 + $0x30] sm:$0xff] %v5215_v41  ;;  %5218 = vst [vmem:[%s6971_s21 + $0x38] sm:$0xff] %v5217_v4  ;;  %v5221_v16 = vld [vmem:[%s6975_s26 + $0x48] sm:$0xff]  ;;  %v5223_v10 = vld [vmem:[%s6975_s26 + $0x50] sm:$0xff]  ;;  %s5747_s14 = sshll.u32 %s10478_s13, 9  ;;  %s10471_s10 = smov %s10478_s13 }
 0x30c   : >> { %5220 = vst [vmem:[%s6971_s21 + $0x40] sm:$0xff] %v5219_v29  ;;  %v5225_v63 = vld [vmem:[%s6975_s26 + $0x58] sm:$0xff]  ;;  %5222 = vst [vmem:[%s6971_s21 + $0x48] sm:$0xff] %v5221_v16  ;;  %v5227_v44 = vld [vmem:[%s6975_s26 + $0x60] sm:$0xff]  ;;  %s10167_s16 = scalar_lea.vmem %s7754_s18, %s5747_s14 [#allocation2]   ;;  %s10170_s17 = scalar_lea.vmem %s10094_s8, %s5747_s14  }
 0x30d   : >> { %5224 = vst [vmem:[%s6971_s21 + $0x50] sm:$0xff] %v5223_v10  ;;  %5226 = vst [vmem:[%s6971_s21 + $0x58] sm:$0xff] %v5225_v63  ;;  %v5229_v40 = vld [vmem:[%s6975_s26 + $0x68] sm:$0xff]  ;;  %v5231_v2 = vld [vmem:[%s6975_s26 + $0x70] sm:$0xff] }
 0x30e   : >> { %5228 = vst [vmem:[%s6971_s21 + $0x60] sm:$0xff] %v5227_v44  ;;  %5230 = vst [vmem:[%s6971_s21 + $0x68] sm:$0xff] %v5229_v40  ;;  %v5233_v3 = vld [vmem:[%s6975_s26 + $0x78] sm:$0xff]  ;;  %v5235_v6 = vld [vmem:[%s6975_s26 + $0x80] sm:$0xff] }
 0x30f   : >> { %5232 = vst [vmem:[%s6971_s21 + $0x70] sm:$0xff] %v5231_v2  ;;  %v5237_v20 = vld [vmem:[%s6975_s26 + $0x88] sm:$0xff]  ;;  %5234 = vst [vmem:[%s6971_s21 + $0x78] sm:$0xff] %v5233_v3  ;;  %v5239_v49 = vld [vmem:[%s6975_s26 + $0x90] sm:$0xff] }
 0x310   : >> { %5236 = vst [vmem:[%s6971_s21 + $0x80] sm:$0xff] %v5235_v6  ;;  %5238 = vst [vmem:[%s6971_s21 + $0x88] sm:$0xff] %v5237_v20  ;;  %v5241_v56 = vld [vmem:[%s6975_s26 + $0x98] sm:$0xff]  ;;  %v5243_v13 = vld [vmem:[%s6975_s26 + $0xa0] sm:$0xff] }
 0x311   : >> { %5240 = vst [vmem:[%s6971_s21 + $0x90] sm:$0xff] %v5239_v49  ;;  %5242 = vst [vmem:[%s6971_s21 + $0x98] sm:$0xff] %v5241_v56  ;;  %v5245_v14 = vld [vmem:[%s6975_s26 + $0xa8] sm:$0xff]  ;;  %v5247_v57 = vld [vmem:[%s6975_s26 + $0xb0] sm:$0xff] }
 0x312   : >> { %5244 = vst [vmem:[%s6971_s21 + $0xa0] sm:$0xff] %v5243_v13  ;;  %v5249_v46 = vld [vmem:[%s6975_s26 + $0xb8] sm:$0xff]  ;;  %5246 = vst [vmem:[%s6971_s21 + $0xa8] sm:$0xff] %v5245_v14  ;;  %v5251_v48 = vld [vmem:[%s6975_s26 + $0xc0] sm:$0xff] }
 0x313   : >> { %5248 = vst [vmem:[%s6971_s21 + $0xb0] sm:$0xff] %v5247_v57  ;;  %5250 = vst [vmem:[%s6971_s21 + $0xb8] sm:$0xff] %v5249_v46  ;;  %v5253_v28 = vld [vmem:[%s6975_s26 + $0xc8] sm:$0xff]  ;;  %v5255_v25 = vld [vmem:[%s6975_s26 + $0xd0] sm:$0xff] }
 0x314   : >> { %5252 = vst [vmem:[%s6971_s21 + $0xc0] sm:$0xff] %v5251_v48  ;;  %5254 = vst [vmem:[%s6971_s21 + $0xc8] sm:$0xff] %v5253_v28  ;;  %v5257_v19 = vld [vmem:[%s6975_s26 + $0xd8] sm:$0xff]  ;;  %v5259_v43 = vld [vmem:[%s6975_s26 + $0xe0] sm:$0xff] }
 0x315   : >> { %5256 = vst [vmem:[%s6971_s21 + $0xd0] sm:$0xff] %v5255_v25  ;;  %v5261_v26 = vld [vmem:[%s6975_s26 + $0xe8] sm:$0xff]  ;;  %5258 = vst [vmem:[%s6971_s21 + $0xd8] sm:$0xff] %v5257_v19  ;;  %v5263_v45 = vld [vmem:[%s6975_s26 + $0xf0] sm:$0xff] }
 0x316   : >> { %5260 = vst [vmem:[%s6971_s21 + $0xe0] sm:$0xff] %v5259_v43  ;;  %5262 = vst [vmem:[%s6971_s21 + $0xe8] sm:$0xff] %v5261_v26  ;;  %v5265_v50 = vld [vmem:[%s6975_s26 + $0xf8] sm:$0xff]  ;;  %v5267_v9 = vld [vmem:[%s6975_s26 + $0x100] sm:$0xff] }
 0x317   : >> { %5264 = vst [vmem:[%s6971_s21 + $0xf0] sm:$0xff] %v5263_v45  ;;  %5266 = vst [vmem:[%s6971_s21 + $0xf8] sm:$0xff] %v5265_v50  ;;  %v5269_v53 = vld [vmem:[%s6975_s26 + $0x108] sm:$0xff]  ;;  %v5271_v36 = vld [vmem:[%s6975_s26 + $0x110] sm:$0xff] }
 0x318   : >> { %5268 = vst [vmem:[%s6971_s21 + $0x100] sm:$0xff] %v5267_v9  ;;  %v5273_v17 = vld [vmem:[%s6975_s26 + $0x118] sm:$0xff]  ;;  %5270 = vst [vmem:[%s6971_s21 + $0x108] sm:$0xff] %v5269_v53  ;;  %v5275_v7 = vld [vmem:[%s6975_s26 + $0x120] sm:$0xff] }
 0x319   : >> { %5272 = vst [vmem:[%s6971_s21 + $0x110] sm:$0xff] %v5271_v36  ;;  %5274 = vst [vmem:[%s6971_s21 + $0x118] sm:$0xff] %v5273_v17  ;;  %v5277_v15 = vld [vmem:[%s6975_s26 + $0x128] sm:$0xff]  ;;  %v5279_v38 = vld [vmem:[%s6975_s26 + $0x130] sm:$0xff] }
 0x31a   : >> { %5276 = vst [vmem:[%s6971_s21 + $0x120] sm:$0xff] %v5275_v7  ;;  %5278 = vst [vmem:[%s6971_s21 + $0x128] sm:$0xff] %v5277_v15  ;;  %v5281_v0 = vld [vmem:[%s6975_s26 + $0x138] sm:$0xff]  ;;  %v5283_v47 = vld [vmem:[%s6975_s26 + $0x140] sm:$0xff] }
 0x31b   : >> { %5280 = vst [vmem:[%s6971_s21 + $0x130] sm:$0xff] %v5279_v38  ;;  %v5285_v22 = vld [vmem:[%s6975_s26 + $0x148] sm:$0xff]  ;;  %5282 = vst [vmem:[%s6971_s21 + $0x138] sm:$0xff] %v5281_v0  ;;  %v5287_v58 = vld [vmem:[%s6975_s26 + $0x150] sm:$0xff] }
 0x31c   : >> { %5284 = vst [vmem:[%s6971_s21 + $0x140] sm:$0xff] %v5283_v47  ;;  %5286 = vst [vmem:[%s6971_s21 + $0x148] sm:$0xff] %v5285_v22  ;;  %v5289_v35 = vld [vmem:[%s6975_s26 + $0x158] sm:$0xff]  ;;  %v5291_v12 = vld [vmem:[%s6975_s26 + $0x160] sm:$0xff] }
 0x31d   : >> { %5288 = vst [vmem:[%s6971_s21 + $0x150] sm:$0xff] %v5287_v58  ;;  %5290 = vst [vmem:[%s6971_s21 + $0x158] sm:$0xff] %v5289_v35  ;;  %v5293_v21 = vld [vmem:[%s6975_s26 + $0x168] sm:$0xff]  ;;  %v5295_v59 = vld [vmem:[%s6975_s26 + $0x170] sm:$0xff] }
 0x31e   : >> { %5292 = vst [vmem:[%s6971_s21 + $0x160] sm:$0xff] %v5291_v12  ;;  %v5297_v52 = vld [vmem:[%s6975_s26 + $0x178] sm:$0xff]  ;;  %5294 = vst [vmem:[%s6971_s21 + $0x168] sm:$0xff] %v5293_v21  ;;  %v5299_v11 = vld [vmem:[%s6975_s26 + $0x180] sm:$0xff] }
 0x31f   : >> { %5296 = vst [vmem:[%s6971_s21 + $0x170] sm:$0xff] %v5295_v59  ;;  %5298 = vst [vmem:[%s6971_s21 + $0x178] sm:$0xff] %v5297_v52  ;;  %v5301_v54 = vld [vmem:[%s6975_s26 + $0x188] sm:$0xff]  ;;  %v5303_v55 = vld [vmem:[%s6975_s26 + $0x190] sm:$0xff] }
 0x320   : >> { %5300 = vst [vmem:[%s6971_s21 + $0x180] sm:$0xff] %v5299_v11  ;;  %5302 = vst [vmem:[%s6971_s21 + $0x188] sm:$0xff] %v5301_v54  ;;  %v5305_v18 = vld [vmem:[%s6975_s26 + $0x198] sm:$0xff]  ;;  %v5307_v60 = vld [vmem:[%s6975_s26 + $0x1a0] sm:$0xff] }
 0x321   : >> { %5304 = vst [vmem:[%s6971_s21 + $0x190] sm:$0xff] %v5303_v55  ;;  %v5309_v33 = vld [vmem:[%s6975_s26 + $0x1a8] sm:$0xff]  ;;  %5306 = vst [vmem:[%s6971_s21 + $0x198] sm:$0xff] %v5305_v18  ;;  %v5311_v27 = vld [vmem:[%s6975_s26 + $0x1b0] sm:$0xff]  ;;  %5199 = sbr.rel (!%p5196_p12) target bundleno = 775 (0x307), region = 133 }
 0x322   : >> { %5308 = vst [vmem:[%s6971_s21 + $0x1a0] sm:$0xff] %v5307_v60  ;;  %5310 = vst [vmem:[%s6971_s21 + $0x1a8] sm:$0xff] %v5309_v33  ;;  %v5313_v42 = vld [vmem:[%s6975_s26 + $0x1b8] sm:$0xff]  ;;  %v5315_v37 = vld [vmem:[%s6975_s26 + $0x1c0] sm:$0xff] }
 0x323   : >> { %5312 = vst [vmem:[%s6971_s21 + $0x1b0] sm:$0xff] %v5311_v27  ;;  %5314 = vst [vmem:[%s6971_s21 + $0x1b8] sm:$0xff] %v5313_v42  ;;  %v5317_v23 = vld [vmem:[%s6975_s26 + $0x1c8] sm:$0xff]  ;;  %v5319_v1 = vld [vmem:[%s6975_s26 + $0x1d0] sm:$0xff] }
 0x324   : >> { %5316 = vst [vmem:[%s6971_s21 + $0x1c0] sm:$0xff] %v5315_v37  ;;  %v5321_v61 = vld [vmem:[%s6975_s26 + $0x1d8] sm:$0xff]  ;;  %5318 = vst [vmem:[%s6971_s21 + $0x1c8] sm:$0xff] %v5317_v23  ;;  %v5323_v39 = vld [vmem:[%s6975_s26 + $0x1e0] sm:$0xff] }
 0x325   : >> { %5320 = vst [vmem:[%s6971_s21 + $0x1d0] sm:$0xff] %v5319_v1  ;;  %5322 = vst [vmem:[%s6971_s21 + $0x1d8] sm:$0xff] %v5321_v61  ;;  %v5325_v31 = vld [vmem:[%s6975_s26 + $0x1e8] sm:$0xff]  ;;  %v5327_v8 = vld [vmem:[%s6975_s26 + $0x1f0] sm:$0xff] }
 0x326   : >> { %5324 = vst [vmem:[%s6971_s21 + $0x1e0] sm:$0xff] %v5323_v39  ;;  %5326 = vst [vmem:[%s6971_s21 + $0x1e8] sm:$0xff] %v5325_v31  ;;  %v5329_v32 = vld [vmem:[%s6975_s26 + $0x1f8] sm:$0xff]  ;;  %s10470_s26 = smov %s10167_s16 }
 0x327   : >> { %5328 = vst [vmem:[%s6971_s21 + $0x1f0] sm:$0xff] %v5327_v8  ;;  %5330 = vst [vmem:[%s6971_s21 + $0x1f8] sm:$0xff] %v5329_v32  ;;  %s10469_s21 = smov %s10170_s17 }
 0x328 PF: > { %s10275_s23 = sand.u32 63, %s10476_s29   ;;  %s5758_s24 = sshll.u32 %s10100_s11, 9 }
 0x329   : > { %s5342_s15 = scalar_lea.vmem %s7754_s18, %s5758_s24 [#allocation2]   ;;  %s5344_s20 = scalar_lea.vmem %s10094_s8, %s5758_s24  }
 0x32a   : > { %p5752_p13 = scmp.le.s32.totalorder %s10275_s23, 0 }
 0x32b   : > { %s6985_s27 = smov (!%p5752_p13), %s5344_s20   ;;  %s6989_s28 = smov (!%p5752_p13), %s5342_s15  }
 0x32c   : > { %5441 = sbr.rel (%p5752_p13) target bundleno = 829 (0x33d), region = 138  ;;  %s6993_s30 = smov (!%p5752_p13), 0  }
 0x32d   : > { %s6997_s6 = smov (!%p5752_p13), 0  }
 0x333 LB: >> { %v5354_v5 = vld [vmem:[%s6991_s28] sm:$0xff]  ;;  %s5356_s29 = sadd.s32 1, %s6995_s30  ;;  %s5348_s6 = sadd.s32 1, %s6999_s6   ;;  %s6999_s6 = sphi %s6997_s6, %s5348_s6   ;;  %s6995_s30 = sphi %s6993_s30, %s6994_s30   ;;  %s6991_s28 = sphi %s6989_s28, %s5361_s28   ;;  %s6987_s27 = sphi %s6985_s27, %s5362_s27  }
 0x334   : >> { %5355 = vst [vmem:[%s6987_s27] sm:$0xff] %v5354_v5  ;;  %p5357_p0 = scmp.ge.s32.totalorder %s5356_s29, %s10275_s23  ;;  %p5347_p1 = scmp.ge.s32.totalorder %s5348_s6, %s10275_s23 }
 0x336   : >> { %s10480_s29 = smov (%p5357_p0, %s5356_s29), 0  ;;  %5350 = sbr.rel (!%p5347_p1) target bundleno = 819 (0x333), region = 144 }
 0x337   : >> { %s5753_s18 = sshll.u32 %s10480_s29, 3  ;;  %s6994_s30 = smov %s10480_s29  }
 0x338   : >> { %s5361_s28 = scalar_lea.vmem %s5342_s15, %s5753_s18 [#allocation2]   ;;  %s5362_s27 = scalar_lea.vmem %s5344_s20, %s5753_s18  }
 0x33d PF: > { %p12_p2 = scmp.ge.s32.totalorder %s7050_s22, 4   ;;  %s10472_s18 = smov %s6963_s19 }
 0x33e   : > { %s10473_s19 = smov %s7058_s25  ;;  %s10474_s20 = smov %s7050_s22 }
 0x33f   :  { %14 = sbr.rel (!%p12_p2) target bundleno = 2 (0x2), region = 155 }

</bundles_post_ra>
